<compile_context>
chip_gen: v5e
topology: v5e:2x2
jax: 0.10.0
libtpu: 0.0.40
codegen_flags: <defaults>
</compile_context>

<pallas_src>
import functools

import jax
import jax.numpy as jnp
from jax.experimental import pallas as pl
from jax.experimental.pallas import tpu as pltpu


# Raise the scoped-VMEM default (16 MiB v5e / 32 MiB v6e-v7x) but stay under
# v7x's 64 MiB physical VMEM.
VMEM_LIMIT = 48 * 1024 * 1024


# ----------------------------------------------------------------------------
# helpers
# ----------------------------------------------------------------------------

def _round_up(n, m):
    return ((n + m - 1) // m) * m


def _pick_tile(dim, target, align):
    """Largest tile <= target that evenly divides dim (full dim if tiny/odd)."""
    if dim <= target:
        return dim
    if dim % target == 0:
        return target
    t = target
    while t >= align:
        if dim % t == 0:
            return t
        t -= align
    return dim


def _pad_rows(x2, max_tile=256):
    """Pad rows so M is a multiple of 8 (small M) or of max_tile (large M);
    avoids degenerate thin (8 x K) MXU tiles for awkward batch*seq sizes."""
    M = x2.shape[0]
    if M <= max_tile:
        Mp = _round_up(M, 8)
        tm = Mp
    else:
        Mp = _round_up(M, max_tile)
        tm = max_tile
    if Mp != M:
        x2 = jnp.pad(x2, ((0, Mp - M), (0, 0)))
    return x2, tm, M


def _pad_cols(w, b):
    """Pad output features to a 128-multiple so output stores stay lane-dense."""
    N = w.shape[-1]
    Np = _round_up(N, 128)
    if Np != N:
        w = jnp.pad(w, ((0, 0), (0, Np - N)))
        b = jnp.pad(b, ((0, Np - N),))
    return w, b, N, Np


# ----------------------------------------------------------------------------
# Pallas kernels
# ----------------------------------------------------------------------------

def _matmul_kernel(x_ref, w_ref, b_ref, o_ref, acc_ref, *, act):
    """Tiled y = act(x @ w + b); K is the last ('arbitrary') grid axis."""
    @pl.when(pl.program_id(2) == 0)
    def _():
        acc_ref[...] = jnp.zeros_like(acc_ref)

    acc_ref[...] += jnp.dot(x_ref[...], w_ref[...],
                            preferred_element_type=jnp.float32)

    @pl.when(pl.program_id(2) == pl.num_programs(2) - 1)
    def _():
        y = acc_ref[...] + b_ref[...]
        if act == "gelu":
            # TODO(synk): PyTorch nn.GELU default is exact erf; tanh approx used here.
            y = jax.nn.gelu(y, approximate=True)
        elif act == "relu":
            y = jnp.maximum(y, 0.0)
        o_ref[...] = y.astype(o_ref.dtype)


def pallas_linear(x, w, b, act=None):
    """y = act(x @ w + b).  x: (..., K), w: (K, N), b: (N,).  bf16 in/out,
    f32 VMEM accumulator."""
    lead = x.shape[:-1]
    K = x.shape[-1]
    x2 = x.reshape(-1, K).astype(jnp.bfloat16)
    x2, tm, M = _pad_rows(x2, 256)
    Mp = x2.shape[0]
    w, b, N, Np = _pad_cols(w.astype(jnp.bfloat16), b.astype(jnp.float32))
    tn = _pick_tile(Np, 512, 128)
    tk = _pick_tile(K, 512, 128)
    out = pl.pallas_call(
        functools.partial(_matmul_kernel, act=act),
        out_shape=jax.ShapeDtypeStruct((Mp, Np), jnp.bfloat16),
        grid=(Mp // tm, Np // tn, K // tk),
        in_specs=[
            pl.BlockSpec((tm, tk), lambda i, j, k: (i, k)),
            pl.BlockSpec((tk, tn), lambda i, j, k: (k, j)),
            pl.BlockSpec((1, tn), lambda i, j, k: (0, j)),
        ],
        out_specs=pl.BlockSpec((tm, tn), lambda i, j, k: (i, j)),
        scratch_shapes=[pltpu.VMEM((tm, tn), jnp.float32)],
        compiler_params=pltpu.CompilerParams(
            dimension_semantics=("parallel", "parallel", "arbitrary"),
            vmem_limit_bytes=VMEM_LIMIT),
    )(x2, w, b.reshape(1, Np))
    return out[:M, :N].reshape(*lead, N)


def _ln_matmul_kernel(x_ref, g_ref, bln_ref, w_ref, b_ref, o_ref, xn_ref, *, act):
    """Fused LayerNorm(x) @ w + b (+act).  LN stats in f32, computed once per
    row tile (j == 0) into a bf16 VMEM scratch and reused for every N tile."""
    @pl.when(pl.program_id(1) == 0)
    def _():
        x = x_ref[...].astype(jnp.float32)
        mu = jnp.mean(x, axis=-1, keepdims=True)
        var = jnp.mean(jnp.square(x - mu), axis=-1, keepdims=True)
        xn = (x - mu) * jax.lax.rsqrt(var + 1e-5) * g_ref[...] + bln_ref[...]
        xn_ref[...] = xn.astype(jnp.bfloat16)

    y = jnp.dot(xn_ref[...], w_ref[...],
                preferred_element_type=jnp.float32) + b_ref[...]
    if act == "gelu":
        y = jax.nn.gelu(y, approximate=True)
    elif act == "relu":
        y = jnp.maximum(y, 0.0)
    o_ref[...] = y.astype(o_ref.dtype)


def pallas_ln_linear(x, g, bln, w, b, act=None):
    """y = act(LayerNorm(x) @ w + b) fused in one kernel (when K fits a tile)."""
    lead = x.shape[:-1]
    K = x.shape[-1]
    if K > 8192:
        # TODO(synk): stream LN over K-tiles for very large model dims.
        return pallas_linear(pallas_layernorm(x, g, bln), w, b, act=act)
    x2 = x.reshape(-1, K).astype(jnp.bfloat16)
    x2, tm, M = _pad_rows(x2, 256)
    Mp = x2.shape[0]
    w, b, N, Np = _pad_cols(w.astype(jnp.bfloat16), b.astype(jnp.float32))
    tn = _pick_tile(Np, 512, 128)
    out = pl.pallas_call(
        functools.partial(_ln_matmul_kernel, act=act),
        out_shape=jax.ShapeDtypeStruct((Mp, Np), jnp.bfloat16),
        grid=(Mp // tm, Np // tn),
        in_specs=[
            pl.BlockSpec((tm, K), lambda i, j: (i, 0)),
            pl.BlockSpec((1, K), lambda i, j: (0, 0)),
            pl.BlockSpec((1, K), lambda i, j: (0, 0)),
            pl.BlockSpec((K, tn), lambda i, j: (0, j)),
            pl.BlockSpec((1, tn), lambda i, j: (0, j)),
        ],
        out_specs=pl.BlockSpec((tm, tn), lambda i, j: (i, j)),
        scratch_shapes=[pltpu.VMEM((tm, K), jnp.bfloat16)],
        compiler_params=pltpu.CompilerParams(
            # j stays on-core ("arbitrary") so the pl.when(j==0) LN scratch is
            # always populated before it is read on the same core.
            dimension_semantics=("parallel", "arbitrary"),
            vmem_limit_bytes=VMEM_LIMIT),
    )(x2, g.reshape(1, K).astype(jnp.float32),
      bln.reshape(1, K).astype(jnp.float32), w, b.reshape(1, Np))
    return out[:M, :N].reshape(*lead, N)


def _layernorm_kernel(x_ref, g_ref, b_ref, o_ref):
    x = x_ref[...].astype(jnp.float32)
    mu = jnp.mean(x, axis=-1, keepdims=True)
    var = jnp.mean(jnp.square(x - mu), axis=-1, keepdims=True)
    y = (x - mu) * jax.lax.rsqrt(var + 1e-5) * g_ref[...] + b_ref[...]
    o_ref[...] = y.astype(o_ref.dtype)


def pallas_layernorm(x, g, b):
    """Row-tiled LayerNorm over the last dim.  bf16 in/out, f32 stats."""
    lead = x.shape[:-1]
    D = x.shape[-1]
    x2 = x.reshape(-1, D).astype(jnp.bfloat16)
    x2, tm, M = _pad_rows(x2, 512)
    Mp = x2.shape[0]
    out = pl.pallas_call(
        _layernorm_kernel,
        out_shape=jax.ShapeDtypeStruct((Mp, D), jnp.bfloat16),
        grid=(Mp // tm,),
        in_specs=[
            pl.BlockSpec((tm, D), lambda i: (i, 0)),
            pl.BlockSpec((1, D), lambda i: (0, 0)),
            pl.BlockSpec((1, D), lambda i: (0, 0)),
        ],
        out_specs=pl.BlockSpec((tm, D), lambda i: (i, 0)),
        compiler_params=pltpu.CompilerParams(dimension_semantics=("parallel",)),
    )(x2, g.reshape(1, D).astype(jnp.float32), b.reshape(1, D).astype(jnp.float32))
    return out[:M].reshape(*lead, D)


def _attn_kernel(q_ref, k_ref, v_ref, kvm_ref, o_ref, m_sc, l_sc, acc_sc,
                 *, causal, tq, tk):
    """One (batch, head, q-tile) with Tk tiled as the 'arbitrary' grid axis
    (flash-style online softmax).  The causal+padding mask is built in-kernel
    from iota plus a (1, tk) key-validity row; nothing quadratic leaves VMEM
    and the per-head result is stored directly (no lane-slicing / concat)."""
    ki = pl.program_id(3)

    @pl.when(ki == 0)
    def _():
        m_sc[...] = jnp.full_like(m_sc, -jnp.inf)
        l_sc[...] = jnp.zeros_like(l_sc)
        acc_sc[...] = jnp.zeros_like(acc_sc)

    q = q_ref[0, 0]                 # (tq, hd) bf16, pre-scaled by 1/sqrt(hd)
    k = k_ref[0, 0]                 # (tk, hd) bf16
    v = v_ref[0, 0]                 # (tk, hd) bf16
    valid = kvm_ref[0] > 0.0        # (1, tk)

    s = jax.lax.dot_general(q, k, (((1,), (1,)), ((), ())),
                            preferred_element_type=jnp.float32)     # (tq, tk)
    if causal:
        row = jax.lax.broadcasted_iota(jnp.int32, (tq, tk), 0) + pl.program_id(2) * tq
        col = jax.lax.broadcasted_iota(jnp.int32, (tq, tk), 1) + ki * tk
        keep = (row >= col) & valid
    else:
        keep = jnp.broadcast_to(valid, (tq, tk))
    s = jnp.where(keep, s, -1e9)

    m_prev = m_sc[...]
    m_new = jnp.maximum(m_prev, jnp.max(s, axis=-1, keepdims=True))
    alpha = jnp.exp(m_prev - m_new)
    p = jnp.exp(s - m_new)
    l_sc[...] = alpha * l_sc[...] + jnp.sum(p, axis=-1, keepdims=True)
    acc_sc[...] = alpha * acc_sc[...] + jnp.dot(
        p.astype(v.dtype), v, preferred_element_type=jnp.float32)
    m_sc[...] = m_new

    @pl.when(ki == pl.num_programs(3) - 1)
    def _():
        o_ref[0, 0] = (acc_sc[...] *
                       pl.reciprocal(l_sc[...], approx=True)).astype(o_ref.dtype)


def pallas_attention(q, k, v, key_mask, num_heads, causal):
    """q: (B, Tq, D), k/v: (B, Tk, D), key_mask: (B, 1, Tk) float (1 = valid)."""
    B, Tq, D = q.shape
    Tk = k.shape[1]
    hd = D // num_heads
    scale = 1.0 / (hd ** 0.5)

    def heads(x, T):                               # (B, T, D) -> (B, H, T, hd)
        return x.reshape(B, T, num_heads, hd).transpose(0, 2, 1, 3)

    qh = heads(q * scale, Tq).astype(jnp.bfloat16)   # pre-scale q once
    kh = heads(k, Tk).astype(jnp.bfloat16)
    vh = heads(v, Tk).astype(jnp.bfloat16)

    tq = _pick_tile(Tq, 256, 8)
    tk = _pick_tile(Tk, 512, 128)

    out = pl.pallas_call(
        functools.partial(_attn_kernel, causal=causal, tq=tq, tk=tk),
        out_shape=jax.ShapeDtypeStruct((B, num_heads, Tq, hd), jnp.bfloat16),
        grid=(B, num_heads, Tq // tq, Tk // tk),
        in_specs=[
            pl.BlockSpec((1, 1, tq, hd), lambda b, h, qi, ki: (b, h, qi, 0)),
            pl.BlockSpec((1, 1, tk, hd), lambda b, h, qi, ki: (b, h, ki, 0)),
            pl.BlockSpec((1, 1, tk, hd), lambda b, h, qi, ki: (b, h, ki, 0)),
            pl.BlockSpec((1, 1, tk), lambda b, h, qi, ki: (b, 0, ki)),
        ],
        out_specs=pl.BlockSpec((1, 1, tq, hd), lambda b, h, qi, ki: (b, h, qi, 0)),
        scratch_shapes=[pltpu.VMEM((tq, 1), jnp.float32),
                        pltpu.VMEM((tq, 1), jnp.float32),
                        pltpu.VMEM((tq, hd), jnp.float32)],
        compiler_params=pltpu.CompilerParams(
            dimension_semantics=("parallel", "parallel", "parallel", "arbitrary"),
            vmem_limit_bytes=VMEM_LIMIT),
    )(qh, kh, vh, key_mask.astype(jnp.float32))
    return out.transpose(0, 2, 1, 3).reshape(B, Tq, D)


def _gcn_conv_kernel(a_ref, x_ref, w_ref, b_ref, o_ref, *, act):
    ax = jnp.dot(a_ref[...], x_ref[...], preferred_element_type=jnp.float32)
    y = jnp.dot(ax.astype(jnp.bfloat16), w_ref[...],
                preferred_element_type=jnp.float32) + b_ref[...]
    if act == "relu":
        y = jnp.maximum(y, 0.0)
    o_ref[...] = y.astype(o_ref.dtype)


def pallas_gcn_conv(adj, x, w, b, act=None):
    """One GCNConv: act(A_norm @ X @ W + b), row-tiled over nodes (bf16 MXU)."""
    N, F_in = x.shape
    F_out = w.shape[-1]
    tr = _pick_tile(N, 256, 8)
    return pl.pallas_call(
        functools.partial(_gcn_conv_kernel, act=act),
        out_shape=jax.ShapeDtypeStruct((N, F_out), jnp.bfloat16),
        grid=(N // tr,),
        in_specs=[
            pl.BlockSpec((tr, N), lambda i: (i, 0)),
            pl.BlockSpec((N, F_in), lambda i: (0, 0)),
            pl.BlockSpec((F_in, F_out), lambda i: (0, 0)),
            pl.BlockSpec((1, F_out), lambda i: (0, 0)),
        ],
        out_specs=pl.BlockSpec((tr, F_out), lambda i: (i, 0)),
        compiler_params=pltpu.CompilerParams(
            dimension_semantics=("parallel",),
            vmem_limit_bytes=VMEM_LIMIT),
    )(adj.astype(jnp.bfloat16), x.astype(jnp.bfloat16), w.astype(jnp.bfloat16),
      b.reshape(1, F_out).astype(jnp.float32))


# ----------------------------------------------------------------------------
# Model pieces (glue around the kernels)
# ----------------------------------------------------------------------------

def _bf(x):
    return x.astype(jnp.bfloat16)


def encode_vision_x(vision_params, vision_x, cfg):
    """Synthetic CLIP-visual stand-in: patch-embed -> token features."""
    B, T, Fr, C, H, W = vision_x.shape
    assert Fr == 1, "Only single frame supported"
    p = cfg["patch"]
    x = vision_x.reshape(B * T * Fr, C, H // p, p, W // p, p)
    x = x.transpose(0, 2, 4, 1, 3, 5)                       # (BTF, Hp, Wp, C, p, p)
    x = x.reshape(B * T * Fr, (H // p) * (W // p), C * p * p)
    tokens = pallas_linear(x, vision_params["w"], vision_params["b"])
    return tokens.reshape(B, T, Fr, (H // p) * (W // p), cfg["vis_dim"])


def perceiver_resampler(pparams, x, cfg):
    """x: (B, T, F, v, d) -> latents (B, T, n_latents, d)."""
    B, T, Fr, v, d = x.shape
    x = x.reshape(B * T, Fr * v, d)
    lat = _bf(jnp.broadcast_to(pparams["latents"], (B * T, cfg["n_latents"], d)))
    nh = cfg["perc_heads"]
    for lyr in pparams["layers"]:
        x_ln = pallas_layernorm(x, lyr["ln_m_g"], lyr["ln_m_b"])
        lat_ln = pallas_layernorm(lat, lyr["ln_l_g"], lyr["ln_l_b"])
        q = pallas_linear(lat_ln, lyr["wq"], lyr["bq"])
        kv_in = jnp.concatenate([x_ln, lat_ln], axis=1)
        kv = pallas_linear(kv_in, lyr["wkv"], lyr["bkv"])          # fused K,V proj
        k, vv = jnp.split(kv, 2, axis=-1)
        key_mask = jnp.ones((B * T, 1, kv_in.shape[1]), jnp.float32)
        att = pallas_attention(q, k, vv, key_mask, nh, causal=False)
        lat = lat + pallas_linear(att, lyr["wo"], lyr["bo"])
        h = pallas_ln_linear(lat, lyr["ff_ln_g"], lyr["ff_ln_b"],
                             lyr["ff1_w"], lyr["ff1_b"], act="gelu")
        lat = lat + pallas_linear(h, lyr["ff2_w"], lyr["ff2_b"])
    lat = pallas_layernorm(lat, pparams["norm_g"], pparams["norm_b"])
    return lat.reshape(B, T, cfg["n_latents"], d)


def gcn_forward(gparams, node_x, adj_norm, cfg):
    """GCN: pairs of GCNConv(d,128)+ReLU, GCNConv(128,d); then mean pool."""
    x = node_x
    for lyr in gparams["layers"]:
        h = pallas_gcn_conv(adj_norm, x, lyr["w1"], lyr["b1"], act="relu")
        x = pallas_gcn_conv(adj_norm, h, lyr["w2"], lyr["b2"])
    G = cfg["num_graphs"]
    n_per = x.shape[0] // G
    # Mean aggregation per graph in plain JAX: a grid=(1,) Pallas kernel for a
    # (G, d) reduction only added launch/DMA overhead.
    return x.astype(jnp.float32).reshape(G, n_per, -1).mean(axis=1)   # (G, graph_dim)


def lang_encoder_forward(lparams, lang_x, attention_mask, media_x,
                         media_locations, graph_emb, graph_locations, cfg):
    B, Tt = lang_x.shape
    h = _bf(jnp.take(lparams["tok_emb"], lang_x, axis=0))     # (B, Tt, D) bf16

    media = media_x.reshape(B, -1, cfg["vis_dim"])            # (B, T_img*n_lat, vis_dim)
    Tm = media.shape[1]

    # text -> media gating: tokens contribute only if an <image> token appears
    # at or before their position (fully-masked rows are zeroed post-attention,
    # identical to the original -1e9-bias-then-zero formulation).
    has_media = jnp.cumsum(media_locations.astype(jnp.int32), axis=1) > 0
    has_media_f = _bf(has_media[:, :, None])

    pad_mask = attention_mask.astype(jnp.float32).reshape(B, 1, Tt)   # (B,1,Tk)
    media_key_mask = jnp.ones((B, 1, Tm), jnp.float32)

    nh = cfg["lang_heads"]
    for lyr in lparams["layers"]:
        xa = lyr["xattn"]
        if xa is not None:
            # gated cross-attention block (Flamingo-style, tanh-scalar gates)
            q = pallas_ln_linear(h, xa["ln_g"], xa["ln_b"], xa["wq"], xa["bq"])
            kv = pallas_linear(media, xa["wkv"], xa["bkv"])           # fused K,V
            k, v = jnp.split(kv, 2, axis=-1)
            att = pallas_attention(q, k, v, media_key_mask, nh, causal=False)
            att = pallas_linear(att, xa["wo"], xa["bo"])
            att = att * has_media_f
            h = h + _bf(jnp.tanh(xa["attn_gate"])) * att
            ff = pallas_ln_linear(h, xa["ff_ln_g"], xa["ff_ln_b"],
                                  xa["ff1_w"], xa["ff1_b"], act="gelu")
            ff = pallas_linear(ff, xa["ff2_w"], xa["ff2_b"])
            h = h + _bf(jnp.tanh(xa["ff_gate"])) * ff
            if cfg["enable_graph_input"]:
                g = pallas_linear(graph_emb, xa["graph_w"], xa["graph_b"])   # (B, D)
                h = h + _bf(jnp.tanh(xa["graph_gate"])) * (
                    _bf(graph_locations[:, :, None]) * g[:, None, :])

        sa = lyr["self"]
        qkv = pallas_ln_linear(h, sa["ln1_g"], sa["ln1_b"], sa["wqkv"], sa["bqkv"])
        q, k, v = jnp.split(qkv, 3, axis=-1)
        att = pallas_attention(q, k, v, pad_mask, nh, causal=True)
        h = h + pallas_linear(att, sa["wo"], sa["bo"])
        m = pallas_ln_linear(h, sa["ln2_g"], sa["ln2_b"],
                             sa["mlp1_w"], sa["mlp1_b"], act="gelu")
        h = h + pallas_linear(m, sa["mlp2_w"], sa["mlp2_b"])

    # final LayerNorm fused into the lm_head projection; bf16 logits.
    logits = pallas_ln_linear(h, lparams["final_ln_g"], lparams["final_ln_b"],
                              lparams["lm_head_w"], lparams["lm_head_b"])
    return logits                                             # (B, Tt, vocab)


def flamingo_forward(params, cfg, vision_x, lang_x, graph_node_x, adj_norm,
                     attention_mask):
    """Flamingo.forward (labels=None, no caching): returns LM logits."""
    vis_tokens = encode_vision_x(params["vision"], vision_x, cfg)        # _encode_vision_x
    media_x = perceiver_resampler(params["perceiver"], vis_tokens, cfg)  # perceiver
    media_locations = lang_x == cfg["media_token_id"]                    # _condition_media_locations
    graph_locations = lang_x == cfg["graph_token_id"]                    # _condition_graph_locations
    graph_emb = gcn_forward(params["gcn"], graph_node_x, adj_norm, cfg)  # _encode_graph_x (GCN)
    return lang_encoder_forward(params["lang"], lang_x, attention_mask,
                                media_x, media_locations, graph_emb,
                                graph_locations, cfg)


# ----------------------------------------------------------------------------
# Deterministic parameter init (matmul weights stored in bf16 for the MXU)
# ----------------------------------------------------------------------------

def init_params(key, cfg):
    keys = iter(jax.random.split(key, 512))

    def nrm(shape, scale=0.02, dtype=jnp.float32):
        return (scale * jax.random.normal(next(keys), shape, jnp.float32)).astype(dtype)

    def wmat(shape, scale=0.02):
        return nrm(shape, scale, jnp.bfloat16)

    def zeros(shape):
        return jnp.zeros(shape, jnp.float32)

    def ones(shape):
        return jnp.ones(shape, jnp.float32)

    D, V, Gd = cfg["lang_dim"], cfg["vis_dim"], cfg["graph_dim"]
    Hm = cfg["mlp_hidden"]
    patch_dim = cfg["C"] * cfg["patch"] * cfg["patch"]

    vision = dict(w=wmat((patch_dim, V)), b=zeros((V,)))

    perc_layers = []
    for _ in range(cfg["perc_depth"]):
        perc_layers.append(dict(
            ln_m_g=ones((V,)), ln_m_b=zeros((V,)),
            ln_l_g=ones((V,)), ln_l_b=zeros((V,)),
            wq=wmat((V, V)), bq=zeros((V,)),
            wkv=wmat((V, 2 * V)), bkv=zeros((2 * V,)),
            wo=wmat((V, V)), bo=zeros((V,)),
            ff_ln_g=ones((V,)), ff_ln_b=zeros((V,)),
            ff1_w=wmat((V, Hm)), ff1_b=zeros((Hm,)),
            ff2_w=wmat((Hm, V)), ff2_b=zeros((V,)),
        ))
    perceiver = dict(latents=nrm((cfg["n_latents"], V), scale=1.0),
                     layers=perc_layers, norm_g=ones((V,)), norm_b=zeros((V,)))

    gcn_layers = []
    for _ in range(cfg["gcn_layers"]):
        gcn_layers.append(dict(
            w1=nrm((Gd, cfg["gcn_hidden"])), b1=zeros((cfg["gcn_hidden"],)),
            w2=nrm((cfg["gcn_hidden"], Gd)), b2=zeros((Gd,)),
        ))
    gcn = dict(layers=gcn_layers)

    lang_layers = []
    for li in range(cfg["lang_layers"]):
        lyr = {}
        if (li + 1) % cfg["cross_attn_every_n_layers"] == 0:
            lyr["xattn"] = dict(
                ln_g=ones((D,)), ln_b=zeros((D,)),
                wq=wmat((D, D)), bq=zeros((D,)),
                wkv=wmat((V, 2 * D)), bkv=zeros((2 * D,)),
                wo=wmat((D, D)), bo=zeros((D,)),
                # real Flamingo initializes gates to 0; use 0.5 so gated paths
                # actually contribute in this synthetic check.
                attn_gate=jnp.array(0.5, jnp.float32),
                ff_ln_g=ones((D,)), ff_ln_b=zeros((D,)),
                ff1_w=wmat((D, Hm)), ff1_b=zeros((Hm,)),
                ff2_w=wmat((Hm, D)), ff2_b=zeros((D,)),
                ff_gate=jnp.array(0.5, jnp.float32),
                graph_w=wmat((Gd, D)), graph_b=zeros((D,)),
                graph_gate=jnp.array(0.5, jnp.float32),
            )
        else:
            lyr["xattn"] = None
        lyr["self"] = dict(
            ln1_g=ones((D,)), ln1_b=zeros((D,)),
            wqkv=wmat((D, 3 * D)), bqkv=zeros((3 * D,)),
            wo=wmat((D, D)), bo=zeros((D,)),
            ln2_g=ones((D,)), ln2_b=zeros((D,)),
            mlp1_w=wmat((D, Hm)), mlp1_b=zeros((Hm,)),
            mlp2_w=wmat((Hm, D)), mlp2_b=zeros((D,)),
        )
        lang_layers.append(lyr)

    lang = dict(
        tok_emb=nrm((cfg["vocab"], D)),
        layers=lang_layers,
        final_ln_g=ones((D,)), final_ln_b=zeros((D,)),
        lm_head_w=wmat((D, cfg["vocab"])), lm_head_b=zeros((cfg["vocab"],)),
    )
    return dict(vision=vision, perceiver=perceiver, gcn=gcn, lang=lang)


# ----------------------------------------------------------------------------
# Main
# ----------------------------------------------------------------------------

if __name__ == "__main__":
    cfg = dict(
        B=2, T_img=1, C=3, H=16, W=16, patch=8,
        vis_dim=32, lang_dim=32, vocab=64, T_txt=8,
        n_latents=4, perc_depth=1, perc_heads=4,
        lang_layers=4, lang_heads=4, mlp_hidden=64,
        cross_attn_every_n_layers=2,
        media_token_id=60, graph_token_id=61, eoc_token_id=62,
        enable_graph_input=True, graph_dim=16, gcn_hidden=128, gcn_layers=2,
        num_graphs=2, nodes_per_graph=4,
    )

    key = jax.random.PRNGKey(0)
    pkey, vkey, gkey = jax.random.split(key, 3)
    params = init_params(pkey, cfg)

    vision_x = jax.random.normal(
        vkey, (cfg["B"], cfg["T_img"], 1, cfg["C"], cfg["H"], cfg["W"]), jnp.float32)
    lang_x = jnp.array([[60, 5, 6, 61, 7, 8, 9, 62],
                        [60, 3, 61, 4, 5, 6, 7, 62]], jnp.int32)
    attention_mask = jnp.ones((cfg["B"], cfg["T_txt"]), jnp.int32)

    n_nodes = cfg["num_graphs"] * cfg["nodes_per_graph"]
    graph_nodes = jax.random.normal(gkey, (n_nodes, cfg["graph_dim"]), jnp.float32)
    blk = jnp.ones((cfg["nodes_per_graph"], cfg["nodes_per_graph"]), jnp.float32)
    A = jax.scipy.linalg.block_diag(blk, blk)          # block-diag graphs w/ self loops
    dinv = jax.lax.rsqrt(A.sum(-1))
    adj_norm = dinv[:, None] * A * dinv[None, :]       # D^-1/2 (A+I) D^-1/2

    fwd = jax.jit(lambda p, vx, lx, gn, adj, am:
                  flamingo_forward(p, cfg, vx, lx, gn, adj, am))
    logits = fwd(params, vision_x, lang_x, graph_nodes, adj_norm, attention_mask)
    jax.block_until_ready(logits)

    assert logits.shape == (cfg["B"], cfg["T_txt"], cfg["vocab"]), logits.shape
    assert bool(jnp.all(jnp.isfinite(logits.astype(jnp.float32))))
    print("KERNEL_OK")
</pallas_src>

<mosaic_0001>
module attributes {stable_mosaic.version = 11 : i64} {
  func.func @_ln_matmul_kernel(%arg0: i32, %arg1: i32, %arg2: memref<16x32xbf16, #tpu.memory_space<vmem>>, %arg3: memref<1x32xf32, #tpu.memory_space<vmem>>, %arg4: memref<1x32xf32, #tpu.memory_space<vmem>>, %arg5: memref<32x128xbf16, #tpu.memory_space<vmem>>, %arg6: memref<1x128xf32, #tpu.memory_space<vmem>>, %arg7: memref<16x128xbf16, #tpu.memory_space<vmem>>, %arg8: memref<16x32xbf16, #tpu.memory_space<vmem>>) attributes {dimension_semantics = [#tpu.dimension_semantics<parallel>, #tpu.dimension_semantics<arbitrary>], iteration_bounds = array<i64: 1, 1>, scalar_prefetch = 0 : i64, scratch_operands = 1 : i64, tpu.core_type = #tpu.core_type<tc>, window_params = [{transform_indices = @transform_0, window_bounds = array<i64: 16, 32>}, {pipeline_mode = #tpu.pipeline_mode<synchronous>, transform_indices = @transform_1, window_bounds = array<i64: 1, 32>}, {pipeline_mode = #tpu.pipeline_mode<synchronous>, transform_indices = @transform_2, window_bounds = array<i64: 1, 32>}, {transform_indices = @transform_3, window_bounds = array<i64: 32, 128>}, {transform_indices = @transform_4, window_bounds = array<i64: 1, 128>}, {transform_indices = @transform_5, window_bounds = array<i64: 16, 128>}]} {
    %c0_i32 = arith.constant 0 : i32
    %0 = arith.cmpi eq, %arg1, %c0_i32 : i32
    %1 = arith.extui %0 : i1 to i32
    %c0_i32_0 = arith.constant 0 : i32
    %2 = arith.cmpi ne, %1, %c0_i32_0 : i32
    scf.if %2 {
      %c0_8 = arith.constant 0 : index
      %c0_9 = arith.constant 0 : index
      %11 = vector.load %arg2[%c0_8, %c0_9] : memref<16x32xbf16, #tpu.memory_space<vmem>>, vector<16x32xbf16>
      %12 = arith.extf %11 : vector<16x32xbf16> to vector<16x32xf32>
      %cst_10 = arith.constant dense<0.000000e+00> : vector<16xf32>
      %13 = vector.multi_reduction <add>, %12, %cst_10 [1] : vector<16x32xf32> to vector<16xf32>
      %14 = vector.shape_cast %13 : vector<16xf32> to vector<16x1xf32>
      %cst_11 = arith.constant 3.200000e+01 : f32
      %15 = vector.broadcast %cst_11 : f32 to vector<16x1xf32>
      %16 = arith.divf %14, %15 : vector<16x1xf32>
      %17 = vector.broadcast %16 : vector<16x1xf32> to vector<16x32xf32>
      %18 = arith.subf %12, %17 : vector<16x32xf32>
      %19 = arith.mulf %18, %18 : vector<16x32xf32>
      %cst_12 = arith.constant dense<0.000000e+00> : vector<16xf32>
      %20 = vector.multi_reduction <add>, %19, %cst_12 [1] : vector<16x32xf32> to vector<16xf32>
      %21 = vector.shape_cast %20 : vector<16xf32> to vector<16x1xf32>
      %cst_13 = arith.constant 3.200000e+01 : f32
      %22 = vector.broadcast %cst_13 : f32 to vector<16x1xf32>
      %23 = arith.divf %21, %22 : vector<16x1xf32>
      %24 = vector.broadcast %16 : vector<16x1xf32> to vector<16x32xf32>
      %25 = arith.subf %12, %24 : vector<16x32xf32>
      %cst_14 = arith.constant 9.99999974E-6 : f32
      %26 = vector.broadcast %cst_14 : f32 to vector<16x1xf32>
      %27 = arith.addf %23, %26 : vector<16x1xf32>
      %28 = math.rsqrt %27 : vector<16x1xf32>
      %29 = vector.broadcast %28 : vector<16x1xf32> to vector<16x32xf32>
      %30 = arith.mulf %25, %29 : vector<16x32xf32>
      %c0_15 = arith.constant 0 : index
      %c0_16 = arith.constant 0 : index
      %31 = vector.load %arg3[%c0_15, %c0_16] : memref<1x32xf32, #tpu.memory_space<vmem>>, vector<1x32xf32>
      %32 = vector.broadcast %31 : vector<1x32xf32> to vector<16x32xf32>
      %33 = arith.mulf %30, %32 : vector<16x32xf32>
      %c0_17 = arith.constant 0 : index
      %c0_18 = arith.constant 0 : index
      %34 = vector.load %arg4[%c0_17, %c0_18] : memref<1x32xf32, #tpu.memory_space<vmem>>, vector<1x32xf32>
      %35 = vector.broadcast %34 : vector<1x32xf32> to vector<16x32xf32>
      %36 = arith.addf %33, %35 : vector<16x32xf32>
      %37 = arith.truncf %36 : vector<16x32xf32> to vector<16x32xbf16>
      %c0_19 = arith.constant 0 : index
      %c0_20 = arith.constant 0 : index
      %38 = vector.load %arg8[%c0_19, %c0_20] : memref<16x32xbf16, #tpu.memory_space<vmem>>, vector<16x32xbf16>
      tpu.vector_store %arg8[%c0_19, %c0_20], %37 {strides = array<i32>} : memref<16x32xbf16, #tpu.memory_space<vmem>>, vector<16x32xbf16>,
    } else {
    }
    %c0 = arith.constant 0 : index
    %c0_1 = arith.constant 0 : index
    %3 = vector.load %arg8[%c0, %c0_1] : memref<16x32xbf16, #tpu.memory_space<vmem>>, vector<16x32xbf16>
    %c0_2 = arith.constant 0 : index
    %c0_3 = arith.constant 0 : index
    %4 = vector.load %arg5[%c0_2, %c0_3] : memref<32x128xbf16, #tpu.memory_space<vmem>>, vector<32x128xbf16>
    %cst = arith.constant dense<0.000000e+00> : vector<16x128xf32>
    %5 = tpu.matmul %3, %4, %cst {dimension_numbers = #tpu.dot_dimension_numbers<[1], [0], [0], [1], [0, 0, 1, 1], [], []>} : vector<16x32xbf16>, vector<32x128xbf16>, vector<16x128xf32> -> vector<16x128xf32>
    %c0_4 = arith.constant 0 : index
    %c0_5 = arith.constant 0 : index
    %6 = vector.load %arg6[%c0_4, %c0_5] : memref<1x128xf32, #tpu.memory_space<vmem>>, vector<1x128xf32>
    %7 = vector.broadcast %6 : vector<1x128xf32> to vector<16x128xf32>
    %8 = arith.addf %5, %7 : vector<16x128xf32>
    %9 = arith.truncf %8 : vector<16x128xf32> to vector<16x128xbf16>
    %c0_6 = arith.constant 0 : index
    %c0_7 = arith.constant 0 : index
    %10 = vector.load %arg7[%c0_6, %c0_7] : memref<16x128xbf16, #tpu.memory_space<vmem>>, vector<16x128xbf16>
    tpu.vector_store %arg7[%c0_6, %c0_7], %9 {strides = array<i32>} : memref<16x128xbf16, #tpu.memory_space<vmem>>, vector<16x128xbf16>,
    return
  }
  func.func @transform_0(%arg0: i32, %arg1: i32) -> (i32, i32) {
    %c0_i32 = arith.constant 0 : i32
    %c0_i32_0 = arith.constant 0 : i32
    return %arg0, %c0_i32 : i32, i32
  }
  func.func @transform_1(%arg0: i32, %arg1: i32) -> (i32, i32) {
    %c0_i32 = arith.constant 0 : i32
    %c0_i32_0 = arith.constant 0 : i32
    %c0_i32_1 = arith.constant 0 : i32
    return %c0_i32, %c0_i32_0 : i32, i32
  }
  func.func @transform_2(%arg0: i32, %arg1: i32) -> (i32, i32) {
    %c0_i32 = arith.constant 0 : i32
    %c0_i32_0 = arith.constant 0 : i32
    %c0_i32_1 = arith.constant 0 : i32
    return %c0_i32, %c0_i32_0 : i32, i32
  }
  func.func @transform_3(%arg0: i32, %arg1: i32) -> (i32, i32) {
    %c0_i32 = arith.constant 0 : i32
    %c0_i32_0 = arith.constant 0 : i32
    return %c0_i32, %arg1 : i32, i32
  }
  func.func @transform_4(%arg0: i32, %arg1: i32) -> (i32, i32) {
    %c0_i32 = arith.constant 0 : i32
    %c0_i32_0 = arith.constant 0 : i32
    return %c0_i32, %arg1 : i32, i32
  }
  func.func @transform_5(%arg0: i32, %arg1: i32) -> (i32, i32) {
    %c0_i32 = arith.constant 0 : i32
    return %arg0, %arg1 : i32, i32
  }
}

module attributes {stable_mosaic.version = 11 : i64} {
  func.func @_attn_kernel(%arg0: i32, %arg1: i32, %arg2: i32, %arg3: i32, %arg4: memref<1x1x8x8xbf16, #tpu.memory_space<vmem>>, %arg5: memref<1x1x8x8xbf16, #tpu.memory_space<vmem>>, %arg6: memref<1x1x8x8xbf16, #tpu.memory_space<vmem>>, %arg7: memref<1x1x8xf32, #tpu.memory_space<vmem>>, %arg8: memref<1x1x8x8xbf16, #tpu.memory_space<vmem>>, %arg9: memref<8x1xf32, #tpu.memory_space<vmem>>, %arg10: memref<8x1xf32, #tpu.memory_space<vmem>>, %arg11: memref<8x8xf32, #tpu.memory_space<vmem>>) attributes {dimension_semantics = [#tpu.dimension_semantics<parallel>, #tpu.dimension_semantics<parallel>, #tpu.dimension_semantics<parallel>, #tpu.dimension_semantics<arbitrary>], iteration_bounds = array<i64: 2, 4, 1, 1>, scalar_prefetch = 0 : i64, scratch_operands = 3 : i64, tpu.core_type = #tpu.core_type<tc>, window_params = [{transform_indices = @transform_0, window_bounds = array<i64: 1, 1, 8, 8>}, {transform_indices = @transform_1, window_bounds = array<i64: 1, 1, 8, 8>}, {transform_indices = @transform_2, window_bounds = array<i64: 1, 1, 8, 8>}, {transform_indices = @transform_3, window_bounds = array<i64: 1, 1, 8>}, {transform_indices = @transform_4, window_bounds = array<i64: 1, 1, 8, 8>}]} {
    %c0_i32 = arith.constant 0 : i32
    %0 = arith.cmpi eq, %arg3, %c0_i32 : i32
    %1 = arith.extui %0 : i1 to i32
    %c0_i32_0 = arith.constant 0 : i32
    %2 = arith.cmpi ne, %1, %c0_i32_0 : i32
    scf.if %2 {
      %cst_35 = arith.constant 0xFF800000 : f32
      %53 = vector.broadcast %cst_35 : f32 to vector<8x1xf32>
      %c0_36 = arith.constant 0 : index
      %c0_37 = arith.constant 0 : index
      %54 = vector.load %arg9[%c0_36, %c0_37] : memref<8x1xf32, #tpu.memory_space<vmem>>, vector<8x1xf32>
      tpu.vector_store %arg9[%c0_36, %c0_37], %53 {strides = array<i32>} : memref<8x1xf32, #tpu.memory_space<vmem>>, vector<8x1xf32>,
      %cst_38 = arith.constant 0.000000e+00 : f32
      %55 = vector.broadcast %cst_38 : f32 to vector<8x1xf32>
      %c0_39 = arith.constant 0 : index
      %c0_40 = arith.constant 0 : index
      %56 = vector.load %arg10[%c0_39, %c0_40] : memref<8x1xf32, #tpu.memory_space<vmem>>, vector<8x1xf32>
      tpu.vector_store %arg10[%c0_39, %c0_40], %55 {strides = array<i32>} : memref<8x1xf32, #tpu.memory_space<vmem>>, vector<8x1xf32>,
      %cst_41 = arith.constant 0.000000e+00 : f32
      %57 = vector.broadcast %cst_41 : f32 to vector<8x8xf32>
      %c0_42 = arith.constant 0 : index
      %c0_43 = arith.constant 0 : index
      %58 = vector.load %arg11[%c0_42, %c0_43] : memref<8x8xf32, #tpu.memory_space<vmem>>, vector<8x8xf32>
      tpu.vector_store %arg11[%c0_42, %c0_43], %57 {strides = array<i32>} : memref<8x8xf32, #tpu.memory_space<vmem>>, vector<8x8xf32>,
    } else {
    }
    %c0 = arith.constant 0 : index
    %c0_1 = arith.constant 0 : index
    %c0_2 = arith.constant 0 : index
    %c0_3 = arith.constant 0 : index
    %3 = vector.load %arg4[%c0, %c0_1, %c0_2, %c0_3] : memref<1x1x8x8xbf16, #tpu.memory_space<vmem>>, vector<1x1x8x8xbf16>
    %4 = vector.shape_cast %3 : vector<1x1x8x8xbf16> to vector<8x8xbf16>
    %c0_4 = arith.constant 0 : index
    %c0_5 = arith.constant 0 : index
    %c0_6 = arith.constant 0 : index
    %c0_7 = arith.constant 0 : index
    %5 = vector.load %arg5[%c0_4, %c0_5, %c0_6, %c0_7] : memref<1x1x8x8xbf16, #tpu.memory_space<vmem>>, vector<1x1x8x8xbf16>
    %6 = vector.shape_cast %5 : vector<1x1x8x8xbf16> to vector<8x8xbf16>
    %c0_8 = arith.constant 0 : index
    %c0_9 = arith.constant 0 : index
    %c0_10 = arith.constant 0 : index
    %c0_11 = arith.constant 0 : index
    %7 = vector.load %arg6[%c0_8, %c0_9, %c0_10, %c0_11] : memref<1x1x8x8xbf16, #tpu.memory_space<vmem>>, vector<1x1x8x8xbf16>
    %8 = vector.shape_cast %7 : vector<1x1x8x8xbf16> to vector<8x8xbf16>
    %c0_12 = arith.constant 0 : index
    %c0_13 = arith.constant 0 : index
    %c0_14 = arith.constant 0 : index
    %9 = vector.load %arg7[%c0_12, %c0_13, %c0_14] : memref<1x1x8xf32, #tpu.memory_space<vmem>>, vector<1x1x8xf32>
    %10 = vector.shape_cast %9 : vector<1x1x8xf32> to vector<1x8xf32>
    %cst = arith.constant 0.000000e+00 : f32
    %11 = vector.broadcast %cst : f32 to vector<1x8xf32>
    %12 = arith.cmpf ogt, %10, %11 : vector<1x8xf32>
    %cst_15 = arith.constant dense<0.000000e+00> : vector<8x8xf32>
    %13 = tpu.matmul %4, %6, %cst_15 {dimension_numbers = #tpu.dot_dimension_numbers<[1], [1], [0], [0], [0, 0, 1, 0], [], []>} : vector<8x8xbf16>, vector<8x8xbf16>, vector<8x8xf32> -> vector<8x8xf32>
    %14 = tpu.iota {dimensions = array<i32: 0>} : vector<8x8xi32>
    %c8_i32 = arith.constant 8 : i32
    %15 = arith.muli %arg2, %c8_i32 : i32
    %16 = vector.broadcast %15 : i32 to vector<8x8xi32>
    %17 = arith.addi %14, %16 : vector<8x8xi32>
    %18 = tpu.iota {dimensions = array<i32: 1>} : vector<8x8xi32>
    %c8_i32_16 = arith.constant 8 : i32
    %19 = arith.muli %arg3, %c8_i32_16 : i32
    %20 = vector.broadcast %19 : i32 to vector<8x8xi32>
    %21 = arith.addi %18, %20 : vector<8x8xi32>
    %22 = arith.cmpi sge, %17, %21 : vector<8x8xi32>
    %23 = vector.broadcast %12 : vector<1x8xi1> to vector<8x8xi1>
    %24 = arith.andi %22, %23 : vector<8x8xi1>
    %cst_17 = arith.constant -1.000000e+09 : f32
    %25 = vector.broadcast %cst_17 : f32 to vector<8x8xf32>
    %26 = arith.select %24, %13, %25 : vector<8x8xi1>, vector<8x8xf32>
    %c0_18 = arith.constant 0 : index
    %c0_19 = arith.constant 0 : index
    %27 = vector.load %arg9[%c0_18, %c0_19] : memref<8x1xf32, #tpu.memory_space<vmem>>, vector<8x1xf32>
    %cst_20 = arith.constant dense<0xFF800000> : vector<8xf32>
    %28 = vector.multi_reduction <maximumf>, %26, %cst_20 [1] : vector<8x8xf32> to vector<8xf32>
    %29 = vector.shape_cast %28 : vector<8xf32> to vector<8x1xf32>
    %30 = arith.maximumf %27, %29 : vector<8x1xf32>
    %31 = arith.subf %27, %30 : vector<8x1xf32>
    %32 = math.exp %31 : vector<8x1xf32>
    %33 = vector.broadcast %30 : vector<8x1xf32> to vector<8x8xf32>
    %34 = arith.subf %26, %33 : vector<8x8xf32>
    %35 = math.exp %34 : vector<8x8xf32>
    %c0_21 = arith.constant 0 : index
    %c0_22 = arith.constant 0 : index
    %36 = vector.load %arg10[%c0_21, %c0_22] : memref<8x1xf32, #tpu.memory_space<vmem>>, vector<8x1xf32>
    %37 = arith.mulf %32, %36 : vector<8x1xf32>
    %cst_23 = arith.constant dense<0.000000e+00> : vector<8xf32>
    %38 = vector.multi_reduction <add>, %35, %cst_23 [1] : vector<8x8xf32> to vector<8xf32>
    %39 = vector.shape_cast %38 : vector<8xf32> to vector<8x1xf32>
    %40 = arith.addf %37, %39 : vector<8x1xf32>
    %c0_24 = arith.constant 0 : index
    %c0_25 = arith.constant 0 : index
    %41 = vector.load %arg10[%c0_24, %c0_25] : memref<8x1xf32, #tpu.memory_space<vmem>>, vector<8x1xf32>
    tpu.vector_store %arg10[%c0_24, %c0_25], %40 {strides = array<i32>} : memref<8x1xf32, #tpu.memory_space<vmem>>, vector<8x1xf32>,
    %c0_26 = arith.constant 0 : index
    %c0_27 = arith.constant 0 : index
    %42 = vector.load %arg11[%c0_26, %c0_27] : memref<8x8xf32, #tpu.memory_space<vmem>>, vector<8x8xf32>
    %43 = vector.broadcast %32 : vector<8x1xf32> to vector<8x8xf32>
    %44 = arith.mulf %43, %42 : vector<8x8xf32>
    %45 = arith.truncf %35 : vector<8x8xf32> to vector<8x8xbf16>
    %cst_28 = arith.constant dense<0.000000e+00> : vector<8x8xf32>
    %46 = tpu.matmul %45, %8, %cst_28 {dimension_numbers = #tpu.dot_dimension_numbers<[1], [0], [0], [1], [0, 0, 1, 1], [], []>} : vector<8x8xbf16>, vector<8x8xbf16>, vector<8x8xf32> -> vector<8x8xf32>
    %47 = arith.addf %44, %46 : vector<8x8xf32>
    %c0_29 = arith.constant 0 : index
    %c0_30 = arith.constant 0 : index
    %48 = vector.load %arg11[%c0_29, %c0_30] : memref<8x8xf32, #tpu.memory_space<vmem>>, vector<8x8xf32>
    tpu.vector_store %arg11[%c0_29, %c0_30], %47 {strides = array<i32>} : memref<8x8xf32, #tpu.memory_space<vmem>>, vector<8x8xf32>,
    %c0_31 = arith.constant 0 : index
    %c0_32 = arith.constant 0 : index
    %49 = vector.load %arg9[%c0_31, %c0_32] : memref<8x1xf32, #tpu.memory_space<vmem>>, vector<8x1xf32>
    tpu.vector_store %arg9[%c0_31, %c0_32], %30 {strides = array<i32>} : memref<8x1xf32, #tpu.memory_space<vmem>>, vector<8x1xf32>,
    %c0_i32_33 = arith.constant 0 : i32
    %50 = arith.cmpi eq, %arg3, %c0_i32_33 : i32
    %51 = arith.extui %50 : i1 to i32
    %c0_i32_34 = arith.constant 0 : i32
    %52 = arith.cmpi ne, %51, %c0_i32_34 : i32
    scf.if %52 {
      %c0_35 = arith.constant 0 : index
      %c0_36 = arith.constant 0 : index
      %53 = vector.load %arg11[%c0_35, %c0_36] : memref<8x8xf32, #tpu.memory_space<vmem>>, vector<8x8xf32>
      %c0_37 = arith.constant 0 : index
      %c0_38 = arith.constant 0 : index
      %54 = vector.load %arg10[%c0_37, %c0_38] : memref<8x1xf32, #tpu.memory_space<vmem>>, vector<8x1xf32>
      %55 = tpu.reciprocal %54 {approx = true} : vector<8x1xf32> -> vector<8x1xf32>
      %56 = vector.broadcast %55 : vector<8x1xf32> to vector<8x8xf32>
      %57 = arith.mulf %53, %56 : vector<8x8xf32>
      %58 = arith.truncf %57 : vector<8x8xf32> to vector<8x8xbf16>
      %c0_39 = arith.constant 0 : index
      %c0_40 = arith.constant 0 : index
      %c0_41 = arith.constant 0 : index
      %c0_42 = arith.constant 0 : index
      %59 = vector.load %arg8[%c0_39, %c0_40, %c0_41, %c0_42] : memref<1x1x8x8xbf16, #tpu.memory_space<vmem>>, vector<1x1x8x8xbf16>
      %60 = vector.shape_cast %59 : vector<1x1x8x8xbf16> to vector<8x8xbf16>
      %61 = vector.shape_cast %58 : vector<8x8xbf16> to vector<1x1x8x8xbf16>
      tpu.vector_store %arg8[%c0_39, %c0_40, %c0_41, %c0_42], %61 {strides = array<i32>} : memref<1x1x8x8xbf16, #tpu.memory_space<vmem>>, vector<1x1x8x8xbf16>,
    } else {
    }
    return
  }
  func.func @transform_0(%arg0: i32, %arg1: i32, %arg2: i32, %arg3: i32) -> (i32, i32, i32, i32) {
    %c0_i32 = arith.constant 0 : i32
    %c0_i32_0 = arith.constant 0 : i32
    return %arg0, %arg1, %arg2, %c0_i32 : i32, i32, i32, i32
  }
  func.func @transform_1(%arg0: i32, %arg1: i32, %arg2: i32, %arg3: i32) -> (i32, i32, i32, i32) {
    %c0_i32 = arith.constant 0 : i32
    %c0_i32_0 = arith.constant 0 : i32
    return %arg0, %arg1, %arg3, %c0_i32 : i32, i32, i32, i32
  }
  func.func @transform_2(%arg0: i32, %arg1: i32, %arg2: i32, %arg3: i32) -> (i32, i32, i32, i32) {
    %c0_i32 = arith.constant 0 : i32
    %c0_i32_0 = arith.constant 0 : i32
    return %arg0, %arg1, %arg3, %c0_i32 : i32, i32, i32, i32
  }
  func.func @transform_3(%arg0: i32, %arg1: i32, %arg2: i32, %arg3: i32) -> (i32, i32, i32) {
    %c0_i32 = arith.constant 0 : i32
    %c0_i32_0 = arith.constant 0 : i32
    return %arg0, %c0_i32, %arg3 : i32, i32, i32
  }
  func.func @transform_4(%arg0: i32, %arg1: i32, %arg2: i32, %arg3: i32) -> (i32, i32, i32, i32) {
    %c0_i32 = arith.constant 0 : i32
    %c0_i32_0 = arith.constant 0 : i32
    return %arg0, %arg1, %arg2, %c0_i32 : i32, i32, i32, i32
  }
}

module attributes {stable_mosaic.version = 11 : i64} {
  func.func @_matmul_kernel(%arg0: i32, %arg1: i32, %arg2: i32, %arg3: memref<16x32xbf16, #tpu.memory_space<vmem>>, %arg4: memref<32x128xbf16, #tpu.memory_space<vmem>>, %arg5: memref<1x128xf32, #tpu.memory_space<vmem>>, %arg6: memref<16x128xbf16, #tpu.memory_space<vmem>>, %arg7: memref<16x128xf32, #tpu.memory_space<vmem>>) attributes {dimension_semantics = [#tpu.dimension_semantics<parallel>, #tpu.dimension_semantics<parallel>, #tpu.dimension_semantics<arbitrary>], iteration_bounds = array<i64: 1, 1, 1>, scalar_prefetch = 0 : i64, scratch_operands = 1 : i64, tpu.core_type = #tpu.core_type<tc>, window_params = [{transform_indices = @transform_0, window_bounds = array<i64: 16, 32>}, {transform_indices = @transform_1, window_bounds = array<i64: 32, 128>}, {transform_indices = @transform_2, window_bounds = array<i64: 1, 128>}, {transform_indices = @transform_3, window_bounds = array<i64: 16, 128>}]} {
    %c0_i32 = arith.constant 0 : i32
    %0 = arith.cmpi eq, %arg2, %c0_i32 : i32
    %1 = arith.extui %0 : i1 to i32
    %c0_i32_0 = arith.constant 0 : i32
    %2 = arith.cmpi ne, %1, %c0_i32_0 : i32
    scf.if %2 {
      %cst_10 = arith.constant 0.000000e+00 : f32
      %12 = vector.broadcast %cst_10 : f32 to vector<16x128xf32>
      %c0_11 = arith.constant 0 : index
      %c0_12 = arith.constant 0 : index
      %13 = vector.load %arg7[%c0_11, %c0_12] : memref<16x128xf32, #tpu.memory_space<vmem>>, vector<16x128xf32>
      tpu.vector_store %arg7[%c0_11, %c0_12], %12 {strides = array<i32>} : memref<16x128xf32, #tpu.memory_space<vmem>>, vector<16x128xf32>,
    } else {
    }
    %c0 = arith.constant 0 : index
    %c0_1 = arith.constant 0 : index
    %3 = vector.load %arg7[%c0, %c0_1] : memref<16x128xf32, #tpu.memory_space<vmem>>, vector<16x128xf32>
    %c0_2 = arith.constant 0 : index
    %c0_3 = arith.constant 0 : index
    %4 = vector.load %arg3[%c0_2, %c0_3] : memref<16x32xbf16, #tpu.memory_space<vmem>>, vector<16x32xbf16>
    %c0_4 = arith.constant 0 : index
    %c0_5 = arith.constant 0 : index
    %5 = vector.load %arg4[%c0_4, %c0_5] : memref<32x128xbf16, #tpu.memory_space<vmem>>, vector<32x128xbf16>
    %cst = arith.constant dense<0.000000e+00> : vector<16x128xf32>
    %6 = tpu.matmul %4, %5, %cst {dimension_numbers = #tpu.dot_dimension_numbers<[1], [0], [0], [1], [0, 0, 1, 1], [], []>} : vector<16x32xbf16>, vector<32x128xbf16>, vector<16x128xf32> -> vector<16x128xf32>
    %7 = arith.addf %3, %6 : vector<16x128xf32>
    %c0_6 = arith.constant 0 : index
    %c0_7 = arith.constant 0 : index
    %8 = vector.load %arg7[%c0_6, %c0_7] : memref<16x128xf32, #tpu.memory_space<vmem>>, vector<16x128xf32>
    tpu.vector_store %arg7[%c0_6, %c0_7], %7 {strides = array<i32>} : memref<16x128xf32, #tpu.memory_space<vmem>>, vector<16x128xf32>,
    %c0_i32_8 = arith.constant 0 : i32
    %9 = arith.cmpi eq, %arg2, %c0_i32_8 : i32
    %10 = arith.extui %9 : i1 to i32
    %c0_i32_9 = arith.constant 0 : i32
    %11 = arith.cmpi ne, %10, %c0_i32_9 : i32
    scf.if %11 {
      %c0_10 = arith.constant 0 : index
      %c0_11 = arith.constant 0 : index
      %12 = vector.load %arg7[%c0_10, %c0_11] : memref<16x128xf32, #tpu.memory_space<vmem>>, vector<16x128xf32>
      %c0_12 = arith.constant 0 : index
      %c0_13 = arith.constant 0 : index
      %13 = vector.load %arg5[%c0_12, %c0_13] : memref<1x128xf32, #tpu.memory_space<vmem>>, vector<1x128xf32>
      %14 = vector.broadcast %13 : vector<1x128xf32> to vector<16x128xf32>
      %15 = arith.addf %12, %14 : vector<16x128xf32>
      %16 = arith.truncf %15 : vector<16x128xf32> to vector<16x128xbf16>
      %c0_14 = arith.constant 0 : index
      %c0_15 = arith.constant 0 : index
      %17 = vector.load %arg6[%c0_14, %c0_15] : memref<16x128xbf16, #tpu.memory_space<vmem>>, vector<16x128xbf16>
      tpu.vector_store %arg6[%c0_14, %c0_15], %16 {strides = array<i32>} : memref<16x128xbf16, #tpu.memory_space<vmem>>, vector<16x128xbf16>,
    } else {
    }
    return
  }
  func.func @transform_0(%arg0: i32, %arg1: i32, %arg2: i32) -> (i32, i32) {
    %c0_i32 = arith.constant 0 : i32
    return %arg0, %arg2 : i32, i32
  }
  func.func @transform_1(%arg0: i32, %arg1: i32, %arg2: i32) -> (i32, i32) {
    %c0_i32 = arith.constant 0 : i32
    return %arg2, %arg1 : i32, i32
  }
  func.func @transform_2(%arg0: i32, %arg1: i32, %arg2: i32) -> (i32, i32) {
    %c0_i32 = arith.constant 0 : i32
    %c0_i32_0 = arith.constant 0 : i32
    return %c0_i32, %arg1 : i32, i32
  }
  func.func @transform_3(%arg0: i32, %arg1: i32, %arg2: i32) -> (i32, i32) {
    %c0_i32 = arith.constant 0 : i32
    return %arg0, %arg1 : i32, i32
  }
}

module attributes {stable_mosaic.version = 11 : i64} {
  func.func @_ln_matmul_kernel(%arg0: i32, %arg1: i32, %arg2: memref<16x32xbf16, #tpu.memory_space<vmem>>, %arg3: memref<1x32xf32, #tpu.memory_space<vmem>>, %arg4: memref<1x32xf32, #tpu.memory_space<vmem>>, %arg5: memref<32x128xbf16, #tpu.memory_space<vmem>>, %arg6: memref<1x128xf32, #tpu.memory_space<vmem>>, %arg7: memref<16x128xbf16, #tpu.memory_space<vmem>>, %arg8: memref<16x32xbf16, #tpu.memory_space<vmem>>) attributes {dimension_semantics = [#tpu.dimension_semantics<parallel>, #tpu.dimension_semantics<arbitrary>], iteration_bounds = array<i64: 1, 1>, scalar_prefetch = 0 : i64, scratch_operands = 1 : i64, tpu.core_type = #tpu.core_type<tc>, window_params = [{transform_indices = @transform_0, window_bounds = array<i64: 16, 32>}, {pipeline_mode = #tpu.pipeline_mode<synchronous>, transform_indices = @transform_1, window_bounds = array<i64: 1, 32>}, {pipeline_mode = #tpu.pipeline_mode<synchronous>, transform_indices = @transform_2, window_bounds = array<i64: 1, 32>}, {transform_indices = @transform_3, window_bounds = array<i64: 32, 128>}, {transform_indices = @transform_4, window_bounds = array<i64: 1, 128>}, {transform_indices = @transform_5, window_bounds = array<i64: 16, 128>}]} {
    %c0_i32 = arith.constant 0 : i32
    %0 = arith.cmpi eq, %arg1, %c0_i32 : i32
    %1 = arith.extui %0 : i1 to i32
    %c0_i32_0 = arith.constant 0 : i32
    %2 = arith.cmpi ne, %1, %c0_i32_0 : i32
    scf.if %2 {
      %c0_12 = arith.constant 0 : index
      %c0_13 = arith.constant 0 : index
      %24 = vector.load %arg2[%c0_12, %c0_13] : memref<16x32xbf16, #tpu.memory_space<vmem>>, vector<16x32xbf16>
      %25 = arith.extf %24 : vector<16x32xbf16> to vector<16x32xf32>
      %cst_14 = arith.constant dense<0.000000e+00> : vector<16xf32>
      %26 = vector.multi_reduction <add>, %25, %cst_14 [1] : vector<16x32xf32> to vector<16xf32>
      %27 = vector.shape_cast %26 : vector<16xf32> to vector<16x1xf32>
      %cst_15 = arith.constant 3.200000e+01 : f32
      %28 = vector.broadcast %cst_15 : f32 to vector<16x1xf32>
      %29 = arith.divf %27, %28 : vector<16x1xf32>
      %30 = vector.broadcast %29 : vector<16x1xf32> to vector<16x32xf32>
      %31 = arith.subf %25, %30 : vector<16x32xf32>
      %32 = arith.mulf %31, %31 : vector<16x32xf32>
      %cst_16 = arith.constant dense<0.000000e+00> : vector<16xf32>
      %33 = vector.multi_reduction <add>, %32, %cst_16 [1] : vector<16x32xf32> to vector<16xf32>
      %34 = vector.shape_cast %33 : vector<16xf32> to vector<16x1xf32>
      %cst_17 = arith.constant 3.200000e+01 : f32
      %35 = vector.broadcast %cst_17 : f32 to vector<16x1xf32>
      %36 = arith.divf %34, %35 : vector<16x1xf32>
      %37 = vector.broadcast %29 : vector<16x1xf32> to vector<16x32xf32>
      %38 = arith.subf %25, %37 : vector<16x32xf32>
      %cst_18 = arith.constant 9.99999974E-6 : f32
      %39 = vector.broadcast %cst_18 : f32 to vector<16x1xf32>
      %40 = arith.addf %36, %39 : vector<16x1xf32>
      %41 = math.rsqrt %40 : vector<16x1xf32>
      %42 = vector.broadcast %41 : vector<16x1xf32> to vector<16x32xf32>
      %43 = arith.mulf %38, %42 : vector<16x32xf32>
      %c0_19 = arith.constant 0 : index
      %c0_20 = arith.constant 0 : index
      %44 = vector.load %arg3[%c0_19, %c0_20] : memref<1x32xf32, #tpu.memory_space<vmem>>, vector<1x32xf32>
      %45 = vector.broadcast %44 : vector<1x32xf32> to vector<16x32xf32>
      %46 = arith.mulf %43, %45 : vector<16x32xf32>
      %c0_21 = arith.constant 0 : index
      %c0_22 = arith.constant 0 : index
      %47 = vector.load %arg4[%c0_21, %c0_22] : memref<1x32xf32, #tpu.memory_space<vmem>>, vector<1x32xf32>
      %48 = vector.broadcast %47 : vector<1x32xf32> to vector<16x32xf32>
      %49 = arith.addf %46, %48 : vector<16x32xf32>
      %50 = arith.truncf %49 : vector<16x32xf32> to vector<16x32xbf16>
      %c0_23 = arith.constant 0 : index
      %c0_24 = arith.constant 0 : index
      %51 = vector.load %arg8[%c0_23, %c0_24] : memref<16x32xbf16, #tpu.memory_space<vmem>>, vector<16x32xbf16>
      tpu.vector_store %arg8[%c0_23, %c0_24], %50 {strides = array<i32>} : memref<16x32xbf16, #tpu.memory_space<vmem>>, vector<16x32xbf16>,
    } else {
    }
    %c0 = arith.constant 0 : index
    %c0_1 = arith.constant 0 : index
    %3 = vector.load %arg8[%c0, %c0_1] : memref<16x32xbf16, #tpu.memory_space<vmem>>, vector<16x32xbf16>
    %c0_2 = arith.constant 0 : index
    %c0_3 = arith.constant 0 : index
    %4 = vector.load %arg5[%c0_2, %c0_3] : memref<32x128xbf16, #tpu.memory_space<vmem>>, vector<32x128xbf16>
    %cst = arith.constant dense<0.000000e+00> : vector<16x128xf32>
    %5 = tpu.matmul %3, %4, %cst {dimension_numbers = #tpu.dot_dimension_numbers<[1], [0], [0], [1], [0, 0, 1, 1], [], []>} : vector<16x32xbf16>, vector<32x128xbf16>, vector<16x128xf32> -> vector<16x128xf32>
    %c0_4 = arith.constant 0 : index
    %c0_5 = arith.constant 0 : index
    %6 = vector.load %arg6[%c0_4, %c0_5] : memref<1x128xf32, #tpu.memory_space<vmem>>, vector<1x128xf32>
    %7 = vector.broadcast %6 : vector<1x128xf32> to vector<16x128xf32>
    %8 = arith.addf %5, %7 : vector<16x128xf32>
    %9 = arith.mulf %8, %8 : vector<16x128xf32>
    %10 = arith.mulf %8, %9 : vector<16x128xf32>
    %cst_6 = arith.constant 4.471500e-02 : f32
    %11 = vector.broadcast %cst_6 : f32 to vector<16x128xf32>
    %12 = arith.mulf %11, %10 : vector<16x128xf32>
    %13 = arith.addf %8, %12 : vector<16x128xf32>
    %cst_7 = arith.constant 0.797884583 : f32
    %14 = vector.broadcast %cst_7 : f32 to vector<16x128xf32>
    %15 = arith.mulf %14, %13 : vector<16x128xf32>
    %16 = math.tanh %15 : vector<16x128xf32>
    %cst_8 = arith.constant 1.000000e+00 : f32
    %17 = vector.broadcast %cst_8 : f32 to vector<16x128xf32>
    %18 = arith.addf %17, %16 : vector<16x128xf32>
    %cst_9 = arith.constant 5.000000e-01 : f32
    %19 = vector.broadcast %cst_9 : f32 to vector<16x128xf32>
    %20 = arith.mulf %19, %18 : vector<16x128xf32>
    %21 = arith.mulf %8, %20 : vector<16x128xf32>
    %22 = arith.truncf %21 : vector<16x128xf32> to vector<16x128xbf16>
    %c0_10 = arith.constant 0 : index
    %c0_11 = arith.constant 0 : index
    %23 = vector.load %arg7[%c0_10, %c0_11] : memref<16x128xbf16, #tpu.memory_space<vmem>>, vector<16x128xbf16>
    tpu.vector_store %arg7[%c0_10, %c0_11], %22 {strides = array<i32>} : memref<16x128xbf16, #tpu.memory_space<vmem>>, vector<16x128xbf16>,
    return
  }
  func.func @transform_0(%arg0: i32, %arg1: i32) -> (i32, i32) {
    %c0_i32 = arith.constant 0 : i32
    %c0_i32_0 = arith.constant 0 : i32
    return %arg0, %c0_i32 : i32, i32
  }
  func.func @transform_1(%arg0: i32, %arg1: i32) -> (i32, i32) {
    %c0_i32 = arith.constant 0 : i32
    %c0_i32_0 = arith.constant 0 : i32
    %c0_i32_1 = arith.constant 0 : i32
    return %c0_i32, %c0_i32_0 : i32, i32
  }
  func.func @transform_2(%arg0: i32, %arg1: i32) -> (i32, i32) {
    %c0_i32 = arith.constant 0 : i32
    %c0_i32_0 = arith.constant 0 : i32
    %c0_i32_1 = arith.constant 0 : i32
    return %c0_i32, %c0_i32_0 : i32, i32
  }
  func.func @transform_3(%arg0: i32, %arg1: i32) -> (i32, i32) {
    %c0_i32 = arith.constant 0 : i32
    %c0_i32_0 = arith.constant 0 : i32
    return %c0_i32, %arg1 : i32, i32
  }
  func.func @transform_4(%arg0: i32, %arg1: i32) -> (i32, i32) {
    %c0_i32 = arith.constant 0 : i32
    %c0_i32_0 = arith.constant 0 : i32
    return %c0_i32, %arg1 : i32, i32
  }
  func.func @transform_5(%arg0: i32, %arg1: i32) -> (i32, i32) {
    %c0_i32 = arith.constant 0 : i32
    return %arg0, %arg1 : i32, i32
  }
}

module attributes {stable_mosaic.version = 11 : i64} {
  func.func @_matmul_kernel(%arg0: i32, %arg1: i32, %arg2: i32, %arg3: memref<16x64xbf16, #tpu.memory_space<vmem>>, %arg4: memref<64x128xbf16, #tpu.memory_space<vmem>>, %arg5: memref<1x128xf32, #tpu.memory_space<vmem>>, %arg6: memref<16x128xbf16, #tpu.memory_space<vmem>>, %arg7: memref<16x128xf32, #tpu.memory_space<vmem>>) attributes {dimension_semantics = [#tpu.dimension_semantics<parallel>, #tpu.dimension_semantics<parallel>, #tpu.dimension_semantics<arbitrary>], iteration_bounds = array<i64: 1, 1, 1>, scalar_prefetch = 0 : i64, scratch_operands = 1 : i64, tpu.core_type = #tpu.core_type<tc>, window_params = [{transform_indices = @transform_0, window_bounds = array<i64: 16, 64>}, {transform_indices = @transform_1, window_bounds = array<i64: 64, 128>}, {transform_indices = @transform_2, window_bounds = array<i64: 1, 128>}, {transform_indices = @transform_3, window_bounds = array<i64: 16, 128>}]} {
    %c0_i32 = arith.constant 0 : i32
    %0 = arith.cmpi eq, %arg2, %c0_i32 : i32
    %1 = arith.extui %0 : i1 to i32
    %c0_i32_0 = arith.constant 0 : i32
    %2 = arith.cmpi ne, %1, %c0_i32_0 : i32
    scf.if %2 {
      %cst_10 = arith.constant 0.000000e+00 : f32
      %12 = vector.broadcast %cst_10 : f32 to vector<16x128xf32>
      %c0_11 = arith.constant 0 : index
      %c0_12 = arith.constant 0 : index
      %13 = vector.load %arg7[%c0_11, %c0_12] : memref<16x128xf32, #tpu.memory_space<vmem>>, vector<16x128xf32>
      tpu.vector_store %arg7[%c0_11, %c0_12], %12 {strides = array<i32>} : memref<16x128xf32, #tpu.memory_space<vmem>>, vector<16x128xf32>,
    } else {
    }
    %c0 = arith.constant 0 : index
    %c0_1 = arith.constant 0 : index
    %3 = vector.load %arg7[%c0, %c0_1] : memref<16x128xf32, #tpu.memory_space<vmem>>, vector<16x128xf32>
    %c0_2 = arith.constant 0 : index
    %c0_3 = arith.constant 0 : index
    %4 = vector.load %arg3[%c0_2, %c0_3] : memref<16x64xbf16, #tpu.memory_space<vmem>>, vector<16x64xbf16>
    %c0_4 = arith.constant 0 : index
    %c0_5 = arith.constant 0 : index
    %5 = vector.load %arg4[%c0_4, %c0_5] : memref<64x128xbf16, #tpu.memory_space<vmem>>, vector<64x128xbf16>
    %cst = arith.constant dense<0.000000e+00> : vector<16x128xf32>
    %6 = tpu.matmul %4, %5, %cst {dimension_numbers = #tpu.dot_dimension_numbers<[1], [0], [0], [1], [0, 0, 1, 1], [], []>} : vector<16x64xbf16>, vector<64x128xbf16>, vector<16x128xf32> -> vector<16x128xf32>
    %7 = arith.addf %3, %6 : vector<16x128xf32>
    %c0_6 = arith.constant 0 : index
    %c0_7 = arith.constant 0 : index
    %8 = vector.load %arg7[%c0_6, %c0_7] : memref<16x128xf32, #tpu.memory_space<vmem>>, vector<16x128xf32>
    tpu.vector_store %arg7[%c0_6, %c0_7], %7 {strides = array<i32>} : memref<16x128xf32, #tpu.memory_space<vmem>>, vector<16x128xf32>,
    %c0_i32_8 = arith.constant 0 : i32
    %9 = arith.cmpi eq, %arg2, %c0_i32_8 : i32
    %10 = arith.extui %9 : i1 to i32
    %c0_i32_9 = arith.constant 0 : i32
    %11 = arith.cmpi ne, %10, %c0_i32_9 : i32
    scf.if %11 {
      %c0_10 = arith.constant 0 : index
      %c0_11 = arith.constant 0 : index
      %12 = vector.load %arg7[%c0_10, %c0_11] : memref<16x128xf32, #tpu.memory_space<vmem>>, vector<16x128xf32>
      %c0_12 = arith.constant 0 : index
      %c0_13 = arith.constant 0 : index
      %13 = vector.load %arg5[%c0_12, %c0_13] : memref<1x128xf32, #tpu.memory_space<vmem>>, vector<1x128xf32>
      %14 = vector.broadcast %13 : vector<1x128xf32> to vector<16x128xf32>
      %15 = arith.addf %12, %14 : vector<16x128xf32>
      %16 = arith.truncf %15 : vector<16x128xf32> to vector<16x128xbf16>
      %c0_14 = arith.constant 0 : index
      %c0_15 = arith.constant 0 : index
      %17 = vector.load %arg6[%c0_14, %c0_15] : memref<16x128xbf16, #tpu.memory_space<vmem>>, vector<16x128xbf16>
      tpu.vector_store %arg6[%c0_14, %c0_15], %16 {strides = array<i32>} : memref<16x128xbf16, #tpu.memory_space<vmem>>, vector<16x128xbf16>,
    } else {
    }
    return
  }
  func.func @transform_0(%arg0: i32, %arg1: i32, %arg2: i32) -> (i32, i32) {
    %c0_i32 = arith.constant 0 : i32
    return %arg0, %arg2 : i32, i32
  }
  func.func @transform_1(%arg0: i32, %arg1: i32, %arg2: i32) -> (i32, i32) {
    %c0_i32 = arith.constant 0 : i32
    return %arg2, %arg1 : i32, i32
  }
  func.func @transform_2(%arg0: i32, %arg1: i32, %arg2: i32) -> (i32, i32) {
    %c0_i32 = arith.constant 0 : i32
    %c0_i32_0 = arith.constant 0 : i32
    return %c0_i32, %arg1 : i32, i32
  }
  func.func @transform_3(%arg0: i32, %arg1: i32, %arg2: i32) -> (i32, i32) {
    %c0_i32 = arith.constant 0 : i32
    return %arg0, %arg1 : i32, i32
  }
}

module attributes {stable_mosaic.version = 11 : i64} {
  func.func @_layernorm_kernel(%arg0: i32, %arg1: memref<8x32xbf16, #tpu.memory_space<vmem>>, %arg2: memref<1x32xf32, #tpu.memory_space<vmem>>, %arg3: memref<1x32xf32, #tpu.memory_space<vmem>>, %arg4: memref<8x32xbf16, #tpu.memory_space<vmem>>) attributes {dimension_semantics = [#tpu.dimension_semantics<parallel>], iteration_bounds = array<i64: 1>, scalar_prefetch = 0 : i64, scratch_operands = 0 : i64, tpu.core_type = #tpu.core_type<tc>, window_params = [{transform_indices = @transform_0, window_bounds = array<i64: 8, 32>}, {pipeline_mode = #tpu.pipeline_mode<synchronous>, transform_indices = @transform_1, window_bounds = array<i64: 1, 32>}, {pipeline_mode = #tpu.pipeline_mode<synchronous>, transform_indices = @transform_2, window_bounds = array<i64: 1, 32>}, {transform_indices = @transform_3, window_bounds = array<i64: 8, 32>}]} {
    %c0 = arith.constant 0 : index
    %c0_0 = arith.constant 0 : index
    %0 = vector.load %arg1[%c0, %c0_0] : memref<8x32xbf16, #tpu.memory_space<vmem>>, vector<8x32xbf16>
    %1 = arith.extf %0 : vector<8x32xbf16> to vector<8x32xf32>
    %cst = arith.constant dense<0.000000e+00> : vector<8xf32>
    %2 = vector.multi_reduction <add>, %1, %cst [1] : vector<8x32xf32> to vector<8xf32>
    %3 = vector.shape_cast %2 : vector<8xf32> to vector<8x1xf32>
    %cst_1 = arith.constant 3.200000e+01 : f32
    %4 = vector.broadcast %cst_1 : f32 to vector<8x1xf32>
    %5 = arith.divf %3, %4 : vector<8x1xf32>
    %6 = vector.broadcast %5 : vector<8x1xf32> to vector<8x32xf32>
    %7 = arith.subf %1, %6 : vector<8x32xf32>
    %8 = arith.mulf %7, %7 : vector<8x32xf32>
    %cst_2 = arith.constant dense<0.000000e+00> : vector<8xf32>
    %9 = vector.multi_reduction <add>, %8, %cst_2 [1] : vector<8x32xf32> to vector<8xf32>
    %10 = vector.shape_cast %9 : vector<8xf32> to vector<8x1xf32>
    %cst_3 = arith.constant 3.200000e+01 : f32
    %11 = vector.broadcast %cst_3 : f32 to vector<8x1xf32>
    %12 = arith.divf %10, %11 : vector<8x1xf32>
    %13 = vector.broadcast %5 : vector<8x1xf32> to vector<8x32xf32>
    %14 = arith.subf %1, %13 : vector<8x32xf32>
    %cst_4 = arith.constant 9.99999974E-6 : f32
    %15 = vector.broadcast %cst_4 : f32 to vector<8x1xf32>
    %16 = arith.addf %12, %15 : vector<8x1xf32>
    %17 = math.rsqrt %16 : vector<8x1xf32>
    %18 = vector.broadcast %17 : vector<8x1xf32> to vector<8x32xf32>
    %19 = arith.mulf %14, %18 : vector<8x32xf32>
    %c0_5 = arith.constant 0 : index
    %c0_6 = arith.constant 0 : index
    %20 = vector.load %arg2[%c0_5, %c0_6] : memref<1x32xf32, #tpu.memory_space<vmem>>, vector<1x32xf32>
    %21 = vector.broadcast %20 : vector<1x32xf32> to vector<8x32xf32>
    %22 = arith.mulf %19, %21 : vector<8x32xf32>
    %c0_7 = arith.constant 0 : index
    %c0_8 = arith.constant 0 : index
    %23 = vector.load %arg3[%c0_7, %c0_8] : memref<1x32xf32, #tpu.memory_space<vmem>>, vector<1x32xf32>
    %24 = vector.broadcast %23 : vector<1x32xf32> to vector<8x32xf32>
    %25 = arith.addf %22, %24 : vector<8x32xf32>
    %26 = arith.truncf %25 : vector<8x32xf32> to vector<8x32xbf16>
    %c0_9 = arith.constant 0 : index
    %c0_10 = arith.constant 0 : index
    %27 = vector.load %arg4[%c0_9, %c0_10] : memref<8x32xbf16, #tpu.memory_space<vmem>>, vector<8x32xbf16>
    tpu.vector_store %arg4[%c0_9, %c0_10], %26 {strides = array<i32>} : memref<8x32xbf16, #tpu.memory_space<vmem>>, vector<8x32xbf16>,
    return
  }
  func.func @transform_0(%arg0: i32) -> (i32, i32) {
    %c0_i32 = arith.constant 0 : i32
    %c0_i32_0 = arith.constant 0 : i32
    return %arg0, %c0_i32 : i32, i32
  }
  func.func @transform_1(%arg0: i32) -> (i32, i32) {
    %c0_i32 = arith.constant 0 : i32
    %c0_i32_0 = arith.constant 0 : i32
    %c0_i32_1 = arith.constant 0 : i32
    return %c0_i32, %c0_i32_0 : i32, i32
  }
  func.func @transform_2(%arg0: i32) -> (i32, i32) {
    %c0_i32 = arith.constant 0 : i32
    %c0_i32_0 = arith.constant 0 : i32
    %c0_i32_1 = arith.constant 0 : i32
    return %c0_i32, %c0_i32_0 : i32, i32
  }
  func.func @transform_3(%arg0: i32) -> (i32, i32) {
    %c0_i32 = arith.constant 0 : i32
    %c0_i32_0 = arith.constant 0 : i32
    return %arg0, %c0_i32 : i32, i32
  }
}

module attributes {stable_mosaic.version = 11 : i64} {
  func.func @_matmul_kernel(%arg0: i32, %arg1: i32, %arg2: i32, %arg3: memref<8x192xbf16, #tpu.memory_space<vmem>>, %arg4: memref<192x128xbf16, #tpu.memory_space<vmem>>, %arg5: memref<1x128xf32, #tpu.memory_space<vmem>>, %arg6: memref<8x128xbf16, #tpu.memory_space<vmem>>, %arg7: memref<8x128xf32, #tpu.memory_space<vmem>>) attributes {dimension_semantics = [#tpu.dimension_semantics<parallel>, #tpu.dimension_semantics<parallel>, #tpu.dimension_semantics<arbitrary>], iteration_bounds = array<i64: 1, 1, 1>, scalar_prefetch = 0 : i64, scratch_operands = 1 : i64, tpu.core_type = #tpu.core_type<tc>, window_params = [{transform_indices = @transform_0, window_bounds = array<i64: 8, 192>}, {transform_indices = @transform_1, window_bounds = array<i64: 192, 128>}, {transform_indices = @transform_2, window_bounds = array<i64: 1, 128>}, {transform_indices = @transform_3, window_bounds = array<i64: 8, 128>}]} {
    %c0_i32 = arith.constant 0 : i32
    %0 = arith.cmpi eq, %arg2, %c0_i32 : i32
    %1 = arith.extui %0 : i1 to i32
    %c0_i32_0 = arith.constant 0 : i32
    %2 = arith.cmpi ne, %1, %c0_i32_0 : i32
    scf.if %2 {
      %cst_10 = arith.constant 0.000000e+00 : f32
      %12 = vector.broadcast %cst_10 : f32 to vector<8x128xf32>
      %c0_11 = arith.constant 0 : index
      %c0_12 = arith.constant 0 : index
      %13 = vector.load %arg7[%c0_11, %c0_12] : memref<8x128xf32, #tpu.memory_space<vmem>>, vector<8x128xf32>
      tpu.vector_store %arg7[%c0_11, %c0_12], %12 {strides = array<i32>} : memref<8x128xf32, #tpu.memory_space<vmem>>, vector<8x128xf32>,
    } else {
    }
    %c0 = arith.constant 0 : index
    %c0_1 = arith.constant 0 : index
    %3 = vector.load %arg7[%c0, %c0_1] : memref<8x128xf32, #tpu.memory_space<vmem>>, vector<8x128xf32>
    %c0_2 = arith.constant 0 : index
    %c0_3 = arith.constant 0 : index
    %4 = vector.load %arg3[%c0_2, %c0_3] : memref<8x192xbf16, #tpu.memory_space<vmem>>, vector<8x192xbf16>
    %c0_4 = arith.constant 0 : index
    %c0_5 = arith.constant 0 : index
    %5 = vector.load %arg4[%c0_4, %c0_5] : memref<192x128xbf16, #tpu.memory_space<vmem>>, vector<192x128xbf16>
    %cst = arith.constant dense<0.000000e+00> : vector<8x128xf32>
    %6 = tpu.matmul %4, %5, %cst {dimension_numbers = #tpu.dot_dimension_numbers<[1], [0], [0], [1], [0, 0, 1, 1], [], []>} : vector<8x192xbf16>, vector<192x128xbf16>, vector<8x128xf32> -> vector<8x128xf32>
    %7 = arith.addf %3, %6 : vector<8x128xf32>
    %c0_6 = arith.constant 0 : index
    %c0_7 = arith.constant 0 : index
    %8 = vector.load %arg7[%c0_6, %c0_7] : memref<8x128xf32, #tpu.memory_space<vmem>>, vector<8x128xf32>
    tpu.vector_store %arg7[%c0_6, %c0_7], %7 {strides = array<i32>} : memref<8x128xf32, #tpu.memory_space<vmem>>, vector<8x128xf32>,
    %c0_i32_8 = arith.constant 0 : i32
    %9 = arith.cmpi eq, %arg2, %c0_i32_8 : i32
    %10 = arith.extui %9 : i1 to i32
    %c0_i32_9 = arith.constant 0 : i32
    %11 = arith.cmpi ne, %10, %c0_i32_9 : i32
    scf.if %11 {
      %c0_10 = arith.constant 0 : index
      %c0_11 = arith.constant 0 : index
      %12 = vector.load %arg7[%c0_10, %c0_11] : memref<8x128xf32, #tpu.memory_space<vmem>>, vector<8x128xf32>
      %c0_12 = arith.constant 0 : index
      %c0_13 = arith.constant 0 : index
      %13 = vector.load %arg5[%c0_12, %c0_13] : memref<1x128xf32, #tpu.memory_space<vmem>>, vector<1x128xf32>
      %14 = vector.broadcast %13 : vector<1x128xf32> to vector<8x128xf32>
      %15 = arith.addf %12, %14 : vector<8x128xf32>
      %16 = arith.truncf %15 : vector<8x128xf32> to vector<8x128xbf16>
      %c0_14 = arith.constant 0 : index
      %c0_15 = arith.constant 0 : index
      %17 = vector.load %arg6[%c0_14, %c0_15] : memref<8x128xbf16, #tpu.memory_space<vmem>>, vector<8x128xbf16>
      tpu.vector_store %arg6[%c0_14, %c0_15], %16 {strides = array<i32>} : memref<8x128xbf16, #tpu.memory_space<vmem>>, vector<8x128xbf16>,
    } else {
    }
    return
  }
  func.func @transform_0(%arg0: i32, %arg1: i32, %arg2: i32) -> (i32, i32) {
    %c0_i32 = arith.constant 0 : i32
    return %arg0, %arg2 : i32, i32
  }
  func.func @transform_1(%arg0: i32, %arg1: i32, %arg2: i32) -> (i32, i32) {
    %c0_i32 = arith.constant 0 : i32
    return %arg2, %arg1 : i32, i32
  }
  func.func @transform_2(%arg0: i32, %arg1: i32, %arg2: i32) -> (i32, i32) {
    %c0_i32 = arith.constant 0 : i32
    %c0_i32_0 = arith.constant 0 : i32
    return %c0_i32, %arg1 : i32, i32
  }
  func.func @transform_3(%arg0: i32, %arg1: i32, %arg2: i32) -> (i32, i32) {
    %c0_i32 = arith.constant 0 : i32
    return %arg0, %arg1 : i32, i32
  }
}

module attributes {stable_mosaic.version = 11 : i64} {
  func.func @_matmul_kernel(%arg0: i32, %arg1: i32, %arg2: i32, %arg3: memref<8x32xbf16, #tpu.memory_space<vmem>>, %arg4: memref<32x128xbf16, #tpu.memory_space<vmem>>, %arg5: memref<1x128xf32, #tpu.memory_space<vmem>>, %arg6: memref<8x128xbf16, #tpu.memory_space<vmem>>, %arg7: memref<8x128xf32, #tpu.memory_space<vmem>>) attributes {dimension_semantics = [#tpu.dimension_semantics<parallel>, #tpu.dimension_semantics<parallel>, #tpu.dimension_semantics<arbitrary>], iteration_bounds = array<i64: 1, 1, 1>, scalar_prefetch = 0 : i64, scratch_operands = 1 : i64, tpu.core_type = #tpu.core_type<tc>, window_params = [{transform_indices = @transform_0, window_bounds = array<i64: 8, 32>}, {transform_indices = @transform_1, window_bounds = array<i64: 32, 128>}, {transform_indices = @transform_2, window_bounds = array<i64: 1, 128>}, {transform_indices = @transform_3, window_bounds = array<i64: 8, 128>}]} {
    %c0_i32 = arith.constant 0 : i32
    %0 = arith.cmpi eq, %arg2, %c0_i32 : i32
    %1 = arith.extui %0 : i1 to i32
    %c0_i32_0 = arith.constant 0 : i32
    %2 = arith.cmpi ne, %1, %c0_i32_0 : i32
    scf.if %2 {
      %cst_10 = arith.constant 0.000000e+00 : f32
      %12 = vector.broadcast %cst_10 : f32 to vector<8x128xf32>
      %c0_11 = arith.constant 0 : index
      %c0_12 = arith.constant 0 : index
      %13 = vector.load %arg7[%c0_11, %c0_12] : memref<8x128xf32, #tpu.memory_space<vmem>>, vector<8x128xf32>
      tpu.vector_store %arg7[%c0_11, %c0_12], %12 {strides = array<i32>} : memref<8x128xf32, #tpu.memory_space<vmem>>, vector<8x128xf32>,
    } else {
    }
    %c0 = arith.constant 0 : index
    %c0_1 = arith.constant 0 : index
    %3 = vector.load %arg7[%c0, %c0_1] : memref<8x128xf32, #tpu.memory_space<vmem>>, vector<8x128xf32>
    %c0_2 = arith.constant 0 : index
    %c0_3 = arith.constant 0 : index
    %4 = vector.load %arg3[%c0_2, %c0_3] : memref<8x32xbf16, #tpu.memory_space<vmem>>, vector<8x32xbf16>
    %c0_4 = arith.constant 0 : index
    %c0_5 = arith.constant 0 : index
    %5 = vector.load %arg4[%c0_4, %c0_5] : memref<32x128xbf16, #tpu.memory_space<vmem>>, vector<32x128xbf16>
    %cst = arith.constant dense<0.000000e+00> : vector<8x128xf32>
    %6 = tpu.matmul %4, %5, %cst {dimension_numbers = #tpu.dot_dimension_numbers<[1], [0], [0], [1], [0, 0, 1, 1], [], []>} : vector<8x32xbf16>, vector<32x128xbf16>, vector<8x128xf32> -> vector<8x128xf32>
    %7 = arith.addf %3, %6 : vector<8x128xf32>
    %c0_6 = arith.constant 0 : index
    %c0_7 = arith.constant 0 : index
    %8 = vector.load %arg7[%c0_6, %c0_7] : memref<8x128xf32, #tpu.memory_space<vmem>>, vector<8x128xf32>
    tpu.vector_store %arg7[%c0_6, %c0_7], %7 {strides = array<i32>} : memref<8x128xf32, #tpu.memory_space<vmem>>, vector<8x128xf32>,
    %c0_i32_8 = arith.constant 0 : i32
    %9 = arith.cmpi eq, %arg2, %c0_i32_8 : i32
    %10 = arith.extui %9 : i1 to i32
    %c0_i32_9 = arith.constant 0 : i32
    %11 = arith.cmpi ne, %10, %c0_i32_9 : i32
    scf.if %11 {
      %c0_10 = arith.constant 0 : index
      %c0_11 = arith.constant 0 : index
      %12 = vector.load %arg7[%c0_10, %c0_11] : memref<8x128xf32, #tpu.memory_space<vmem>>, vector<8x128xf32>
      %c0_12 = arith.constant 0 : index
      %c0_13 = arith.constant 0 : index
      %13 = vector.load %arg5[%c0_12, %c0_13] : memref<1x128xf32, #tpu.memory_space<vmem>>, vector<1x128xf32>
      %14 = vector.broadcast %13 : vector<1x128xf32> to vector<8x128xf32>
      %15 = arith.addf %12, %14 : vector<8x128xf32>
      %16 = arith.truncf %15 : vector<8x128xf32> to vector<8x128xbf16>
      %c0_14 = arith.constant 0 : index
      %c0_15 = arith.constant 0 : index
      %17 = vector.load %arg6[%c0_14, %c0_15] : memref<8x128xbf16, #tpu.memory_space<vmem>>, vector<8x128xbf16>
      tpu.vector_store %arg6[%c0_14, %c0_15], %16 {strides = array<i32>} : memref<8x128xbf16, #tpu.memory_space<vmem>>, vector<8x128xbf16>,
    } else {
    }
    return
  }
  func.func @transform_0(%arg0: i32, %arg1: i32, %arg2: i32) -> (i32, i32) {
    %c0_i32 = arith.constant 0 : i32
    return %arg0, %arg2 : i32, i32
  }
  func.func @transform_1(%arg0: i32, %arg1: i32, %arg2: i32) -> (i32, i32) {
    %c0_i32 = arith.constant 0 : i32
    return %arg2, %arg1 : i32, i32
  }
  func.func @transform_2(%arg0: i32, %arg1: i32, %arg2: i32) -> (i32, i32) {
    %c0_i32 = arith.constant 0 : i32
    %c0_i32_0 = arith.constant 0 : i32
    return %c0_i32, %arg1 : i32, i32
  }
  func.func @transform_3(%arg0: i32, %arg1: i32, %arg2: i32) -> (i32, i32) {
    %c0_i32 = arith.constant 0 : i32
    return %arg0, %arg1 : i32, i32
  }
}

module attributes {stable_mosaic.version = 11 : i64} {
  func.func @_attn_kernel(%arg0: i32, %arg1: i32, %arg2: i32, %arg3: i32, %arg4: memref<1x1x4x8xbf16, #tpu.memory_space<vmem>>, %arg5: memref<1x1x8x8xbf16, #tpu.memory_space<vmem>>, %arg6: memref<1x1x8x8xbf16, #tpu.memory_space<vmem>>, %arg7: memref<1x1x8xf32, #tpu.memory_space<vmem>>, %arg8: memref<1x1x4x8xbf16, #tpu.memory_space<vmem>>, %arg9: memref<4x1xf32, #tpu.memory_space<vmem>>, %arg10: memref<4x1xf32, #tpu.memory_space<vmem>>, %arg11: memref<4x8xf32, #tpu.memory_space<vmem>>) attributes {dimension_semantics = [#tpu.dimension_semantics<parallel>, #tpu.dimension_semantics<parallel>, #tpu.dimension_semantics<parallel>, #tpu.dimension_semantics<arbitrary>], iteration_bounds = array<i64: 2, 4, 1, 1>, scalar_prefetch = 0 : i64, scratch_operands = 3 : i64, tpu.core_type = #tpu.core_type<tc>, window_params = [{transform_indices = @transform_0, window_bounds = array<i64: 1, 1, 4, 8>}, {transform_indices = @transform_1, window_bounds = array<i64: 1, 1, 8, 8>}, {transform_indices = @transform_2, window_bounds = array<i64: 1, 1, 8, 8>}, {transform_indices = @transform_3, window_bounds = array<i64: 1, 1, 8>}, {transform_indices = @transform_4, window_bounds = array<i64: 1, 1, 4, 8>}]} {
    %c0_i32 = arith.constant 0 : i32
    %0 = arith.cmpi eq, %arg3, %c0_i32 : i32
    %1 = arith.extui %0 : i1 to i32
    %c0_i32_0 = arith.constant 0 : i32
    %2 = arith.cmpi ne, %1, %c0_i32_0 : i32
    scf.if %2 {
      %cst_34 = arith.constant 0xFF800000 : f32
      %44 = vector.broadcast %cst_34 : f32 to vector<4x1xf32>
      %c0_35 = arith.constant 0 : index
      %c0_36 = arith.constant 0 : index
      %45 = vector.load %arg9[%c0_35, %c0_36] : memref<4x1xf32, #tpu.memory_space<vmem>>, vector<4x1xf32>
      tpu.vector_store %arg9[%c0_35, %c0_36], %44 {strides = array<i32>} : memref<4x1xf32, #tpu.memory_space<vmem>>, vector<4x1xf32>,
      %cst_37 = arith.constant 0.000000e+00 : f32
      %46 = vector.broadcast %cst_37 : f32 to vector<4x1xf32>
      %c0_38 = arith.constant 0 : index
      %c0_39 = arith.constant 0 : index
      %47 = vector.load %arg10[%c0_38, %c0_39] : memref<4x1xf32, #tpu.memory_space<vmem>>, vector<4x1xf32>
      tpu.vector_store %arg10[%c0_38, %c0_39], %46 {strides = array<i32>} : memref<4x1xf32, #tpu.memory_space<vmem>>, vector<4x1xf32>,
      %cst_40 = arith.constant 0.000000e+00 : f32
      %48 = vector.broadcast %cst_40 : f32 to vector<4x8xf32>
      %c0_41 = arith.constant 0 : index
      %c0_42 = arith.constant 0 : index
      %49 = vector.load %arg11[%c0_41, %c0_42] : memref<4x8xf32, #tpu.memory_space<vmem>>, vector<4x8xf32>
      tpu.vector_store %arg11[%c0_41, %c0_42], %48 {strides = array<i32>} : memref<4x8xf32, #tpu.memory_space<vmem>>, vector<4x8xf32>,
    } else {
    }
    %c0 = arith.constant 0 : index
    %c0_1 = arith.constant 0 : index
    %c0_2 = arith.constant 0 : index
    %c0_3 = arith.constant 0 : index
    %3 = vector.load %arg4[%c0, %c0_1, %c0_2, %c0_3] : memref<1x1x4x8xbf16, #tpu.memory_space<vmem>>, vector<1x1x4x8xbf16>
    %4 = vector.shape_cast %3 : vector<1x1x4x8xbf16> to vector<4x8xbf16>
    %c0_4 = arith.constant 0 : index
    %c0_5 = arith.constant 0 : index
    %c0_6 = arith.constant 0 : index
    %c0_7 = arith.constant 0 : index
    %5 = vector.load %arg5[%c0_4, %c0_5, %c0_6, %c0_7] : memref<1x1x8x8xbf16, #tpu.memory_space<vmem>>, vector<1x1x8x8xbf16>
    %6 = vector.shape_cast %5 : vector<1x1x8x8xbf16> to vector<8x8xbf16>
    %c0_8 = arith.constant 0 : index
    %c0_9 = arith.constant 0 : index
    %c0_10 = arith.constant 0 : index
    %c0_11 = arith.constant 0 : index
    %7 = vector.load %arg6[%c0_8, %c0_9, %c0_10, %c0_11] : memref<1x1x8x8xbf16, #tpu.memory_space<vmem>>, vector<1x1x8x8xbf16>
    %8 = vector.shape_cast %7 : vector<1x1x8x8xbf16> to vector<8x8xbf16>
    %c0_12 = arith.constant 0 : index
    %c0_13 = arith.constant 0 : index
    %c0_14 = arith.constant 0 : index
    %9 = vector.load %arg7[%c0_12, %c0_13, %c0_14] : memref<1x1x8xf32, #tpu.memory_space<vmem>>, vector<1x1x8xf32>
    %10 = vector.shape_cast %9 : vector<1x1x8xf32> to vector<1x8xf32>
    %cst = arith.constant 0.000000e+00 : f32
    %11 = vector.broadcast %cst : f32 to vector<1x8xf32>
    %12 = arith.cmpf ogt, %10, %11 : vector<1x8xf32>
    %cst_15 = arith.constant dense<0.000000e+00> : vector<4x8xf32>
    %13 = tpu.matmul %4, %6, %cst_15 {dimension_numbers = #tpu.dot_dimension_numbers<[1], [1], [0], [0], [0, 0, 1, 0], [], []>} : vector<4x8xbf16>, vector<8x8xbf16>, vector<4x8xf32> -> vector<4x8xf32>
    %14 = vector.shape_cast %12 : vector<1x8xi1> to vector<1x8xi1>
    %15 = vector.broadcast %14 : vector<1x8xi1> to vector<4x8xi1>
    %cst_16 = arith.constant -1.000000e+09 : f32
    %16 = vector.broadcast %cst_16 : f32 to vector<4x8xf32>
    %17 = arith.select %15, %13, %16 : vector<4x8xi1>, vector<4x8xf32>
    %c0_17 = arith.constant 0 : index
    %c0_18 = arith.constant 0 : index
    %18 = vector.load %arg9[%c0_17, %c0_18] : memref<4x1xf32, #tpu.memory_space<vmem>>, vector<4x1xf32>
    %cst_19 = arith.constant dense<0xFF800000> : vector<4xf32>
    %19 = vector.multi_reduction <maximumf>, %17, %cst_19 [1] : vector<4x8xf32> to vector<4xf32>
    %20 = vector.shape_cast %19 : vector<4xf32> to vector<4x1xf32>
    %21 = arith.maximumf %18, %20 : vector<4x1xf32>
    %22 = arith.subf %18, %21 : vector<4x1xf32>
    %23 = math.exp %22 : vector<4x1xf32>
    %24 = vector.broadcast %21 : vector<4x1xf32> to vector<4x8xf32>
    %25 = arith.subf %17, %24 : vector<4x8xf32>
    %26 = math.exp %25 : vector<4x8xf32>
    %c0_20 = arith.constant 0 : index
    %c0_21 = arith.constant 0 : index
    %27 = vector.load %arg10[%c0_20, %c0_21] : memref<4x1xf32, #tpu.memory_space<vmem>>, vector<4x1xf32>
    %28 = arith.mulf %23, %27 : vector<4x1xf32>
    %cst_22 = arith.constant dense<0.000000e+00> : vector<4xf32>
    %29 = vector.multi_reduction <add>, %26, %cst_22 [1] : vector<4x8xf32> to vector<4xf32>
    %30 = vector.shape_cast %29 : vector<4xf32> to vector<4x1xf32>
    %31 = arith.addf %28, %30 : vector<4x1xf32>
    %c0_23 = arith.constant 0 : index
    %c0_24 = arith.constant 0 : index
    %32 = vector.load %arg10[%c0_23, %c0_24] : memref<4x1xf32, #tpu.memory_space<vmem>>, vector<4x1xf32>
    tpu.vector_store %arg10[%c0_23, %c0_24], %31 {strides = array<i32>} : memref<4x1xf32, #tpu.memory_space<vmem>>, vector<4x1xf32>,
    %c0_25 = arith.constant 0 : index
    %c0_26 = arith.constant 0 : index
    %33 = vector.load %arg11[%c0_25, %c0_26] : memref<4x8xf32, #tpu.memory_space<vmem>>, vector<4x8xf32>
    %34 = vector.broadcast %23 : vector<4x1xf32> to vector<4x8xf32>
    %35 = arith.mulf %34, %33 : vector<4x8xf32>
    %36 = arith.truncf %26 : vector<4x8xf32> to vector<4x8xbf16>
    %cst_27 = arith.constant dense<0.000000e+00> : vector<4x8xf32>
    %37 = tpu.matmul %36, %8, %cst_27 {dimension_numbers = #tpu.dot_dimension_numbers<[1], [0], [0], [1], [0, 0, 1, 1], [], []>} : vector<4x8xbf16>, vector<8x8xbf16>, vector<4x8xf32> -> vector<4x8xf32>
    %38 = arith.addf %35, %37 : vector<4x8xf32>
    %c0_28 = arith.constant 0 : index
    %c0_29 = arith.constant 0 : index
    %39 = vector.load %arg11[%c0_28, %c0_29] : memref<4x8xf32, #tpu.memory_space<vmem>>, vector<4x8xf32>
    tpu.vector_store %arg11[%c0_28, %c0_29], %38 {strides = array<i32>} : memref<4x8xf32, #tpu.memory_space<vmem>>, vector<4x8xf32>,
    %c0_30 = arith.constant 0 : index
    %c0_31 = arith.constant 0 : index
    %40 = vector.load %arg9[%c0_30, %c0_31] : memref<4x1xf32, #tpu.memory_space<vmem>>, vector<4x1xf32>
    tpu.vector_store %arg9[%c0_30, %c0_31], %21 {strides = array<i32>} : memref<4x1xf32, #tpu.memory_space<vmem>>, vector<4x1xf32>,
    %c0_i32_32 = arith.constant 0 : i32
    %41 = arith.cmpi eq, %arg3, %c0_i32_32 : i32
    %42 = arith.extui %41 : i1 to i32
    %c0_i32_33 = arith.constant 0 : i32
    %43 = arith.cmpi ne, %42, %c0_i32_33 : i32
    scf.if %43 {
      %c0_34 = arith.constant 0 : index
      %c0_35 = arith.constant 0 : index
      %44 = vector.load %arg11[%c0_34, %c0_35] : memref<4x8xf32, #tpu.memory_space<vmem>>, vector<4x8xf32>
      %c0_36 = arith.constant 0 : index
      %c0_37 = arith.constant 0 : index
      %45 = vector.load %arg10[%c0_36, %c0_37] : memref<4x1xf32, #tpu.memory_space<vmem>>, vector<4x1xf32>
      %46 = tpu.reciprocal %45 {approx = true} : vector<4x1xf32> -> vector<4x1xf32>
      %47 = vector.broadcast %46 : vector<4x1xf32> to vector<4x8xf32>
      %48 = arith.mulf %44, %47 : vector<4x8xf32>
      %49 = arith.truncf %48 : vector<4x8xf32> to vector<4x8xbf16>
      %c0_38 = arith.constant 0 : index
      %c0_39 = arith.constant 0 : index
      %c0_40 = arith.constant 0 : index
      %c0_41 = arith.constant 0 : index
      %50 = vector.load %arg8[%c0_38, %c0_39, %c0_40, %c0_41] : memref<1x1x4x8xbf16, #tpu.memory_space<vmem>>, vector<1x1x4x8xbf16>
      %51 = vector.shape_cast %50 : vector<1x1x4x8xbf16> to vector<4x8xbf16>
      %52 = vector.shape_cast %49 : vector<4x8xbf16> to vector<1x1x4x8xbf16>
      tpu.vector_store %arg8[%c0_38, %c0_39, %c0_40, %c0_41], %52 {strides = array<i32>} : memref<1x1x4x8xbf16, #tpu.memory_space<vmem>>, vector<1x1x4x8xbf16>,
    } else {
    }
    return
  }
  func.func @transform_0(%arg0: i32, %arg1: i32, %arg2: i32, %arg3: i32) -> (i32, i32, i32, i32) {
    %c0_i32 = arith.constant 0 : i32
    %c0_i32_0 = arith.constant 0 : i32
    return %arg0, %arg1, %arg2, %c0_i32 : i32, i32, i32, i32
  }
  func.func @transform_1(%arg0: i32, %arg1: i32, %arg2: i32, %arg3: i32) -> (i32, i32, i32, i32) {
    %c0_i32 = arith.constant 0 : i32
    %c0_i32_0 = arith.constant 0 : i32
    return %arg0, %arg1, %arg3, %c0_i32 : i32, i32, i32, i32
  }
  func.func @transform_2(%arg0: i32, %arg1: i32, %arg2: i32, %arg3: i32) -> (i32, i32, i32, i32) {
    %c0_i32 = arith.constant 0 : i32
    %c0_i32_0 = arith.constant 0 : i32
    return %arg0, %arg1, %arg3, %c0_i32 : i32, i32, i32, i32
  }
  func.func @transform_3(%arg0: i32, %arg1: i32, %arg2: i32, %arg3: i32) -> (i32, i32, i32) {
    %c0_i32 = arith.constant 0 : i32
    %c0_i32_0 = arith.constant 0 : i32
    return %arg0, %c0_i32, %arg3 : i32, i32, i32
  }
  func.func @transform_4(%arg0: i32, %arg1: i32, %arg2: i32, %arg3: i32) -> (i32, i32, i32, i32) {
    %c0_i32 = arith.constant 0 : i32
    %c0_i32_0 = arith.constant 0 : i32
    return %arg0, %arg1, %arg2, %c0_i32 : i32, i32, i32, i32
  }
}

module attributes {stable_mosaic.version = 11 : i64} {
  func.func @_matmul_kernel(%arg0: i32, %arg1: i32, %arg2: i32, %arg3: memref<8x64xbf16, #tpu.memory_space<vmem>>, %arg4: memref<64x128xbf16, #tpu.memory_space<vmem>>, %arg5: memref<1x128xf32, #tpu.memory_space<vmem>>, %arg6: memref<8x128xbf16, #tpu.memory_space<vmem>>, %arg7: memref<8x128xf32, #tpu.memory_space<vmem>>) attributes {dimension_semantics = [#tpu.dimension_semantics<parallel>, #tpu.dimension_semantics<parallel>, #tpu.dimension_semantics<arbitrary>], iteration_bounds = array<i64: 1, 1, 1>, scalar_prefetch = 0 : i64, scratch_operands = 1 : i64, tpu.core_type = #tpu.core_type<tc>, window_params = [{transform_indices = @transform_0, window_bounds = array<i64: 8, 64>}, {transform_indices = @transform_1, window_bounds = array<i64: 64, 128>}, {transform_indices = @transform_2, window_bounds = array<i64: 1, 128>}, {transform_indices = @transform_3, window_bounds = array<i64: 8, 128>}]} {
    %c0_i32 = arith.constant 0 : i32
    %0 = arith.cmpi eq, %arg2, %c0_i32 : i32
    %1 = arith.extui %0 : i1 to i32
    %c0_i32_0 = arith.constant 0 : i32
    %2 = arith.cmpi ne, %1, %c0_i32_0 : i32
    scf.if %2 {
      %cst_10 = arith.constant 0.000000e+00 : f32
      %12 = vector.broadcast %cst_10 : f32 to vector<8x128xf32>
      %c0_11 = arith.constant 0 : index
      %c0_12 = arith.constant 0 : index
      %13 = vector.load %arg7[%c0_11, %c0_12] : memref<8x128xf32, #tpu.memory_space<vmem>>, vector<8x128xf32>
      tpu.vector_store %arg7[%c0_11, %c0_12], %12 {strides = array<i32>} : memref<8x128xf32, #tpu.memory_space<vmem>>, vector<8x128xf32>,
    } else {
    }
    %c0 = arith.constant 0 : index
    %c0_1 = arith.constant 0 : index
    %3 = vector.load %arg7[%c0, %c0_1] : memref<8x128xf32, #tpu.memory_space<vmem>>, vector<8x128xf32>
    %c0_2 = arith.constant 0 : index
    %c0_3 = arith.constant 0 : index
    %4 = vector.load %arg3[%c0_2, %c0_3] : memref<8x64xbf16, #tpu.memory_space<vmem>>, vector<8x64xbf16>
    %c0_4 = arith.constant 0 : index
    %c0_5 = arith.constant 0 : index
    %5 = vector.load %arg4[%c0_4, %c0_5] : memref<64x128xbf16, #tpu.memory_space<vmem>>, vector<64x128xbf16>
    %cst = arith.constant dense<0.000000e+00> : vector<8x128xf32>
    %6 = tpu.matmul %4, %5, %cst {dimension_numbers = #tpu.dot_dimension_numbers<[1], [0], [0], [1], [0, 0, 1, 1], [], []>} : vector<8x64xbf16>, vector<64x128xbf16>, vector<8x128xf32> -> vector<8x128xf32>
    %7 = arith.addf %3, %6 : vector<8x128xf32>
    %c0_6 = arith.constant 0 : index
    %c0_7 = arith.constant 0 : index
    %8 = vector.load %arg7[%c0_6, %c0_7] : memref<8x128xf32, #tpu.memory_space<vmem>>, vector<8x128xf32>
    tpu.vector_store %arg7[%c0_6, %c0_7], %7 {strides = array<i32>} : memref<8x128xf32, #tpu.memory_space<vmem>>, vector<8x128xf32>,
    %c0_i32_8 = arith.constant 0 : i32
    %9 = arith.cmpi eq, %arg2, %c0_i32_8 : i32
    %10 = arith.extui %9 : i1 to i32
    %c0_i32_9 = arith.constant 0 : i32
    %11 = arith.cmpi ne, %10, %c0_i32_9 : i32
    scf.if %11 {
      %c0_10 = arith.constant 0 : index
      %c0_11 = arith.constant 0 : index
      %12 = vector.load %arg7[%c0_10, %c0_11] : memref<8x128xf32, #tpu.memory_space<vmem>>, vector<8x128xf32>
      %c0_12 = arith.constant 0 : index
      %c0_13 = arith.constant 0 : index
      %13 = vector.load %arg5[%c0_12, %c0_13] : memref<1x128xf32, #tpu.memory_space<vmem>>, vector<1x128xf32>
      %14 = vector.broadcast %13 : vector<1x128xf32> to vector<8x128xf32>
      %15 = arith.addf %12, %14 : vector<8x128xf32>
      %16 = arith.truncf %15 : vector<8x128xf32> to vector<8x128xbf16>
      %c0_14 = arith.constant 0 : index
      %c0_15 = arith.constant 0 : index
      %17 = vector.load %arg6[%c0_14, %c0_15] : memref<8x128xbf16, #tpu.memory_space<vmem>>, vector<8x128xbf16>
      tpu.vector_store %arg6[%c0_14, %c0_15], %16 {strides = array<i32>} : memref<8x128xbf16, #tpu.memory_space<vmem>>, vector<8x128xbf16>,
    } else {
    }
    return
  }
  func.func @transform_0(%arg0: i32, %arg1: i32, %arg2: i32) -> (i32, i32) {
    %c0_i32 = arith.constant 0 : i32
    return %arg0, %arg2 : i32, i32
  }
  func.func @transform_1(%arg0: i32, %arg1: i32, %arg2: i32) -> (i32, i32) {
    %c0_i32 = arith.constant 0 : i32
    return %arg2, %arg1 : i32, i32
  }
  func.func @transform_2(%arg0: i32, %arg1: i32, %arg2: i32) -> (i32, i32) {
    %c0_i32 = arith.constant 0 : i32
    %c0_i32_0 = arith.constant 0 : i32
    return %c0_i32, %arg1 : i32, i32
  }
  func.func @transform_3(%arg0: i32, %arg1: i32, %arg2: i32) -> (i32, i32) {
    %c0_i32 = arith.constant 0 : i32
    return %arg0, %arg1 : i32, i32
  }
}

module attributes {stable_mosaic.version = 11 : i64} {
  func.func @_ln_matmul_kernel(%arg0: i32, %arg1: i32, %arg2: memref<8x32xbf16, #tpu.memory_space<vmem>>, %arg3: memref<1x32xf32, #tpu.memory_space<vmem>>, %arg4: memref<1x32xf32, #tpu.memory_space<vmem>>, %arg5: memref<32x128xbf16, #tpu.memory_space<vmem>>, %arg6: memref<1x128xf32, #tpu.memory_space<vmem>>, %arg7: memref<8x128xbf16, #tpu.memory_space<vmem>>, %arg8: memref<8x32xbf16, #tpu.memory_space<vmem>>) attributes {dimension_semantics = [#tpu.dimension_semantics<parallel>, #tpu.dimension_semantics<arbitrary>], iteration_bounds = array<i64: 1, 1>, scalar_prefetch = 0 : i64, scratch_operands = 1 : i64, tpu.core_type = #tpu.core_type<tc>, window_params = [{transform_indices = @transform_0, window_bounds = array<i64: 8, 32>}, {pipeline_mode = #tpu.pipeline_mode<synchronous>, transform_indices = @transform_1, window_bounds = array<i64: 1, 32>}, {pipeline_mode = #tpu.pipeline_mode<synchronous>, transform_indices = @transform_2, window_bounds = array<i64: 1, 32>}, {transform_indices = @transform_3, window_bounds = array<i64: 32, 128>}, {transform_indices = @transform_4, window_bounds = array<i64: 1, 128>}, {transform_indices = @transform_5, window_bounds = array<i64: 8, 128>}]} {
    %c0_i32 = arith.constant 0 : i32
    %0 = arith.cmpi eq, %arg1, %c0_i32 : i32
    %1 = arith.extui %0 : i1 to i32
    %c0_i32_0 = arith.constant 0 : i32
    %2 = arith.cmpi ne, %1, %c0_i32_0 : i32
    scf.if %2 {
      %c0_12 = arith.constant 0 : index
      %c0_13 = arith.constant 0 : index
      %24 = vector.load %arg2[%c0_12, %c0_13] : memref<8x32xbf16, #tpu.memory_space<vmem>>, vector<8x32xbf16>
      %25 = arith.extf %24 : vector<8x32xbf16> to vector<8x32xf32>
      %cst_14 = arith.constant dense<0.000000e+00> : vector<8xf32>
      %26 = vector.multi_reduction <add>, %25, %cst_14 [1] : vector<8x32xf32> to vector<8xf32>
      %27 = vector.shape_cast %26 : vector<8xf32> to vector<8x1xf32>
      %cst_15 = arith.constant 3.200000e+01 : f32
      %28 = vector.broadcast %cst_15 : f32 to vector<8x1xf32>
      %29 = arith.divf %27, %28 : vector<8x1xf32>
      %30 = vector.broadcast %29 : vector<8x1xf32> to vector<8x32xf32>
      %31 = arith.subf %25, %30 : vector<8x32xf32>
      %32 = arith.mulf %31, %31 : vector<8x32xf32>
      %cst_16 = arith.constant dense<0.000000e+00> : vector<8xf32>
      %33 = vector.multi_reduction <add>, %32, %cst_16 [1] : vector<8x32xf32> to vector<8xf32>
      %34 = vector.shape_cast %33 : vector<8xf32> to vector<8x1xf32>
      %cst_17 = arith.constant 3.200000e+01 : f32
      %35 = vector.broadcast %cst_17 : f32 to vector<8x1xf32>
      %36 = arith.divf %34, %35 : vector<8x1xf32>
      %37 = vector.broadcast %29 : vector<8x1xf32> to vector<8x32xf32>
      %38 = arith.subf %25, %37 : vector<8x32xf32>
      %cst_18 = arith.constant 9.99999974E-6 : f32
      %39 = vector.broadcast %cst_18 : f32 to vector<8x1xf32>
      %40 = arith.addf %36, %39 : vector<8x1xf32>
      %41 = math.rsqrt %40 : vector<8x1xf32>
      %42 = vector.broadcast %41 : vector<8x1xf32> to vector<8x32xf32>
      %43 = arith.mulf %38, %42 : vector<8x32xf32>
      %c0_19 = arith.constant 0 : index
      %c0_20 = arith.constant 0 : index
      %44 = vector.load %arg3[%c0_19, %c0_20] : memref<1x32xf32, #tpu.memory_space<vmem>>, vector<1x32xf32>
      %45 = vector.broadcast %44 : vector<1x32xf32> to vector<8x32xf32>
      %46 = arith.mulf %43, %45 : vector<8x32xf32>
      %c0_21 = arith.constant 0 : index
      %c0_22 = arith.constant 0 : index
      %47 = vector.load %arg4[%c0_21, %c0_22] : memref<1x32xf32, #tpu.memory_space<vmem>>, vector<1x32xf32>
      %48 = vector.broadcast %47 : vector<1x32xf32> to vector<8x32xf32>
      %49 = arith.addf %46, %48 : vector<8x32xf32>
      %50 = arith.truncf %49 : vector<8x32xf32> to vector<8x32xbf16>
      %c0_23 = arith.constant 0 : index
      %c0_24 = arith.constant 0 : index
      %51 = vector.load %arg8[%c0_23, %c0_24] : memref<8x32xbf16, #tpu.memory_space<vmem>>, vector<8x32xbf16>
      tpu.vector_store %arg8[%c0_23, %c0_24], %50 {strides = array<i32>} : memref<8x32xbf16, #tpu.memory_space<vmem>>, vector<8x32xbf16>,
    } else {
    }
    %c0 = arith.constant 0 : index
    %c0_1 = arith.constant 0 : index
    %3 = vector.load %arg8[%c0, %c0_1] : memref<8x32xbf16, #tpu.memory_space<vmem>>, vector<8x32xbf16>
    %c0_2 = arith.constant 0 : index
    %c0_3 = arith.constant 0 : index
    %4 = vector.load %arg5[%c0_2, %c0_3] : memref<32x128xbf16, #tpu.memory_space<vmem>>, vector<32x128xbf16>
    %cst = arith.constant dense<0.000000e+00> : vector<8x128xf32>
    %5 = tpu.matmul %3, %4, %cst {dimension_numbers = #tpu.dot_dimension_numbers<[1], [0], [0], [1], [0, 0, 1, 1], [], []>} : vector<8x32xbf16>, vector<32x128xbf16>, vector<8x128xf32> -> vector<8x128xf32>
    %c0_4 = arith.constant 0 : index
    %c0_5 = arith.constant 0 : index
    %6 = vector.load %arg6[%c0_4, %c0_5] : memref<1x128xf32, #tpu.memory_space<vmem>>, vector<1x128xf32>
    %7 = vector.broadcast %6 : vector<1x128xf32> to vector<8x128xf32>
    %8 = arith.addf %5, %7 : vector<8x128xf32>
    %9 = arith.mulf %8, %8 : vector<8x128xf32>
    %10 = arith.mulf %8, %9 : vector<8x128xf32>
    %cst_6 = arith.constant 4.471500e-02 : f32
    %11 = vector.broadcast %cst_6 : f32 to vector<8x128xf32>
    %12 = arith.mulf %11, %10 : vector<8x128xf32>
    %13 = arith.addf %8, %12 : vector<8x128xf32>
    %cst_7 = arith.constant 0.797884583 : f32
    %14 = vector.broadcast %cst_7 : f32 to vector<8x128xf32>
    %15 = arith.mulf %14, %13 : vector<8x128xf32>
    %16 = math.tanh %15 : vector<8x128xf32>
    %cst_8 = arith.constant 1.000000e+00 : f32
    %17 = vector.broadcast %cst_8 : f32 to vector<8x128xf32>
    %18 = arith.addf %17, %16 : vector<8x128xf32>
    %cst_9 = arith.constant 5.000000e-01 : f32
    %19 = vector.broadcast %cst_9 : f32 to vector<8x128xf32>
    %20 = arith.mulf %19, %18 : vector<8x128xf32>
    %21 = arith.mulf %8, %20 : vector<8x128xf32>
    %22 = arith.truncf %21 : vector<8x128xf32> to vector<8x128xbf16>
    %c0_10 = arith.constant 0 : index
    %c0_11 = arith.constant 0 : index
    %23 = vector.load %arg7[%c0_10, %c0_11] : memref<8x128xbf16, #tpu.memory_space<vmem>>, vector<8x128xbf16>
    tpu.vector_store %arg7[%c0_10, %c0_11], %22 {strides = array<i32>} : memref<8x128xbf16, #tpu.memory_space<vmem>>, vector<8x128xbf16>,
    return
  }
  func.func @transform_0(%arg0: i32, %arg1: i32) -> (i32, i32) {
    %c0_i32 = arith.constant 0 : i32
    %c0_i32_0 = arith.constant 0 : i32
    return %arg0, %c0_i32 : i32, i32
  }
  func.func @transform_1(%arg0: i32, %arg1: i32) -> (i32, i32) {
    %c0_i32 = arith.constant 0 : i32
    %c0_i32_0 = arith.constant 0 : i32
    %c0_i32_1 = arith.constant 0 : i32
    return %c0_i32, %c0_i32_0 : i32, i32
  }
  func.func @transform_2(%arg0: i32, %arg1: i32) -> (i32, i32) {
    %c0_i32 = arith.constant 0 : i32
    %c0_i32_0 = arith.constant 0 : i32
    %c0_i32_1 = arith.constant 0 : i32
    return %c0_i32, %c0_i32_0 : i32, i32
  }
  func.func @transform_3(%arg0: i32, %arg1: i32) -> (i32, i32) {
    %c0_i32 = arith.constant 0 : i32
    %c0_i32_0 = arith.constant 0 : i32
    return %c0_i32, %arg1 : i32, i32
  }
  func.func @transform_4(%arg0: i32, %arg1: i32) -> (i32, i32) {
    %c0_i32 = arith.constant 0 : i32
    %c0_i32_0 = arith.constant 0 : i32
    return %c0_i32, %arg1 : i32, i32
  }
  func.func @transform_5(%arg0: i32, %arg1: i32) -> (i32, i32) {
    %c0_i32 = arith.constant 0 : i32
    return %arg0, %arg1 : i32, i32
  }
}

module attributes {stable_mosaic.version = 11 : i64} {
  func.func @_attn_kernel(%arg0: i32, %arg1: i32, %arg2: i32, %arg3: i32, %arg4: memref<1x1x8x8xbf16, #tpu.memory_space<vmem>>, %arg5: memref<1x1x4x8xbf16, #tpu.memory_space<vmem>>, %arg6: memref<1x1x4x8xbf16, #tpu.memory_space<vmem>>, %arg7: memref<1x1x4xf32, #tpu.memory_space<vmem>>, %arg8: memref<1x1x8x8xbf16, #tpu.memory_space<vmem>>, %arg9: memref<8x1xf32, #tpu.memory_space<vmem>>, %arg10: memref<8x1xf32, #tpu.memory_space<vmem>>, %arg11: memref<8x8xf32, #tpu.memory_space<vmem>>) attributes {dimension_semantics = [#tpu.dimension_semantics<parallel>, #tpu.dimension_semantics<parallel>, #tpu.dimension_semantics<parallel>, #tpu.dimension_semantics<arbitrary>], iteration_bounds = array<i64: 2, 4, 1, 1>, scalar_prefetch = 0 : i64, scratch_operands = 3 : i64, tpu.core_type = #tpu.core_type<tc>, window_params = [{transform_indices = @transform_0, window_bounds = array<i64: 1, 1, 8, 8>}, {transform_indices = @transform_1, window_bounds = array<i64: 1, 1, 4, 8>}, {transform_indices = @transform_2, window_bounds = array<i64: 1, 1, 4, 8>}, {transform_indices = @transform_3, window_bounds = array<i64: 1, 1, 4>}, {transform_indices = @transform_4, window_bounds = array<i64: 1, 1, 8, 8>}]} {
    %c0_i32 = arith.constant 0 : i32
    %0 = arith.cmpi eq, %arg3, %c0_i32 : i32
    %1 = arith.extui %0 : i1 to i32
    %c0_i32_0 = arith.constant 0 : i32
    %2 = arith.cmpi ne, %1, %c0_i32_0 : i32
    scf.if %2 {
      %cst_34 = arith.constant 0xFF800000 : f32
      %44 = vector.broadcast %cst_34 : f32 to vector<8x1xf32>
      %c0_35 = arith.constant 0 : index
      %c0_36 = arith.constant 0 : index
      %45 = vector.load %arg9[%c0_35, %c0_36] : memref<8x1xf32, #tpu.memory_space<vmem>>, vector<8x1xf32>
      tpu.vector_store %arg9[%c0_35, %c0_36], %44 {strides = array<i32>} : memref<8x1xf32, #tpu.memory_space<vmem>>, vector<8x1xf32>,
      %cst_37 = arith.constant 0.000000e+00 : f32
      %46 = vector.broadcast %cst_37 : f32 to vector<8x1xf32>
      %c0_38 = arith.constant 0 : index
      %c0_39 = arith.constant 0 : index
      %47 = vector.load %arg10[%c0_38, %c0_39] : memref<8x1xf32, #tpu.memory_space<vmem>>, vector<8x1xf32>
      tpu.vector_store %arg10[%c0_38, %c0_39], %46 {strides = array<i32>} : memref<8x1xf32, #tpu.memory_space<vmem>>, vector<8x1xf32>,
      %cst_40 = arith.constant 0.000000e+00 : f32
      %48 = vector.broadcast %cst_40 : f32 to vector<8x8xf32>
      %c0_41 = arith.constant 0 : index
      %c0_42 = arith.constant 0 : index
      %49 = vector.load %arg11[%c0_41, %c0_42] : memref<8x8xf32, #tpu.memory_space<vmem>>, vector<8x8xf32>
      tpu.vector_store %arg11[%c0_41, %c0_42], %48 {strides = array<i32>} : memref<8x8xf32, #tpu.memory_space<vmem>>, vector<8x8xf32>,
    } else {
    }
    %c0 = arith.constant 0 : index
    %c0_1 = arith.constant 0 : index
    %c0_2 = arith.constant 0 : index
    %c0_3 = arith.constant 0 : index
    %3 = vector.load %arg4[%c0, %c0_1, %c0_2, %c0_3] : memref<1x1x8x8xbf16, #tpu.memory_space<vmem>>, vector<1x1x8x8xbf16>
    %4 = vector.shape_cast %3 : vector<1x1x8x8xbf16> to vector<8x8xbf16>
    %c0_4 = arith.constant 0 : index
    %c0_5 = arith.constant 0 : index
    %c0_6 = arith.constant 0 : index
    %c0_7 = arith.constant 0 : index
    %5 = vector.load %arg5[%c0_4, %c0_5, %c0_6, %c0_7] : memref<1x1x4x8xbf16, #tpu.memory_space<vmem>>, vector<1x1x4x8xbf16>
    %6 = vector.shape_cast %5 : vector<1x1x4x8xbf16> to vector<4x8xbf16>
    %c0_8 = arith.constant 0 : index
    %c0_9 = arith.constant 0 : index
    %c0_10 = arith.constant 0 : index
    %c0_11 = arith.constant 0 : index
    %7 = vector.load %arg6[%c0_8, %c0_9, %c0_10, %c0_11] : memref<1x1x4x8xbf16, #tpu.memory_space<vmem>>, vector<1x1x4x8xbf16>
    %8 = vector.shape_cast %7 : vector<1x1x4x8xbf16> to vector<4x8xbf16>
    %c0_12 = arith.constant 0 : index
    %c0_13 = arith.constant 0 : index
    %c0_14 = arith.constant 0 : index
    %9 = vector.load %arg7[%c0_12, %c0_13, %c0_14] : memref<1x1x4xf32, #tpu.memory_space<vmem>>, vector<1x1x4xf32>
    %10 = vector.shape_cast %9 : vector<1x1x4xf32> to vector<1x4xf32>
    %cst = arith.constant 0.000000e+00 : f32
    %11 = vector.broadcast %cst : f32 to vector<1x4xf32>
    %12 = arith.cmpf ogt, %10, %11 : vector<1x4xf32>
    %cst_15 = arith.constant dense<0.000000e+00> : vector<8x4xf32>
    %13 = tpu.matmul %4, %6, %cst_15 {dimension_numbers = #tpu.dot_dimension_numbers<[1], [1], [0], [0], [0, 0, 1, 0], [], []>} : vector<8x8xbf16>, vector<4x8xbf16>, vector<8x4xf32> -> vector<8x4xf32>
    %14 = vector.shape_cast %12 : vector<1x4xi1> to vector<1x4xi1>
    %15 = vector.broadcast %14 : vector<1x4xi1> to vector<8x4xi1>
    %cst_16 = arith.constant -1.000000e+09 : f32
    %16 = vector.broadcast %cst_16 : f32 to vector<8x4xf32>
    %17 = arith.select %15, %13, %16 : vector<8x4xi1>, vector<8x4xf32>
    %c0_17 = arith.constant 0 : index
    %c0_18 = arith.constant 0 : index
    %18 = vector.load %arg9[%c0_17, %c0_18] : memref<8x1xf32, #tpu.memory_space<vmem>>, vector<8x1xf32>
    %cst_19 = arith.constant dense<0xFF800000> : vector<8xf32>
    %19 = vector.multi_reduction <maximumf>, %17, %cst_19 [1] : vector<8x4xf32> to vector<8xf32>
    %20 = vector.shape_cast %19 : vector<8xf32> to vector<8x1xf32>
    %21 = arith.maximumf %18, %20 : vector<8x1xf32>
    %22 = arith.subf %18, %21 : vector<8x1xf32>
    %23 = math.exp %22 : vector<8x1xf32>
    %24 = vector.broadcast %21 : vector<8x1xf32> to vector<8x4xf32>
    %25 = arith.subf %17, %24 : vector<8x4xf32>
    %26 = math.exp %25 : vector<8x4xf32>
    %c0_20 = arith.constant 0 : index
    %c0_21 = arith.constant 0 : index
    %27 = vector.load %arg10[%c0_20, %c0_21] : memref<8x1xf32, #tpu.memory_space<vmem>>, vector<8x1xf32>
    %28 = arith.mulf %23, %27 : vector<8x1xf32>
    %cst_22 = arith.constant dense<0.000000e+00> : vector<8xf32>
    %29 = vector.multi_reduction <add>, %26, %cst_22 [1] : vector<8x4xf32> to vector<8xf32>
    %30 = vector.shape_cast %29 : vector<8xf32> to vector<8x1xf32>
    %31 = arith.addf %28, %30 : vector<8x1xf32>
    %c0_23 = arith.constant 0 : index
    %c0_24 = arith.constant 0 : index
    %32 = vector.load %arg10[%c0_23, %c0_24] : memref<8x1xf32, #tpu.memory_space<vmem>>, vector<8x1xf32>
    tpu.vector_store %arg10[%c0_23, %c0_24], %31 {strides = array<i32>} : memref<8x1xf32, #tpu.memory_space<vmem>>, vector<8x1xf32>,
    %c0_25 = arith.constant 0 : index
    %c0_26 = arith.constant 0 : index
    %33 = vector.load %arg11[%c0_25, %c0_26] : memref<8x8xf32, #tpu.memory_space<vmem>>, vector<8x8xf32>
    %34 = vector.broadcast %23 : vector<8x1xf32> to vector<8x8xf32>
    %35 = arith.mulf %34, %33 : vector<8x8xf32>
    %36 = arith.truncf %26 : vector<8x4xf32> to vector<8x4xbf16>
    %cst_27 = arith.constant dense<0.000000e+00> : vector<8x8xf32>
    %37 = tpu.matmul %36, %8, %cst_27 {dimension_numbers = #tpu.dot_dimension_numbers<[1], [0], [0], [1], [0, 0, 1, 1], [], []>} : vector<8x4xbf16>, vector<4x8xbf16>, vector<8x8xf32> -> vector<8x8xf32>
    %38 = arith.addf %35, %37 : vector<8x8xf32>
    %c0_28 = arith.constant 0 : index
    %c0_29 = arith.constant 0 : index
    %39 = vector.load %arg11[%c0_28, %c0_29] : memref<8x8xf32, #tpu.memory_space<vmem>>, vector<8x8xf32>
    tpu.vector_store %arg11[%c0_28, %c0_29], %38 {strides = array<i32>} : memref<8x8xf32, #tpu.memory_space<vmem>>, vector<8x8xf32>,
    %c0_30 = arith.constant 0 : index
    %c0_31 = arith.constant 0 : index
    %40 = vector.load %arg9[%c0_30, %c0_31] : memref<8x1xf32, #tpu.memory_space<vmem>>, vector<8x1xf32>
    tpu.vector_store %arg9[%c0_30, %c0_31], %21 {strides = array<i32>} : memref<8x1xf32, #tpu.memory_space<vmem>>, vector<8x1xf32>,
    %c0_i32_32 = arith.constant 0 : i32
    %41 = arith.cmpi eq, %arg3, %c0_i32_32 : i32
    %42 = arith.extui %41 : i1 to i32
    %c0_i32_33 = arith.constant 0 : i32
    %43 = arith.cmpi ne, %42, %c0_i32_33 : i32
    scf.if %43 {
      %c0_34 = arith.constant 0 : index
      %c0_35 = arith.constant 0 : index
      %44 = vector.load %arg11[%c0_34, %c0_35] : memref<8x8xf32, #tpu.memory_space<vmem>>, vector<8x8xf32>
      %c0_36 = arith.constant 0 : index
      %c0_37 = arith.constant 0 : index
      %45 = vector.load %arg10[%c0_36, %c0_37] : memref<8x1xf32, #tpu.memory_space<vmem>>, vector<8x1xf32>
      %46 = tpu.reciprocal %45 {approx = true} : vector<8x1xf32> -> vector<8x1xf32>
      %47 = vector.broadcast %46 : vector<8x1xf32> to vector<8x8xf32>
      %48 = arith.mulf %44, %47 : vector<8x8xf32>
      %49 = arith.truncf %48 : vector<8x8xf32> to vector<8x8xbf16>
      %c0_38 = arith.constant 0 : index
      %c0_39 = arith.constant 0 : index
      %c0_40 = arith.constant 0 : index
      %c0_41 = arith.constant 0 : index
      %50 = vector.load %arg8[%c0_38, %c0_39, %c0_40, %c0_41] : memref<1x1x8x8xbf16, #tpu.memory_space<vmem>>, vector<1x1x8x8xbf16>
      %51 = vector.shape_cast %50 : vector<1x1x8x8xbf16> to vector<8x8xbf16>
      %52 = vector.shape_cast %49 : vector<8x8xbf16> to vector<1x1x8x8xbf16>
      tpu.vector_store %arg8[%c0_38, %c0_39, %c0_40, %c0_41], %52 {strides = array<i32>} : memref<1x1x8x8xbf16, #tpu.memory_space<vmem>>, vector<1x1x8x8xbf16>,
    } else {
    }
    return
  }
  func.func @transform_0(%arg0: i32, %arg1: i32, %arg2: i32, %arg3: i32) -> (i32, i32, i32, i32) {
    %c0_i32 = arith.constant 0 : i32
    %c0_i32_0 = arith.constant 0 : i32
    return %arg0, %arg1, %arg2, %c0_i32 : i32, i32, i32, i32
  }
  func.func @transform_1(%arg0: i32, %arg1: i32, %arg2: i32, %arg3: i32) -> (i32, i32, i32, i32) {
    %c0_i32 = arith.constant 0 : i32
    %c0_i32_0 = arith.constant 0 : i32
    return %arg0, %arg1, %arg3, %c0_i32 : i32, i32, i32, i32
  }
  func.func @transform_2(%arg0: i32, %arg1: i32, %arg2: i32, %arg3: i32) -> (i32, i32, i32, i32) {
    %c0_i32 = arith.constant 0 : i32
    %c0_i32_0 = arith.constant 0 : i32
    return %arg0, %arg1, %arg3, %c0_i32 : i32, i32, i32, i32
  }
  func.func @transform_3(%arg0: i32, %arg1: i32, %arg2: i32, %arg3: i32) -> (i32, i32, i32) {
    %c0_i32 = arith.constant 0 : i32
    %c0_i32_0 = arith.constant 0 : i32
    return %arg0, %c0_i32, %arg3 : i32, i32, i32
  }
  func.func @transform_4(%arg0: i32, %arg1: i32, %arg2: i32, %arg3: i32) -> (i32, i32, i32, i32) {
    %c0_i32 = arith.constant 0 : i32
    %c0_i32_0 = arith.constant 0 : i32
    return %arg0, %arg1, %arg2, %c0_i32 : i32, i32, i32, i32
  }
}

module attributes {stable_mosaic.version = 11 : i64} {
  func.func @_gcn_conv_kernel(%arg0: i32, %arg1: memref<8x8xbf16, #tpu.memory_space<vmem>>, %arg2: memref<8x128xbf16, #tpu.memory_space<vmem>>, %arg3: memref<128x16xbf16, #tpu.memory_space<vmem>>, %arg4: memref<1x16xf32, #tpu.memory_space<vmem>>, %arg5: memref<8x16xbf16, #tpu.memory_space<vmem>>) attributes {dimension_semantics = [#tpu.dimension_semantics<parallel>], iteration_bounds = array<i64: 1>, scalar_prefetch = 0 : i64, scratch_operands = 0 : i64, tpu.core_type = #tpu.core_type<tc>, window_params = [{transform_indices = @transform_0, window_bounds = array<i64: 8, 8>}, {pipeline_mode = #tpu.pipeline_mode<synchronous>, transform_indices = @transform_1, window_bounds = array<i64: 8, 128>}, {pipeline_mode = #tpu.pipeline_mode<synchronous>, transform_indices = @transform_2, window_bounds = array<i64: 128, 16>}, {pipeline_mode = #tpu.pipeline_mode<synchronous>, transform_indices = @transform_3, window_bounds = array<i64: 1, 16>}, {transform_indices = @transform_4, window_bounds = array<i64: 8, 16>}]} {
    %c0 = arith.constant 0 : index
    %c0_0 = arith.constant 0 : index
    %0 = vector.load %arg1[%c0, %c0_0] : memref<8x8xbf16, #tpu.memory_space<vmem>>, vector<8x8xbf16>
    %c0_1 = arith.constant 0 : index
    %c0_2 = arith.constant 0 : index
    %1 = vector.load %arg2[%c0_1, %c0_2] : memref<8x128xbf16, #tpu.memory_space<vmem>>, vector<8x128xbf16>
    %cst = arith.constant dense<0.000000e+00> : vector<8x128xf32>
    %2 = tpu.matmul %0, %1, %cst {dimension_numbers = #tpu.dot_dimension_numbers<[1], [0], [0], [1], [0, 0, 1, 1], [], []>} : vector<8x8xbf16>, vector<8x128xbf16>, vector<8x128xf32> -> vector<8x128xf32>
    %3 = arith.truncf %2 : vector<8x128xf32> to vector<8x128xbf16>
    %c0_3 = arith.constant 0 : index
    %c0_4 = arith.constant 0 : index
    %4 = vector.load %arg3[%c0_3, %c0_4] : memref<128x16xbf16, #tpu.memory_space<vmem>>, vector<128x16xbf16>
    %cst_5 = arith.constant dense<0.000000e+00> : vector<8x16xf32>
    %5 = tpu.matmul %3, %4, %cst_5 {dimension_numbers = #tpu.dot_dimension_numbers<[1], [0], [0], [1], [0, 0, 1, 1], [], []>} : vector<8x128xbf16>, vector<128x16xbf16>, vector<8x16xf32> -> vector<8x16xf32>
    %c0_6 = arith.constant 0 : index
    %c0_7 = arith.constant 0 : index
    %6 = vector.load %arg4[%c0_6, %c0_7] : memref<1x16xf32, #tpu.memory_space<vmem>>, vector<1x16xf32>
    %7 = vector.broadcast %6 : vector<1x16xf32> to vector<8x16xf32>
    %8 = arith.addf %5, %7 : vector<8x16xf32>
    %9 = arith.truncf %8 : vector<8x16xf32> to vector<8x16xbf16>
    %c0_8 = arith.constant 0 : index
    %c0_9 = arith.constant 0 : index
    %10 = vector.load %arg5[%c0_8, %c0_9] : memref<8x16xbf16, #tpu.memory_space<vmem>>, vector<8x16xbf16>
    tpu.vector_store %arg5[%c0_8, %c0_9], %9 {strides = array<i32>} : memref<8x16xbf16, #tpu.memory_space<vmem>>, vector<8x16xbf16>,
    return
  }
  func.func @transform_0(%arg0: i32) -> (i32, i32) {
    %c0_i32 = arith.constant 0 : i32
    %c0_i32_0 = arith.constant 0 : i32
    return %arg0, %c0_i32 : i32, i32
  }
  func.func @transform_1(%arg0: i32) -> (i32, i32) {
    %c0_i32 = arith.constant 0 : i32
    %c0_i32_0 = arith.constant 0 : i32
    %c0_i32_1 = arith.constant 0 : i32
    return %c0_i32, %c0_i32_0 : i32, i32
  }
  func.func @transform_2(%arg0: i32) -> (i32, i32) {
    %c0_i32 = arith.constant 0 : i32
    %c0_i32_0 = arith.constant 0 : i32
    %c0_i32_1 = arith.constant 0 : i32
    return %c0_i32, %c0_i32_0 : i32, i32
  }
  func.func @transform_3(%arg0: i32) -> (i32, i32) {
    %c0_i32 = arith.constant 0 : i32
    %c0_i32_0 = arith.constant 0 : i32
    %c0_i32_1 = arith.constant 0 : i32
    return %c0_i32, %c0_i32_0 : i32, i32
  }
  func.func @transform_4(%arg0: i32) -> (i32, i32) {
    %c0_i32 = arith.constant 0 : i32
    %c0_i32_0 = arith.constant 0 : i32
    return %arg0, %c0_i32 : i32, i32
  }
}

module attributes {stable_mosaic.version = 11 : i64} {
  func.func @_gcn_conv_kernel(%arg0: i32, %arg1: memref<8x8xbf16, #tpu.memory_space<vmem>>, %arg2: memref<8x16xbf16, #tpu.memory_space<vmem>>, %arg3: memref<16x128xbf16, #tpu.memory_space<vmem>>, %arg4: memref<1x128xf32, #tpu.memory_space<vmem>>, %arg5: memref<8x128xbf16, #tpu.memory_space<vmem>>) attributes {dimension_semantics = [#tpu.dimension_semantics<parallel>], iteration_bounds = array<i64: 1>, scalar_prefetch = 0 : i64, scratch_operands = 0 : i64, tpu.core_type = #tpu.core_type<tc>, window_params = [{transform_indices = @transform_0, window_bounds = array<i64: 8, 8>}, {pipeline_mode = #tpu.pipeline_mode<synchronous>, transform_indices = @transform_1, window_bounds = array<i64: 8, 16>}, {pipeline_mode = #tpu.pipeline_mode<synchronous>, transform_indices = @transform_2, window_bounds = array<i64: 16, 128>}, {pipeline_mode = #tpu.pipeline_mode<synchronous>, transform_indices = @transform_3, window_bounds = array<i64: 1, 128>}, {transform_indices = @transform_4, window_bounds = array<i64: 8, 128>}]} {
    %c0 = arith.constant 0 : index
    %c0_0 = arith.constant 0 : index
    %0 = vector.load %arg1[%c0, %c0_0] : memref<8x8xbf16, #tpu.memory_space<vmem>>, vector<8x8xbf16>
    %c0_1 = arith.constant 0 : index
    %c0_2 = arith.constant 0 : index
    %1 = vector.load %arg2[%c0_1, %c0_2] : memref<8x16xbf16, #tpu.memory_space<vmem>>, vector<8x16xbf16>
    %cst = arith.constant dense<0.000000e+00> : vector<8x16xf32>
    %2 = tpu.matmul %0, %1, %cst {dimension_numbers = #tpu.dot_dimension_numbers<[1], [0], [0], [1], [0, 0, 1, 1], [], []>} : vector<8x8xbf16>, vector<8x16xbf16>, vector<8x16xf32> -> vector<8x16xf32>
    %3 = arith.truncf %2 : vector<8x16xf32> to vector<8x16xbf16>
    %c0_3 = arith.constant 0 : index
    %c0_4 = arith.constant 0 : index
    %4 = vector.load %arg3[%c0_3, %c0_4] : memref<16x128xbf16, #tpu.memory_space<vmem>>, vector<16x128xbf16>
    %cst_5 = arith.constant dense<0.000000e+00> : vector<8x128xf32>
    %5 = tpu.matmul %3, %4, %cst_5 {dimension_numbers = #tpu.dot_dimension_numbers<[1], [0], [0], [1], [0, 0, 1, 1], [], []>} : vector<8x16xbf16>, vector<16x128xbf16>, vector<8x128xf32> -> vector<8x128xf32>
    %c0_6 = arith.constant 0 : index
    %c0_7 = arith.constant 0 : index
    %6 = vector.load %arg4[%c0_6, %c0_7] : memref<1x128xf32, #tpu.memory_space<vmem>>, vector<1x128xf32>
    %7 = vector.broadcast %6 : vector<1x128xf32> to vector<8x128xf32>
    %8 = arith.addf %5, %7 : vector<8x128xf32>
    %cst_8 = arith.constant 0.000000e+00 : f32
    %9 = vector.broadcast %cst_8 : f32 to vector<8x128xf32>
    %10 = arith.maximumf %8, %9 : vector<8x128xf32>
    %11 = arith.truncf %10 : vector<8x128xf32> to vector<8x128xbf16>
    %c0_9 = arith.constant 0 : index
    %c0_10 = arith.constant 0 : index
    %12 = vector.load %arg5[%c0_9, %c0_10] : memref<8x128xbf16, #tpu.memory_space<vmem>>, vector<8x128xbf16>
    tpu.vector_store %arg5[%c0_9, %c0_10], %11 {strides = array<i32>} : memref<8x128xbf16, #tpu.memory_space<vmem>>, vector<8x128xbf16>,
    return
  }
  func.func @transform_0(%arg0: i32) -> (i32, i32) {
    %c0_i32 = arith.constant 0 : i32
    %c0_i32_0 = arith.constant 0 : i32
    return %arg0, %c0_i32 : i32, i32
  }
  func.func @transform_1(%arg0: i32) -> (i32, i32) {
    %c0_i32 = arith.constant 0 : i32
    %c0_i32_0 = arith.constant 0 : i32
    %c0_i32_1 = arith.constant 0 : i32
    return %c0_i32, %c0_i32_0 : i32, i32
  }
  func.func @transform_2(%arg0: i32) -> (i32, i32) {
    %c0_i32 = arith.constant 0 : i32
    %c0_i32_0 = arith.constant 0 : i32
    %c0_i32_1 = arith.constant 0 : i32
    return %c0_i32, %c0_i32_0 : i32, i32
  }
  func.func @transform_3(%arg0: i32) -> (i32, i32) {
    %c0_i32 = arith.constant 0 : i32
    %c0_i32_0 = arith.constant 0 : i32
    %c0_i32_1 = arith.constant 0 : i32
    return %c0_i32, %c0_i32_0 : i32, i32
  }
  func.func @transform_4(%arg0: i32) -> (i32, i32) {
    %c0_i32 = arith.constant 0 : i32
    %c0_i32_0 = arith.constant 0 : i32
    return %arg0, %c0_i32 : i32, i32
  }
}

module attributes {stable_mosaic.version = 11 : i64} {
  func.func @_matmul_kernel(%arg0: i32, %arg1: i32, %arg2: i32, %arg3: memref<8x16xbf16, #tpu.memory_space<vmem>>, %arg4: memref<16x128xbf16, #tpu.memory_space<vmem>>, %arg5: memref<1x128xf32, #tpu.memory_space<vmem>>, %arg6: memref<8x128xbf16, #tpu.memory_space<vmem>>, %arg7: memref<8x128xf32, #tpu.memory_space<vmem>>) attributes {dimension_semantics = [#tpu.dimension_semantics<parallel>, #tpu.dimension_semantics<parallel>, #tpu.dimension_semantics<arbitrary>], iteration_bounds = array<i64: 1, 1, 1>, scalar_prefetch = 0 : i64, scratch_operands = 1 : i64, tpu.core_type = #tpu.core_type<tc>, window_params = [{transform_indices = @transform_0, window_bounds = array<i64: 8, 16>}, {transform_indices = @transform_1, window_bounds = array<i64: 16, 128>}, {transform_indices = @transform_2, window_bounds = array<i64: 1, 128>}, {transform_indices = @transform_3, window_bounds = array<i64: 8, 128>}]} {
    %c0_i32 = arith.constant 0 : i32
    %0 = arith.cmpi eq, %arg2, %c0_i32 : i32
    %1 = arith.extui %0 : i1 to i32
    %c0_i32_0 = arith.constant 0 : i32
    %2 = arith.cmpi ne, %1, %c0_i32_0 : i32
    scf.if %2 {
      %cst_10 = arith.constant 0.000000e+00 : f32
      %12 = vector.broadcast %cst_10 : f32 to vector<8x128xf32>
      %c0_11 = arith.constant 0 : index
      %c0_12 = arith.constant 0 : index
      %13 = vector.load %arg7[%c0_11, %c0_12] : memref<8x128xf32, #tpu.memory_space<vmem>>, vector<8x128xf32>
      tpu.vector_store %arg7[%c0_11, %c0_12], %12 {strides = array<i32>} : memref<8x128xf32, #tpu.memory_space<vmem>>, vector<8x128xf32>,
    } else {
    }
    %c0 = arith.constant 0 : index
    %c0_1 = arith.constant 0 : index
    %3 = vector.load %arg7[%c0, %c0_1] : memref<8x128xf32, #tpu.memory_space<vmem>>, vector<8x128xf32>
    %c0_2 = arith.constant 0 : index
    %c0_3 = arith.constant 0 : index
    %4 = vector.load %arg3[%c0_2, %c0_3] : memref<8x16xbf16, #tpu.memory_space<vmem>>, vector<8x16xbf16>
    %c0_4 = arith.constant 0 : index
    %c0_5 = arith.constant 0 : index
    %5 = vector.load %arg4[%c0_4, %c0_5] : memref<16x128xbf16, #tpu.memory_space<vmem>>, vector<16x128xbf16>
    %cst = arith.constant dense<0.000000e+00> : vector<8x128xf32>
    %6 = tpu.matmul %4, %5, %cst {dimension_numbers = #tpu.dot_dimension_numbers<[1], [0], [0], [1], [0, 0, 1, 1], [], []>} : vector<8x16xbf16>, vector<16x128xbf16>, vector<8x128xf32> -> vector<8x128xf32>
    %7 = arith.addf %3, %6 : vector<8x128xf32>
    %c0_6 = arith.constant 0 : index
    %c0_7 = arith.constant 0 : index
    %8 = vector.load %arg7[%c0_6, %c0_7] : memref<8x128xf32, #tpu.memory_space<vmem>>, vector<8x128xf32>
    tpu.vector_store %arg7[%c0_6, %c0_7], %7 {strides = array<i32>} : memref<8x128xf32, #tpu.memory_space<vmem>>, vector<8x128xf32>,
    %c0_i32_8 = arith.constant 0 : i32
    %9 = arith.cmpi eq, %arg2, %c0_i32_8 : i32
    %10 = arith.extui %9 : i1 to i32
    %c0_i32_9 = arith.constant 0 : i32
    %11 = arith.cmpi ne, %10, %c0_i32_9 : i32
    scf.if %11 {
      %c0_10 = arith.constant 0 : index
      %c0_11 = arith.constant 0 : index
      %12 = vector.load %arg7[%c0_10, %c0_11] : memref<8x128xf32, #tpu.memory_space<vmem>>, vector<8x128xf32>
      %c0_12 = arith.constant 0 : index
      %c0_13 = arith.constant 0 : index
      %13 = vector.load %arg5[%c0_12, %c0_13] : memref<1x128xf32, #tpu.memory_space<vmem>>, vector<1x128xf32>
      %14 = vector.broadcast %13 : vector<1x128xf32> to vector<8x128xf32>
      %15 = arith.addf %12, %14 : vector<8x128xf32>
      %16 = arith.truncf %15 : vector<8x128xf32> to vector<8x128xbf16>
      %c0_14 = arith.constant 0 : index
      %c0_15 = arith.constant 0 : index
      %17 = vector.load %arg6[%c0_14, %c0_15] : memref<8x128xbf16, #tpu.memory_space<vmem>>, vector<8x128xbf16>
      tpu.vector_store %arg6[%c0_14, %c0_15], %16 {strides = array<i32>} : memref<8x128xbf16, #tpu.memory_space<vmem>>, vector<8x128xbf16>,
    } else {
    }
    return
  }
  func.func @transform_0(%arg0: i32, %arg1: i32, %arg2: i32) -> (i32, i32) {
    %c0_i32 = arith.constant 0 : i32
    return %arg0, %arg2 : i32, i32
  }
  func.func @transform_1(%arg0: i32, %arg1: i32, %arg2: i32) -> (i32, i32) {
    %c0_i32 = arith.constant 0 : i32
    return %arg2, %arg1 : i32, i32
  }
  func.func @transform_2(%arg0: i32, %arg1: i32, %arg2: i32) -> (i32, i32) {
    %c0_i32 = arith.constant 0 : i32
    %c0_i32_0 = arith.constant 0 : i32
    return %c0_i32, %arg1 : i32, i32
  }
  func.func @transform_3(%arg0: i32, %arg1: i32, %arg2: i32) -> (i32, i32) {
    %c0_i32 = arith.constant 0 : i32
    return %arg0, %arg1 : i32, i32
  }
}

</mosaic_0001>

<bundles_post_ra>
// kernel: _lambda_.63
= control target key start
LH: loop header
LB: loop body
LE: loop exit
PB: predicated region body
PF: predicated region fallthrough
CT: control target
= control target key end

     0   :  { %vm29_vm0 = vcmask 261120   ;;  %v186_v5 = vmov 32.0   ;;  %vm95_vm6 = vcmask 257024   ;;  %s243_s0 = inlined_call_operand.vmem [shape: bf16[16,32], index: 0, kind: input, shape index: {}]   ;;  %s244_s1 = inlined_call_operand.vmem [shape: f32[1,32], index: 1, kind: input, shape index: {}]   ;;  %s245_s2 = inlined_call_operand.vmem [shape: f32[1,32], index: 2, kind: input, shape index: {}]   ;;  %s246_s4 = inlined_call_operand.vmem [shape: f32[1,128], index: 4, kind: input, shape index: {}]   ;;  %s247_s3 = inlined_call_operand.vmem [shape: bf16[32,128], index: 3, kind: input, shape index: {}]   ;;  %s248_s5 = inlined_call_operand.vmem [shape: bf16[16,128], index: 5, kind: output, shape index: {}]  }
   0x1   :  { %v168_v0 = vld [vmem:[%s243_s0] sm:$0xff]   ;;  %180 = vrcp.f32 %v186_v5  ;;  %v166_v25 = vld [vmem:[%s247_s3 + $0x8] sm:$0xff] }
   0x2   :  { %v169_v1 = vunpack.c.l.bf16 %v168_v0  ;;  %v170_v3 = vunpack.c.h.bf16 %v168_v0  ;;  %135 = vmatpush.bf16.msra.mxu0 %v166_v25  ;;  %v165_v28 = vld [vmem:[%s247_s3] sm:$0xff] }
   0x3   :  { %v177_v38 = vld [vmem:[%s244_s1] ss:$0 sm:$0xff] }
   0x4   :  { %v30_v2 = vsel %vm29_vm0, %v169_v1, 0.0  ;;  %v33_v4 = vsel %vm29_vm0, %v170_v3, 0.0  ;;  %v178_v41 = vld [vmem:[%s245_s2] ss:$0 sm:$0xff] }
   0x5   :  { %31 = vadd.xlane.f32.xlu0 %v30_v2  ;;  %v179_v56 = vld [vmem:[%s246_s4] ss:$0 sm:$0xff] }
   0x6   :  { %136 = vmatpush.bf16.msra.mxu0 %v165_v28 }
   0x7   :  { %v181_v6 = vpop.eup %180 }
   0x8   :  { %v37_v7 = vmul.f32 32.0, %v181_v6  ;;  %vm41_vm1 = vweird.f32 %v181_v6 }
   0xa   :  { %v38_v8 = vsub.f32 1.0, %v37_v7 }
   0xc   :  { %v39_v9 = vmul.f32 %v181_v6, %v38_v8 }
   0xd   :  { %34 = vadd.xlane.f32.xlu0 %v33_v4 }
   0xe   :  { %v40_v10 = vadd.f32 %v181_v6, %v39_v9 }
  0x10   :  { %v42_v11 = vsel %vm41_vm1, %v181_v6, %v40_v10 }
  0x78   :  { %v32_v12 = vpop.xlane.xlu0 %31 }
  0x79   :  { %v43_v13 = vmul.f32 %v42_v11, %v32_v12 }
  0x7b   :  { %v45_v14 = vsub.f32 %v169_v1, %v43_v13 }
  0x7d   :  { %v47_v15 = vmul.f32 %v45_v14, %v45_v14 }
  0x7f   :  { %v49_v16 = vsel %vm29_vm0, %v47_v15, 0.0 }
  0x80   :  { %50 = vadd.xlane.f32.xlu1 %v49_v16  ;;  %v35_v17 = vpop.xlane.xlu0 %34 }
  0x81   :  { %v44_v18 = vmul.f32 %v42_v11, %v35_v17 }
  0x83   :  { %v46_v19 = vsub.f32 %v170_v3, %v44_v18 }
  0x85   :  { %v48_v20 = vmul.f32 %v46_v19, %v46_v19 }
  0x87   :  { %v52_v21 = vsel %vm29_vm0, %v48_v20, 0.0 }
  0x88   :  { %53 = vadd.xlane.f32.xlu1 %v52_v21 }
  0xf3   :  { %v51_v22 = vpop.xlane.xlu1 %50 }
  0xf4   :  { %v55_v23 = vmul.f32 %v51_v22, %v42_v11 }
  0xf6   :  { %v57_v24 = vadd.f32 1e-05, %v55_v23 }
  0xf8   :  { %182 = vrsqrt.f32 %v57_v24  ;;  %vm65_vm3 = vweird.f32 %v57_v24 }
  0xfb   :  { %v54_v26 = vpop.xlane.xlu1 %53 }
  0xfc   :  { %v56_v27 = vmul.f32 %v54_v26, %v42_v11 }
  0xfe   :  { %v183_v29 = vpop.eup %182  ;;  %v58_v30 = vadd.f32 1e-05, %v56_v27 }
  0xff   :  { %v60_v31 = vmul.f32 %v183_v29, %v57_v24  ;;  %vm66_vm2 = vweird.f32 %v183_v29 }
 0x100   :  { %184 = vrsqrt.f32 %v58_v30  ;;  %vm67_vm4 = vmor %vm65_vm3, %vm66_vm2  ;;  %vm75_vm7 = vweird.f32 %v58_v30 }
 0x101   :  { %v61_v32 = vmul.f32 %v183_v29, %v60_v31 }
 0x103   :  { %v62_v33 = vmul.f32 0.5, %v61_v32 }
 0x105   :  { %v63_v34 = vsub.f32 1.5, %v62_v33 }
 0x106   :  { %v185_v35 = vpop.eup %184 }
 0x107   :  { %v64_v36 = vmul.f32 %v183_v29, %v63_v34  ;;  %v70_v37 = vmul.f32 %v185_v35, %v58_v30  ;;  %vm76_vm5 = vweird.f32 %v185_v35 }
 0x108   :  { %vm77_vm8 = vmor %vm75_vm7, %vm76_vm5 }
 0x109   :  { %v68_v39 = vsel %vm67_vm4, %v183_v29, %v64_v36  ;;  %v71_v40 = vmul.f32 %v185_v35, %v70_v37 }
 0x10a   :  { %v79_v42 = vmul.f32 %v68_v39, %v45_v14 }
 0x10b   :  { %v72_v43 = vmul.f32 0.5, %v71_v40 }
 0x10c   :  { %v85_v44 = vmul.f32 %v177_v38, %v79_v42 }
 0x10d   :  { %v73_v45 = vsub.f32 1.5, %v72_v43 }
 0x10e   :  { %v91_v46 = vadd.f32 %v178_v41, %v85_v44 }
 0x10f   :  { %v74_v47 = vmul.f32 %v185_v35, %v73_v45 }
 0x110   :  { %v93_v48 = vpack.c.bf16 %v91_v46, %v91_v46 }
 0x111   :  { %v78_v49 = vsel %vm77_vm8, %v185_v35, %v74_v47 }
 0x112   :  { %96 = vst.msk [vmem:[#allocation2] sm:$0xf] %vm95_vm6, %v93_v48  ;;  %v80_v50 = vmul.f32 %v78_v49, %v46_v19 }
 0x114   :  { %v86_v51 = vmul.f32 %v177_v38, %v80_v50 }
 0x116   :  { %v92_v52 = vadd.f32 %v178_v41, %v86_v51 }
 0x118   :  { %v94_v53 = vpack.c.bf16 %v92_v52, %v92_v52 }
 0x11a   :  { %97 = vst.msk [vmem:[#allocation2 + $0x4] sm:$0xf] %vm95_vm6, %v94_v53 }
 0x121   :  { %v164_v54 = vld [vmem:[#allocation2] sm:$0xff] }
 0x122   :  { %163 = vmatmul.msk.bf16.vlgmr.msra.gmra.mxu0 %vm29_vm0, %v164_v54 }
 0x19f   :  { %v138_v55 = vpop.f32.mrf.mxu0 }
 0x1a0   :  { %v139_v58 = vadd.f32 %v179_v56, %v138_v55 }
 0x1a7   :  { %v140_v57 = vpop.f32.mrf.mxu0 }
 0x1a8   :  { %v141_v59 = vadd.f32 %v179_v56, %v140_v57 }
 0x1aa   :  { %v174_v60 = vpack.c.bf16 %v141_v59, %v139_v58 }
 0x1ac   :  { %175 = vst [vmem:[%s248_s5] sm:$0xff] %v174_v60  }

// kernel: _lambda_.64
= control target key start
LH: loop header
LB: loop body
LE: loop exit
PB: predicated region body
PF: predicated region fallthrough
CT: control target
= control target key end

     0   :  { %s788_s15 = smov 0   ;;  %s790_s16 = smov 0   ;;  %s865_s0 = inlined_call_operand.vmem [shape: bf16[2,4,8,8], index: 0, kind: input, shape index: {}]   ;;  %s866_s1 = inlined_call_operand.vmem [shape: bf16[2,4,8,8], index: 1, kind: input, shape index: {}]   ;;  %s867_s2 = inlined_call_operand.vmem [shape: bf16[2,4,8,8], index: 2, kind: input, shape index: {}]   ;;  %s868_s3 = inlined_call_operand.vmem [shape: f32[2,1,8], index: 3, kind: input, shape index: {}]   ;;  %s869_s4 = inlined_call_operand.vmem [shape: bf16[2,4,8,8], index: 4, kind: output, shape index: {}]  }
   0x1   :  { %s792_s17 = smov 0   ;;  %s794_s18 = smov 0  }
   0x2   :  { %s796_s19 = smov 0  }
   0x3 LB: > { %s36_s20 = sadd.s32 1, %s750_s17  ;;  %s40_s21 = sadd.s32 1, %s754_s18  ;;  %s758_s19 = sphi %s796_s19, %s14_s19   ;;  %s754_s18 = sphi %s794_s18, %s873_s18   ;;  %s750_s17 = sphi %s792_s17, %s872_s17   ;;  %s746_s16 = sphi %s790_s16, %s871_s16   ;;  %s742_s15 = sphi %s788_s15, %s870_s15  }
   0x4   : > { %p38_p0 = scmp.ge.s32.totalorder %s36_s20, 4  ;;  %p655_p1 = scmp.ge.s32.totalorder %s758_s19, 1 }
   0x5   : > { %p255_p2 = scmp.lt.s32.totalorder %s758_s19, 9 }
   0x6   : > { %s875_s20 = smov (%p38_p0, %s36_s20), 0  ;;  %s877_s21 = smov (!%p38_p0, %s40_s21), %s754_s18 }
   0x7   : > { %p256_p3 = pnand %p655_p1, %p255_p2  ;;  %p42_p4 = scmp.ge.s32.totalorder %s877_s21, 2 }
   0x8   : > { %p321_p5 = scmp.lt.s32.totalorder (!%p256_p3), %s746_s16, 1  ;;  %p323_p6 = scmp.lt.s32.totalorder (!%p256_p3), %s742_s15, 3 }
   0x9   : > { %s879_s21 = smov (%p42_p4, %s877_s21), 0  ;;  %259 = sbr.rel (%p256_p3) target bundleno = 630 (0x276), region = 36 }
   0xe   : > { %s881_s16 = smov (!%p321_p5, %s746_s16), 1  ;;  %s883_s15 = smov (!%p323_p6, %s742_s15), 3  ;;  %vm379_vm0 = vcmask 64512   ;;  %v760_v3 = vmov 0   ;;  %vm376_vm1 = vcmask 7168   ;;  %v761_v4 = vmov -inf  }
   0xf   : > { %s656_s22 = sshll.u32 %s881_s16, 2  ;;  %711 = vset.pattern.permute.xlu0 %v760_v3  ;;  %712 = vset.pattern.permute.xlu1 %v760_v3  ;;  %377 = vst.msk [vmem:[#allocation2] sm:$0xff] %vm376_vm1, %v761_v4  ;;  %s359_s7 = scalar_lea.vmem %s868_s3, %s881_s16  ;;  %v406_v6 = vlaneseq  ;;  %v762_v15 = vmov 0.0   ;;  %vm457_vm6 = vcmask 1043456   ;;  %vm490_vm7 = vcmask 60416  }
  0x10   : > { %s329_s23 = sadd.s32 %s656_s22, %s883_s15  ;;  %713 = vset.pattern.permute.xlu2 %v760_v3  ;;  %v384_v5 = vld [vmem:[%s359_s7] sm:$0x1]  ;;  %378 = vst.msk [vmem:[#allocation3] sm:$0xff] %vm376_vm1, %v762_v15 }
  0x11   : > { %s818_s24 = sshll.u32 %s329_s23, 2  ;;  %vm385_vm2 = vcmp.gt.f32.partialorder %v384_v5, 0.0  ;;  %v407_v8 = vshrl.u32 %v406_v6, 7  ;;  %v412_v9 = vand.u32 127, %v406_v6  ;;  %380 = vst.msk [vmem:[#allocation4] sm:$0xff] %vm379_vm0, %v762_v15 }
  0x12   : > { %s342_s27 = scalar_lea.vmem %s866_s1, %s818_s24  ;;  %s331_s30 = scalar_lea.vmem %s865_s0, %s818_s24  ;;  %v417_v7 = vsel %vm385_vm2, 1, %v760_v3 }
  0x13   : > { %v382_v0 = vld [vmem:[%s342_s27] sm:$0xf]  ;;  %v418_v10 = vperm.slane %v417_v7, 0  ;;  %vm416_vm3 = vcmp.ge.s32.totalorder %v407_v8, %v412_v9  ;;  %s353_s10 = scalar_lea.vmem %s867_s2, %s818_s24  ;;  %s370_s13 = scalar_lea.vmem %s869_s4, %s818_s24 }
  0x14   : > { %v391_v1 = vsel %vm379_vm0, %v382_v0, 0  ;;  %v381_v2 = vld [vmem:[%s331_s30] sm:$0xf] }
  0x15   : > { %400 = vmatpush.bf16.xpose.msra.mxu0 %v391_v1  ;;  %vm419_vm4 = vcmp.eq.s32.totalorder %v418_v10, 1  ;;  %v383_v20 = vld [vmem:[%s353_s10] sm:$0xf] }
  0x16   : > { %vm420_vm5 = vmand %vm416_vm3, %vm419_vm4  ;;  %v422_v16 = vld [vmem:[#allocation2] sm:$0xff]  ;;  %v459_v21 = vsel %vm457_vm6, %v383_v20, 0 }
  0x17   : > { %468 = vmatpush.bf16.msra.mxu1 %v459_v21  ;;  %v438_v30 = vld [vmem:[#allocation3] sm:$0xff] }
  0x18   : > { %v446_v38 = vld [vmem:[#allocation4] sm:$0xff] }
  0x1c   : > { %664 = vmatmul.msk.bf16.vlgmr.msra.gmra.mxu0 %vm379_vm0, %v381_v2 }
  0x99   : > { %v402_v11 = vpop.f32.mrf.mxu0 }
  0x9a   : > { %v421_v12 = vsel %vm420_vm5, %v402_v11, -1e+09 }
  0x9b   : > { %v423_v13 = vsel %vm379_vm0, %v421_v12, -inf }
  0x9c   : > { %424 = vmax.xlane.f32.xlu0 %v423_v13 }
  0xa1   : > { %v404_v14 = vpop.f32.mrf.mxu0 }
 0x10f   : > { %v425_v17 = vpop.xlane.xlu0 %424 }
 0x110   : > { %v426_v18 = vmax.f32 %v422_v16, %v425_v17 }
 0x112   : > { %v427_v19 = vsub.f32 %v422_v16, %v426_v18  ;;  %476 = vst.msk [vmem:[#allocation2] sm:$0xff] %vm376_vm1, %v426_v18  ;;  %432 = vperm.xlu0 %711, %v426_v18  }
 0x114   : > { %v428_v28 = vmul.f32 1.442695, %v427_v19 }
 0x184   : > { %v433_v22 = vpop.permute.xlu0 %432 }
 0x185   : > { %v435_v23 = vsub.f32 %v421_v12, %v433_v22 }
 0x187   : > { %v436_v24 = vmul.f32 1.442695, %v435_v23 }
 0x189   : > { %714 = vpow2.f32 %v436_v24 }
 0x18a   : > { %716 = vpow2.f32 %v428_v28 }
 0x18f   : > { %v715_v25 = vpop.eup %714 }
 0x190   : > { %v440_v26 = vsel %vm379_vm0, %v715_v25, 0.0  ;;  %v453_v27 = vpack.c.bf16 %v715_v25, %v715_v25  ;;  %v717_v29 = vpop.eup %716 }
 0x191   : > { %441 = vadd.xlane.f32.xlu1 %v440_v26  ;;  %v439_v31 = vmul.f32 %v717_v29, %v438_v30 }
 0x192   : > { %665 = vmatmul.msk.bf16.vlgmr.msra.gmra.mxu1 %vm379_vm0, %v453_v27 }
 0x1aa   : > { %449 = vperm.xlu1 %712, %v717_v29  }
 0x204   : > { %v442_v32 = vpop.xlane.xlu1 %441 }
 0x205   : > { %v443_v33 = vadd.f32 %v442_v32, %v439_v31 }
 0x207   : > { %445 = vst.msk [vmem:[#allocation3] sm:$0xff] %vm376_vm1, %v443_v33 }
 0x20e   : > { %v481_v34 = vld [vmem:[#allocation3] sm:$0xff] }
 0x20f   : > { %v470_v35 = vpop.f32.mrf.mxu1  ;;  %718 = vrcp.f32 %v481_v34 }
 0x215   : > { %v719_v36 = vpop.eup %718 }
 0x216   : > { %485 = vperm.xlu2 %713, %v719_v36  }
 0x217   : > { %v472_v37 = vpop.f32.mrf.mxu1 }
 0x21c   : > { %v450_v39 = vpop.permute.xlu1 %449 }
 0x21d   : > { %v452_v40 = vmul.f32 %v450_v39, %v446_v38 }
 0x21f   : > { %v474_v41 = vadd.f32 %v470_v35, %v452_v40 }
 0x221   : > { %475 = vst.msk [vmem:[#allocation4] sm:$0xff] %vm379_vm0, %v474_v41 }
 0x228   : > { %v480_v42 = vld [vmem:[#allocation4] sm:$0xff] }
 0x270   : > { %v486_v43 = vpop.permute.xlu2 %485 }
 0x271   : > { %v488_v44 = vmul.f32 %v486_v43, %v480_v42 }
 0x273   : > { %v489_v45 = vpack.c.bf16 %v488_v44, %v488_v44 }
 0x275   : > { %491 = vst.msk [vmem:[%s370_s13] sm:$0xf] %vm490_vm7, %v489_v45 }
 0x276 PF: > { %s14_s19 = sadd.s32 1, %s758_s19   ;;  %s870_s15 = smov %s750_s17 }
 0x277   : > { %p11_p7 = scmp.ge.s32.totalorder %s14_s19, 10   ;;  %s871_s16 = smov %s754_s18 }
 0x278   : > { %s872_s17 = smov %s875_s20  ;;  %s873_s18 = smov %s879_s21 }
 0x279   :  { %13 = sbr.rel (!%p11_p7) target bundleno = 3 (0x3), region = 83 }

// kernel: _lambda_.65
= control target key start
LH: loop header
LB: loop body
LE: loop exit
PB: predicated region body
PF: predicated region fallthrough
CT: control target
= control target key end

     0   :  { %vm46_vm0 = vcmask 261120   ;;  %s144_s1 = inlined_call_operand.vmem [shape: bf16[32,128], index: 1, kind: input, shape index: {}]   ;;  %s145_s2 = inlined_call_operand.vmem [shape: f32[1,128], index: 2, kind: input, shape index: {}]   ;;  %s146_s0 = inlined_call_operand.vmem [shape: bf16[16,32], index: 0, kind: input, shape index: {}]   ;;  %s147_s3 = inlined_call_operand.vmem [shape: bf16[16,128], index: 3, kind: output, shape index: {}]  }
   0x1   :  { %v102_v0 = vld [vmem:[%s144_s1 + $0x8] sm:$0xff]  ;;  %v101_v1 = vld [vmem:[%s144_s1] sm:$0xff] }
   0x2   :  { %56 = vmatpush.bf16.msra.mxu0 %v102_v0  ;;  %v100_v2 = vld [vmem:[%s146_s0] sm:$0xff] }
   0x3   :  { %v108_v4 = vld [vmem:[%s145_s2] ss:$0 sm:$0xff] }
   0x6   :  { %57 = vmatpush.bf16.msra.mxu0 %v101_v1 }
   0x9   :  { %99 = vmatmul.msk.bf16.vlgmr.msra.gmra.mxu0 %vm46_vm0, %v100_v2 }
  0x86   :  { %v59_v3 = vpop.f32.mrf.mxu0 }
  0x87   :  { %v77_v6 = vadd.f32 %v108_v4, %v59_v3 }
  0x8e   :  { %v61_v5 = vpop.f32.mrf.mxu0 }
  0x8f   :  { %v78_v7 = vadd.f32 %v108_v4, %v61_v5 }
  0x91   :  { %v106_v8 = vpack.c.bf16 %v78_v7, %v77_v6 }
  0x93   :  { %107 = vst [vmem:[%s147_s3] sm:$0xff] %v106_v8  }

// kernel: _lambda_.66
= control target key start
LH: loop header
LB: loop body
LE: loop exit
PB: predicated region body
PF: predicated region fallthrough
CT: control target
= control target key end

     0   :  { %vm29_vm0 = vcmask 261120   ;;  %v208_v5 = vmov 32.0   ;;  %vm95_vm6 = vcmask 257024   ;;  %s265_s0 = inlined_call_operand.vmem [shape: bf16[16,32], index: 0, kind: input, shape index: {}]   ;;  %s266_s1 = inlined_call_operand.vmem [shape: f32[1,32], index: 1, kind: input, shape index: {}]   ;;  %s267_s2 = inlined_call_operand.vmem [shape: f32[1,32], index: 2, kind: input, shape index: {}]   ;;  %s268_s4 = inlined_call_operand.vmem [shape: f32[1,128], index: 4, kind: input, shape index: {}]   ;;  %s269_s3 = inlined_call_operand.vmem [shape: bf16[32,128], index: 3, kind: input, shape index: {}]   ;;  %s270_s5 = inlined_call_operand.vmem [shape: bf16[16,128], index: 5, kind: output, shape index: {}]  }
   0x1   :  { %v186_v0 = vld [vmem:[%s265_s0] sm:$0xff]   ;;  %198 = vrcp.f32 %v208_v5  ;;  %v184_v25 = vld [vmem:[%s269_s3 + $0x8] sm:$0xff] }
   0x2   :  { %v187_v1 = vunpack.c.l.bf16 %v186_v0  ;;  %v188_v3 = vunpack.c.h.bf16 %v186_v0  ;;  %135 = vmatpush.bf16.msra.mxu0 %v184_v25  ;;  %v183_v28 = vld [vmem:[%s269_s3] sm:$0xff] }
   0x3   :  { %v195_v38 = vld [vmem:[%s266_s1] ss:$0 sm:$0xff] }
   0x4   :  { %v30_v2 = vsel %vm29_vm0, %v187_v1, 0.0  ;;  %v33_v4 = vsel %vm29_vm0, %v188_v3, 0.0  ;;  %v196_v41 = vld [vmem:[%s267_s2] ss:$0 sm:$0xff] }
   0x5   :  { %31 = vadd.xlane.f32.xlu0 %v30_v2  ;;  %v197_v55 = vld [vmem:[%s268_s4] ss:$0 sm:$0xff] }
   0x6   :  { %136 = vmatpush.bf16.msra.mxu0 %v183_v28 }
   0x7   :  { %v199_v6 = vpop.eup %198 }
   0x8   :  { %v37_v7 = vmul.f32 32.0, %v199_v6  ;;  %vm41_vm1 = vweird.f32 %v199_v6 }
   0xa   :  { %v38_v8 = vsub.f32 1.0, %v37_v7 }
   0xc   :  { %v39_v9 = vmul.f32 %v199_v6, %v38_v8 }
   0xd   :  { %34 = vadd.xlane.f32.xlu0 %v33_v4 }
   0xe   :  { %v40_v10 = vadd.f32 %v199_v6, %v39_v9 }
  0x10   :  { %v42_v11 = vsel %vm41_vm1, %v199_v6, %v40_v10 }
  0x78   :  { %v32_v12 = vpop.xlane.xlu0 %31 }
  0x79   :  { %v43_v13 = vmul.f32 %v42_v11, %v32_v12 }
  0x7b   :  { %v45_v14 = vsub.f32 %v187_v1, %v43_v13 }
  0x7d   :  { %v47_v15 = vmul.f32 %v45_v14, %v45_v14 }
  0x7f   :  { %v49_v16 = vsel %vm29_vm0, %v47_v15, 0.0 }
  0x80   :  { %50 = vadd.xlane.f32.xlu1 %v49_v16  ;;  %v35_v17 = vpop.xlane.xlu0 %34 }
  0x81   :  { %v44_v18 = vmul.f32 %v42_v11, %v35_v17 }
  0x83   :  { %v46_v19 = vsub.f32 %v188_v3, %v44_v18 }
  0x85   :  { %v48_v20 = vmul.f32 %v46_v19, %v46_v19 }
  0x87   :  { %v52_v21 = vsel %vm29_vm0, %v48_v20, 0.0 }
  0x88   :  { %53 = vadd.xlane.f32.xlu1 %v52_v21 }
  0xf3   :  { %v51_v22 = vpop.xlane.xlu1 %50 }
  0xf4   :  { %v55_v23 = vmul.f32 %v51_v22, %v42_v11 }
  0xf6   :  { %v57_v24 = vadd.f32 1e-05, %v55_v23 }
  0xf8   :  { %200 = vrsqrt.f32 %v57_v24  ;;  %vm65_vm3 = vweird.f32 %v57_v24 }
  0xfb   :  { %v54_v26 = vpop.xlane.xlu1 %53 }
  0xfc   :  { %v56_v27 = vmul.f32 %v54_v26, %v42_v11 }
  0xfe   :  { %v201_v29 = vpop.eup %200  ;;  %v58_v30 = vadd.f32 1e-05, %v56_v27 }
  0xff   :  { %v60_v31 = vmul.f32 %v201_v29, %v57_v24  ;;  %vm66_vm2 = vweird.f32 %v201_v29 }
 0x100   :  { %202 = vrsqrt.f32 %v58_v30  ;;  %vm67_vm4 = vmor %vm65_vm3, %vm66_vm2  ;;  %vm75_vm7 = vweird.f32 %v58_v30 }
 0x101   :  { %v61_v32 = vmul.f32 %v201_v29, %v60_v31 }
 0x103   :  { %v62_v33 = vmul.f32 0.5, %v61_v32 }
 0x105   :  { %v63_v34 = vsub.f32 1.5, %v62_v33 }
 0x106   :  { %v203_v35 = vpop.eup %202 }
 0x107   :  { %v64_v36 = vmul.f32 %v201_v29, %v63_v34  ;;  %v70_v37 = vmul.f32 %v203_v35, %v58_v30  ;;  %vm76_vm5 = vweird.f32 %v203_v35 }
 0x108   :  { %vm77_vm8 = vmor %vm75_vm7, %vm76_vm5 }
 0x109   :  { %v68_v39 = vsel %vm67_vm4, %v201_v29, %v64_v36  ;;  %v71_v40 = vmul.f32 %v203_v35, %v70_v37 }
 0x10a   :  { %v79_v42 = vmul.f32 %v68_v39, %v45_v14 }
 0x10b   :  { %v72_v43 = vmul.f32 0.5, %v71_v40 }
 0x10c   :  { %v85_v44 = vmul.f32 %v195_v38, %v79_v42 }
 0x10d   :  { %v73_v45 = vsub.f32 1.5, %v72_v43 }
 0x10e   :  { %v91_v46 = vadd.f32 %v196_v41, %v85_v44 }
 0x10f   :  { %v74_v47 = vmul.f32 %v203_v35, %v73_v45 }
 0x110   :  { %v93_v48 = vpack.c.bf16 %v91_v46, %v91_v46 }
 0x111   :  { %v78_v49 = vsel %vm77_vm8, %v203_v35, %v74_v47 }
 0x112   :  { %96 = vst.msk [vmem:[#allocation2] sm:$0xf] %vm95_vm6, %v93_v48  ;;  %v80_v50 = vmul.f32 %v78_v49, %v46_v19 }
 0x114   :  { %v86_v51 = vmul.f32 %v195_v38, %v80_v50 }
 0x116   :  { %v92_v52 = vadd.f32 %v196_v41, %v86_v51 }
 0x118   :  { %v94_v53 = vpack.c.bf16 %v92_v52, %v92_v52 }
 0x11a   :  { %97 = vst.msk [vmem:[#allocation2 + $0x4] sm:$0xf] %vm95_vm6, %v94_v53 }
 0x121   :  { %v182_v54 = vld [vmem:[#allocation2] sm:$0xff] }
 0x122   :  { %181 = vmatmul.msk.bf16.vlgmr.msra.gmra.mxu0 %vm29_vm0, %v182_v54 }
 0x19f   :  { %v138_v56 = vpop.f32.mrf.mxu0 }
 0x1a0   :  { %v139_v57 = vadd.f32 %v197_v55, %v138_v56 }
 0x1a2   :  { %v143_v58 = vmul.f32 %v139_v57, %v139_v57 }
 0x1a4   :  { %v145_v59 = vmul.f32 %v143_v58, %v139_v57 }
 0x1a6   :  { %v147_v60 = vmul.f32 0.044715, %v145_v59 }
 0x1a7   :  { %v140_v61 = vpop.f32.mrf.mxu0 }
 0x1a8   :  { %v149_v62 = vadd.f32 %v147_v60, %v139_v57  ;;  %v141_v63 = vadd.f32 %v197_v55, %v140_v61 }
 0x1aa   :  { %v151_v0 = vmul.f32 0.7978846, %v149_v62  ;;  %v144_v1 = vmul.f32 %v141_v63, %v141_v63 }
 0x1ac   :  { %v146_v2 = vmul.f32 %v144_v1, %v141_v63  ;;  %204 = vtanh.f32 %v151_v0 }
 0x1ae   :  { %v148_v3 = vmul.f32 0.044715, %v146_v2 }
 0x1b0   :  { %v150_v4 = vadd.f32 %v148_v3, %v141_v63 }
 0x1b2   :  { %v152_v5 = vmul.f32 0.7978846, %v150_v4  ;;  %v205_v6 = vpop.eup %204 }
 0x1b3   :  { %v155_v7 = vadd.f32 1.0, %v205_v6 }
 0x1b4   :  { %206 = vtanh.f32 %v152_v5 }
 0x1b5   :  { %v157_v9 = vmul.f32 0.5, %v155_v7 }
 0x1b7   :  { %v159_v12 = vmul.f32 %v157_v9, %v139_v57 }
 0x1ba   :  { %v207_v8 = vpop.eup %206 }
 0x1bb   :  { %v156_v10 = vadd.f32 1.0, %v207_v8 }
 0x1bd   :  { %v158_v11 = vmul.f32 0.5, %v156_v10 }
 0x1bf   :  { %v160_v13 = vmul.f32 %v158_v11, %v141_v63 }
 0x1c1   :  { %v192_v14 = vpack.c.bf16 %v160_v13, %v159_v12 }
 0x1c3   :  { %193 = vst [vmem:[%s270_s5] sm:$0xff] %v192_v14  }

// kernel: _lambda_.67
= control target key start
LH: loop header
LB: loop body
LE: loop exit
PB: predicated region body
PF: predicated region fallthrough
CT: control target
= control target key end

     0   :  { %vm62_vm0 = vcmask 523264   ;;  %s176_s1 = inlined_call_operand.vmem [shape: bf16[64,128], index: 1, kind: input, shape index: {}]   ;;  %s177_s2 = inlined_call_operand.vmem [shape: f32[1,128], index: 2, kind: input, shape index: {}]   ;;  %s178_s0 = inlined_call_operand.vmem [shape: bf16[16,64], index: 0, kind: input, shape index: {}]   ;;  %s179_s3 = inlined_call_operand.vmem [shape: bf16[16,128], index: 3, kind: output, shape index: {}]  }
   0x1   :  { %v128_v0 = vld [vmem:[%s176_s1 + $0x18] sm:$0xff]  ;;  %v127_v1 = vld [vmem:[%s176_s1 + $0x10] sm:$0xff]  ;;  %v126_v2 = vld [vmem:[%s176_s1 + $0x8] sm:$0xff] }
   0x2   :  { %70 = vmatpush.bf16.msra.mxu0 %v128_v0  ;;  %v125_v3 = vld [vmem:[%s176_s1] sm:$0xff] }
   0x3   :  { %v124_v4 = vld [vmem:[%s178_s0] sm:$0xff] }
   0x4   :  { %v134_v6 = vld [vmem:[%s177_s2] ss:$0 sm:$0xff] }
   0x6   :  { %71 = vmatpush.bf16.msra.mxu0 %v127_v1 }
   0xa   :  { %72 = vmatpush.bf16.msra.mxu0 %v126_v2 }
   0xe   :  { %73 = vmatpush.bf16.msra.mxu0 %v125_v3 }
  0x11   :  { %123 = vmatmul.msk.bf16.vlgmr.msra.gmra.mxu0 %vm62_vm0, %v124_v4 }
  0x8e   :  { %v75_v5 = vpop.f32.mrf.mxu0 }
  0x8f   :  { %v93_v8 = vadd.f32 %v134_v6, %v75_v5 }
  0x96   :  { %v77_v7 = vpop.f32.mrf.mxu0 }
  0x97   :  { %v94_v9 = vadd.f32 %v134_v6, %v77_v7 }
  0x99   :  { %v132_v10 = vpack.c.bf16 %v94_v9, %v93_v8 }
  0x9b   :  { %133 = vst [vmem:[%s179_s3] sm:$0xff] %v132_v10  }

// kernel: _lambda_.51
= control target key start
LH: loop header
LB: loop body
LE: loop exit
PB: predicated region body
PF: predicated region fallthrough
CT: control target
= control target key end

     0   :  { %vm16_vm0 = vcmask 261120   ;;  %v70_v3 = vmov 32.0   ;;  %vm57_vm5 = vcmask 257024   ;;  %s105_s0 = inlined_call_operand.vmem [shape: bf16[8,32], index: 0, kind: input, shape index: {}]   ;;  %s106_s1 = inlined_call_operand.vmem [shape: f32[1,32], index: 1, kind: input, shape index: {}]   ;;  %s107_s2 = inlined_call_operand.vmem [shape: f32[1,32], index: 2, kind: input, shape index: {}]   ;;  %s108_s3 = inlined_call_operand.vmem [shape: bf16[8,32], index: 3, kind: output, shape index: {}]  }
   0x1   :  { %v14_v0 = vld [vmem:[%s105_s0] sm:$0xf]  ;;  %66 = vrcp.f32 %v70_v3 }
   0x2   :  { %v15_v1 = vunpack.c.l.bf16 %v14_v0  ;;  %v64_v24 = vld [vmem:[%s106_s1] ss:$0 sm:$0xff] }
   0x3   :  { %v65_v26 = vld [vmem:[%s107_s2] ss:$0 sm:$0xff] }
   0x4   :  { %v17_v2 = vsel %vm16_vm0, %v15_v1, 0.0 }
   0x5   :  { %18 = vadd.xlane.f32.xlu0 %v17_v2 }
   0x7   :  { %v67_v4 = vpop.eup %66 }
   0x8   :  { %v21_v5 = vmul.f32 32.0, %v67_v4  ;;  %vm25_vm1 = vweird.f32 %v67_v4 }
   0xa   :  { %v22_v6 = vsub.f32 1.0, %v21_v5 }
   0xc   :  { %v23_v7 = vmul.f32 %v67_v4, %v22_v6 }
   0xe   :  { %v24_v8 = vadd.f32 %v67_v4, %v23_v7 }
  0x10   :  { %v26_v9 = vsel %vm25_vm1, %v67_v4, %v24_v8 }
  0x78   :  { %v19_v10 = vpop.xlane.xlu0 %18 }
  0x79   :  { %v27_v11 = vmul.f32 %v26_v9, %v19_v10 }
  0x7b   :  { %v28_v12 = vsub.f32 %v15_v1, %v27_v11 }
  0x7d   :  { %v29_v13 = vmul.f32 %v28_v12, %v28_v12 }
  0x7f   :  { %v30_v14 = vsel %vm16_vm0, %v29_v13, 0.0 }
  0x80   :  { %31 = vadd.xlane.f32.xlu0 %v30_v14 }
  0xf3   :  { %v32_v15 = vpop.xlane.xlu0 %31 }
  0xf4   :  { %v33_v16 = vmul.f32 %v32_v15, %v26_v9 }
  0xf6   :  { %v34_v17 = vadd.f32 1e-05, %v33_v16 }
  0xf8   :  { %68 = vrsqrt.f32 %v34_v17  ;;  %vm41_vm3 = vweird.f32 %v34_v17 }
  0xfe   :  { %v69_v18 = vpop.eup %68 }
  0xff   :  { %v36_v19 = vmul.f32 %v69_v18, %v34_v17  ;;  %vm42_vm2 = vweird.f32 %v69_v18 }
 0x100   :  { %vm43_vm4 = vmor %vm41_vm3, %vm42_vm2 }
 0x101   :  { %v37_v20 = vmul.f32 %v69_v18, %v36_v19 }
 0x103   :  { %v38_v21 = vmul.f32 0.5, %v37_v20 }
 0x105   :  { %v39_v22 = vsub.f32 1.5, %v38_v21 }
 0x107   :  { %v40_v23 = vmul.f32 %v69_v18, %v39_v22 }
 0x109   :  { %v44_v25 = vsel %vm43_vm4, %v69_v18, %v40_v23 }
 0x10a   :  { %v45_v27 = vmul.f32 %v44_v25, %v28_v12 }
 0x10c   :  { %v50_v28 = vmul.f32 %v64_v24, %v45_v27 }
 0x10e   :  { %v55_v29 = vadd.f32 %v65_v26, %v50_v28 }
 0x110   :  { %v56_v30 = vpack.c.bf16 %v55_v29, %v55_v29 }
 0x112   :  { %58 = vst.msk [vmem:[%s108_s3] sm:$0xf] %vm57_vm5, %v56_v30 }

// kernel: _lambda_.49
= control target key start
LH: loop header
LB: loop body
LE: loop exit
PB: predicated region body
PF: predicated region fallthrough
CT: control target
= control target key end

     0   :  { %vm124_vm0 = vcmask 523264   ;;  %s298_s1 = inlined_call_operand.vmem [shape: bf16[192,128], index: 1, kind: input, shape index: {}]   ;;  %s299_s0 = inlined_call_operand.vmem [shape: bf16[8,192], index: 0, kind: input, shape index: {}]   ;;  %s300_s2 = inlined_call_operand.vmem [shape: f32[1,128], index: 2, kind: input, shape index: {}]   ;;  %s301_s3 = inlined_call_operand.vmem [shape: bf16[8,128], index: 3, kind: output, shape index: {}]  }
   0x1   :  { %v227_v0 = vld [vmem:[%s298_s1 + $0x38] sm:$0xff]  ;;  %v226_v2 = vld [vmem:[%s298_s1 + $0x30] sm:$0xff]  ;;  %v225_v4 = vld [vmem:[%s298_s1 + $0x28] sm:$0xff] }
   0x2   :  { %v231_v1 = vld [vmem:[%s298_s1 + $0x58] sm:$0xff]  ;;  %128 = vmatpush.bf16.msra.mxu0 %v227_v0  ;;  %v230_v3 = vld [vmem:[%s298_s1 + $0x50] sm:$0xff]  ;;  %v229_v5 = vld [vmem:[%s298_s1 + $0x48] sm:$0xff] }
   0x3   :  { %145 = vmatpush.bf16.msra.mxu1 %v231_v1  ;;  %v21_v6 = vld [vmem:[%s299_s0] sm:$0xff]  ;;  %v223_v10 = vld [vmem:[%s298_s1 + $0x18] sm:$0xff]  ;;  %v222_v12 = vld [vmem:[%s298_s1 + $0x10] sm:$0xff] }
   0x4   :  { %v224_v7 = vld [vmem:[%s298_s1 + $0x20] sm:$0xff]  ;;  %v48_v8 = vunpack.c.h.b16 %v21_v6  ;;  %v221_v13 = vld [vmem:[%s298_s1 + $0x8] sm:$0xff]  ;;  %v47_v14 = vunpack.c.l.b16 %v21_v6 }
   0x5   :  { %v228_v9 = vld [vmem:[%s298_s1 + $0x40] sm:$0xff] }
   0x6   :  { %129 = vmatpush.bf16.msra.mxu0 %v226_v2  ;;  %v50_v11 = vpack.c.b16 %v48_v8, %v48_v8  ;;  %v220_v15 = vld [vmem:[%s298_s1] sm:$0xff]  ;;  %v49_v16 = vpack.c.b16 %v47_v14, %v47_v14 }
   0x7   :  { %146 = vmatpush.bf16.msra.mxu1 %v230_v3  ;;  %v232_v19 = vld [vmem:[%s300_s2] ss:$0 sm:$0xff] }
   0xa   :  { %130 = vmatpush.bf16.msra.mxu0 %v225_v4 }
   0xb   :  { %147 = vmatpush.bf16.msra.mxu1 %v229_v5 }
   0xe   :  { %131 = vmatpush.bf16.msra.mxu0 %v224_v7 }
   0xf   :  { %148 = vmatpush.bf16.msra.mxu1 %v228_v9 }
  0x12   :  { %132 = vmatpush.bf16.msra.mxu0 %v223_v10  ;;  %219 = vmatmul.msk.bf16.vlgmr.msra.gmra.mxu1 %vm124_vm0, %v50_v11 }
  0x16   :  { %133 = vmatpush.bf16.msra.mxu0 %v222_v12 }
  0x1a   :  { %134 = vmatpush.bf16.msra.mxu0 %v221_v13 }
  0x1e   :  { %135 = vmatpush.bf16.msra.mxu0 %v220_v15 }
  0x21   :  { %136 = vmatmul.bf16.vlgmr.msra.gmra.mxu0 %v49_v16 }
  0x8f   :  { %v150_v17 = vpop.f32.mrf.mxu1 }
  0x97   :  { %v152_v18 = vpop.f32.mrf.mxu1 }
  0x9e   :  { %v137_v20 = vpop.f32.mrf.mxu0 }
  0x9f   :  { %v151_v21 = vadd.f32 %v150_v17, %v137_v20 }
  0xa1   :  { %v164_v22 = vadd.f32 %v232_v19, %v151_v21 }
  0xa3   :  { %v165_v23 = vpack.c.bf16 %v164_v22, %v164_v22 }
  0xa5   :  { %166 = vst [vmem:[%s301_s3] sm:$0xf] %v165_v23 }
  0xa6   :  { %v139_v24 = vpop.f32.mrf.mxu0 }

// kernel: _lambda_.52
= control target key start
LH: loop header
LB: loop body
LE: loop exit
PB: predicated region body
PF: predicated region fallthrough
CT: control target
= control target key end

     0   :  { %vm38_vm0 = vcmask 261120   ;;  %s119_s1 = inlined_call_operand.vmem [shape: bf16[32,128], index: 1, kind: input, shape index: {}]   ;;  %s120_s2 = inlined_call_operand.vmem [shape: f32[1,128], index: 2, kind: input, shape index: {}]   ;;  %s121_s0 = inlined_call_operand.vmem [shape: bf16[8,32], index: 0, kind: input, shape index: {}]   ;;  %s122_s3 = inlined_call_operand.vmem [shape: bf16[8,128], index: 3, kind: output, shape index: {}]  }
   0x1   :  { %v82_v0 = vld [vmem:[%s119_s1 + $0x8] sm:$0xff]  ;;  %v81_v1 = vld [vmem:[%s119_s1] sm:$0xff] }
   0x2   :  { %48 = vmatpush.bf16.msra.mxu0 %v82_v0  ;;  %v21_v2 = vld [vmem:[%s121_s0] sm:$0xf] }
   0x3   :  { %v83_v3 = vld [vmem:[%s120_s2] ss:$0 sm:$0xff] }
   0x6   :  { %49 = vmatpush.bf16.msra.mxu0 %v81_v1 }
   0x9   :  { %80 = vmatmul.msk.bf16.vlgmr.msra.gmra.mxu0 %vm38_vm0, %v21_v2 }
  0x86   :  { %v51_v4 = vpop.f32.mrf.mxu0 }
  0x87   :  { %v65_v5 = vadd.f32 %v83_v3, %v51_v4 }
  0x89   :  { %v66_v6 = vpack.c.bf16 %v65_v5, %v65_v5 }
  0x8b   :  { %67 = vst [vmem:[%s122_s3] sm:$0xf] %v66_v6 }
  0x8e   :  { %v53_v7 = vpop.f32.mrf.mxu0 }

// kernel: _lambda_.54
= control target key start
LH: loop header
LB: loop body
LE: loop exit
PB: predicated region body
PF: predicated region fallthrough
CT: control target
= control target key end

     0   :  { %s777_s15 = smov 0   ;;  %s779_s16 = smov 0   ;;  %s860_s0 = inlined_call_operand.vmem [shape: bf16[2,4,4,8], index: 0, kind: input, shape index: {}]   ;;  %s861_s1 = inlined_call_operand.vmem [shape: bf16[2,4,8,8], index: 1, kind: input, shape index: {}]   ;;  %s862_s2 = inlined_call_operand.vmem [shape: bf16[2,4,8,8], index: 2, kind: input, shape index: {}]   ;;  %s863_s3 = inlined_call_operand.vmem [shape: f32[2,1,8], index: 3, kind: input, shape index: {}]   ;;  %s864_s4 = inlined_call_operand.vmem [shape: bf16[2,4,4,8], index: 4, kind: output, shape index: {}]  }
   0x1   :  { %s781_s17 = smov 0   ;;  %s783_s18 = smov 0  }
   0x2   :  { %s785_s19 = smov 0  }
   0x3 LB: > { %s36_s20 = sadd.s32 1, %s739_s17  ;;  %s40_s21 = sadd.s32 1, %s743_s18  ;;  %s747_s19 = sphi %s785_s19, %s14_s19   ;;  %s743_s18 = sphi %s783_s18, %s868_s18   ;;  %s739_s17 = sphi %s781_s17, %s867_s17   ;;  %s735_s16 = sphi %s779_s16, %s866_s16   ;;  %s731_s15 = sphi %s777_s15, %s865_s15  }
   0x4   : > { %p38_p0 = scmp.ge.s32.totalorder %s36_s20, 4  ;;  %p644_p1 = scmp.ge.s32.totalorder %s747_s19, 1 }
   0x5   : > { %p255_p2 = scmp.lt.s32.totalorder %s747_s19, 9 }
   0x6   : > { %s870_s20 = smov (%p38_p0, %s36_s20), 0  ;;  %s872_s21 = smov (!%p38_p0, %s40_s21), %s743_s18 }
   0x7   : > { %p256_p3 = pnand %p644_p1, %p255_p2  ;;  %p42_p4 = scmp.ge.s32.totalorder %s872_s21, 2 }
   0x8   : > { %p321_p5 = scmp.lt.s32.totalorder (!%p256_p3), %s735_s16, 1  ;;  %p323_p6 = scmp.lt.s32.totalorder (!%p256_p3), %s731_s15, 3 }
   0x9   : > { %s874_s21 = smov (%p42_p4, %s872_s21), 0  ;;  %259 = sbr.rel (%p256_p3) target bundleno = 630 (0x276), region = 36 }
   0xe   : > { %s876_s16 = smov (!%p321_p5, %s735_s16), 1  ;;  %s878_s15 = smov (!%p323_p6, %s731_s15), 3  ;;  %vm386_vm0 = vcmask 64512   ;;  %v749_v3 = vmov 0   ;;  %vm376_vm1 = vcmask 3072   ;;  %v750_v4 = vmov 0.0  }
   0xf   : > { %s645_s22 = sshll.u32 %s876_s16, 2  ;;  %700 = vset.pattern.permute.xlu0 %v749_v3  ;;  %701 = vset.pattern.permute.xlu1 %v749_v3  ;;  %378 = vst.msk [vmem:[#allocation3] sm:$0xf] %vm376_vm1, %v750_v4  ;;  %vm379_vm2 = vcmask 60416   ;;  %v751_v5 = vmov -inf   ;;  %s359_s8 = scalar_lea.vmem %s863_s3, %s876_s16  ;;  %vm446_vm5 = vcmask 1043456  }
  0x10   : > { %s807_s23 = sadd.s32 %s645_s22, %s878_s15  ;;  %702 = vset.pattern.permute.xlu2 %v749_v3  ;;  %380 = vst.msk [vmem:[#allocation4] sm:$0xf] %vm379_vm2, %v750_v4  ;;  %v384_v6 = vld [vmem:[%s359_s8] sm:$0x1]  ;;  %vm479_vm6 = vcmask 58368  }
  0x11   : > { %s648_s24 = sshll.u32 %s807_s23, 2  ;;  %s646_s28 = sshll.u32 %s807_s23, 1  ;;  %377 = vst.msk [vmem:[#allocation2] sm:$0xf] %vm376_vm1, %v751_v5  ;;  %vm385_vm3 = vcmp.gt.f32.partialorder %v384_v6, 0.0 }
  0x12   : > { %s342_s27 = scalar_lea.vmem %s861_s1, %s648_s24  ;;  %s331_s5 = scalar_lea.vmem %s860_s0, %s646_s28  ;;  %v406_v7 = vsel %vm385_vm3, 1, %v749_v3 }
  0x13   : > { %v382_v0 = vld [vmem:[%s342_s27] sm:$0xf]  ;;  %v407_v8 = vperm.slane %v406_v7, 0  ;;  %s353_s11 = scalar_lea.vmem %s862_s2, %s648_s24  ;;  %s370_s14 = scalar_lea.vmem %s864_s4, %s646_s28 }
  0x14   : > { %v391_v1 = vsel %vm386_vm0, %v382_v0, 0  ;;  %v381_v2 = vld [vmem:[%s331_s5] sm:$0x3] }
  0x15   : > { %400 = vmatpush.bf16.xpose.msra.mxu0 %v391_v1  ;;  %vm408_vm4 = vcmp.eq.s32.totalorder %v407_v8, 1  ;;  %v383_v17 = vld [vmem:[%s353_s11] sm:$0xf] }
  0x16   : > { %v448_v18 = vsel %vm446_vm5, %v383_v17, 0  ;;  %v427_v27 = vld [vmem:[#allocation3] sm:$0xf] }
  0x17   : > { %457 = vmatpush.bf16.msra.mxu1 %v448_v18  ;;  %v435_v35 = vld [vmem:[#allocation4] sm:$0xf] }
  0x18   : > { %v410_v13 = vld [vmem:[#allocation2] sm:$0xf] }
  0x1c   : > { %653 = vmatmul.msk.bf16.vlgmr.msra.gmra.mxu0 %vm386_vm0, %v381_v2 }
  0x99   : > { %v402_v9 = vpop.f32.mrf.mxu0 }
  0x9a   : > { %v409_v10 = vsel %vm408_vm4, %v402_v9, -1e+09 }
  0x9b   : > { %v412_v11 = vsel %vm379_vm2, %v409_v10, -inf }
  0x9c   : > { %413 = vmax.xlane.f32.xlu0 %v412_v11 }
  0xa1   : > { %v404_v12 = vpop.f32.mrf.mxu0 }
 0x10f   : > { %v414_v14 = vpop.xlane.xlu0 %413 }
 0x110   : > { %v415_v15 = vmax.f32 %v410_v13, %v414_v14 }
 0x112   : > { %v416_v16 = vsub.f32 %v410_v13, %v415_v15  ;;  %465 = vst.msk [vmem:[#allocation2] sm:$0xf] %vm376_vm1, %v415_v15  ;;  %421 = vperm.xlu0 %700, %v415_v15  }
 0x114   : > { %v417_v25 = vmul.f32 1.442695, %v416_v16 }
 0x184   : > { %v422_v19 = vpop.permute.xlu0 %421 }
 0x185   : > { %v424_v20 = vsub.f32 %v409_v10, %v422_v19 }
 0x187   : > { %v425_v21 = vmul.f32 1.442695, %v424_v20 }
 0x189   : > { %703 = vpow2.f32 %v425_v21 }
 0x18a   : > { %705 = vpow2.f32 %v417_v25 }
 0x18f   : > { %v704_v22 = vpop.eup %703 }
 0x190   : > { %v429_v23 = vsel %vm379_vm2, %v704_v22, 0.0  ;;  %v442_v24 = vpack.c.bf16 %v704_v22, %v704_v22  ;;  %v706_v26 = vpop.eup %705 }
 0x191   : > { %430 = vadd.xlane.f32.xlu1 %v429_v23  ;;  %v428_v28 = vmul.f32 %v706_v26, %v427_v27 }
 0x192   : > { %654 = vmatmul.msk.bf16.vlgmr.msra.gmra.mxu1 %vm386_vm0, %v442_v24 }
 0x1aa   : > { %438 = vperm.xlu1 %701, %v706_v26  }
 0x204   : > { %v431_v29 = vpop.xlane.xlu1 %430 }
 0x205   : > { %v432_v30 = vadd.f32 %v431_v29, %v428_v28 }
 0x207   : > { %434 = vst.msk [vmem:[#allocation3] sm:$0xf] %vm376_vm1, %v432_v30 }
 0x20e   : > { %v470_v31 = vld [vmem:[#allocation3] sm:$0xf] }
 0x20f   : > { %v459_v32 = vpop.f32.mrf.mxu1  ;;  %707 = vrcp.f32 %v470_v31 }
 0x215   : > { %v708_v33 = vpop.eup %707 }
 0x216   : > { %474 = vperm.xlu2 %702, %v708_v33  }
 0x217   : > { %v461_v34 = vpop.f32.mrf.mxu1 }
 0x21c   : > { %v439_v36 = vpop.permute.xlu1 %438 }
 0x21d   : > { %v441_v37 = vmul.f32 %v439_v36, %v435_v35 }
 0x21f   : > { %v463_v38 = vadd.f32 %v459_v32, %v441_v37 }
 0x221   : > { %464 = vst.msk [vmem:[#allocation4] sm:$0xf] %vm379_vm2, %v463_v38 }
 0x228   : > { %v469_v39 = vld [vmem:[#allocation4] sm:$0xf] }
 0x270   : > { %v475_v40 = vpop.permute.xlu2 %474 }
 0x271   : > { %v477_v41 = vmul.f32 %v475_v40, %v469_v39 }
 0x273   : > { %v478_v42 = vpack.c.bf16 %v477_v41, %v477_v41 }
 0x275   : > { %480 = vst.msk [vmem:[%s370_s14] sm:$0x3] %vm479_vm6, %v478_v42 }
 0x276 PF: > { %s14_s19 = sadd.s32 1, %s747_s19   ;;  %s865_s15 = smov %s739_s17 }
 0x277   : > { %p11_p7 = scmp.ge.s32.totalorder %s14_s19, 10   ;;  %s866_s16 = smov %s743_s18 }
 0x278   : > { %s867_s17 = smov %s870_s20  ;;  %s868_s18 = smov %s874_s21 }
 0x279   :  { %13 = sbr.rel (!%p11_p7) target bundleno = 3 (0x3), region = 83 }

// kernel: _lambda_.57
= control target key start
LH: loop header
LB: loop body
LE: loop exit
PB: predicated region body
PF: predicated region fallthrough
CT: control target
= control target key end

     0   :  { %vm54_vm0 = vcmask 523264   ;;  %s151_s1 = inlined_call_operand.vmem [shape: bf16[64,128], index: 1, kind: input, shape index: {}]   ;;  %s152_s2 = inlined_call_operand.vmem [shape: f32[1,128], index: 2, kind: input, shape index: {}]   ;;  %s153_s0 = inlined_call_operand.vmem [shape: bf16[8,64], index: 0, kind: input, shape index: {}]   ;;  %s154_s3 = inlined_call_operand.vmem [shape: bf16[8,128], index: 3, kind: output, shape index: {}]  }
   0x1   :  { %v108_v0 = vld [vmem:[%s151_s1 + $0x18] sm:$0xff]  ;;  %v107_v1 = vld [vmem:[%s151_s1 + $0x10] sm:$0xff]  ;;  %v106_v2 = vld [vmem:[%s151_s1 + $0x8] sm:$0xff] }
   0x2   :  { %62 = vmatpush.bf16.msra.mxu0 %v108_v0  ;;  %v105_v3 = vld [vmem:[%s151_s1] sm:$0xff] }
   0x3   :  { %v21_v4 = vld [vmem:[%s153_s0] sm:$0xf] }
   0x4   :  { %v109_v5 = vld [vmem:[%s152_s2] ss:$0 sm:$0xff] }
   0x6   :  { %63 = vmatpush.bf16.msra.mxu0 %v107_v1 }
   0xa   :  { %64 = vmatpush.bf16.msra.mxu0 %v106_v2 }
   0xe   :  { %65 = vmatpush.bf16.msra.mxu0 %v105_v3 }
  0x11   :  { %104 = vmatmul.msk.bf16.vlgmr.msra.gmra.mxu0 %vm54_vm0, %v21_v4 }
  0x8e   :  { %v67_v6 = vpop.f32.mrf.mxu0 }
  0x8f   :  { %v81_v7 = vadd.f32 %v109_v5, %v67_v6 }
  0x91   :  { %v82_v8 = vpack.c.bf16 %v81_v7, %v81_v7 }
  0x93   :  { %83 = vst [vmem:[%s154_s3] sm:$0xf] %v82_v8 }
  0x96   :  { %v69_v9 = vpop.f32.mrf.mxu0 }

// kernel: _lambda_.56
= control target key start
LH: loop header
LB: loop body
LE: loop exit
PB: predicated region body
PF: predicated region fallthrough
CT: control target
= control target key end

     0   :  { %vm27_vm0 = vcmask 261120   ;;  %v144_v3 = vmov 32.0   ;;  %vm68_vm5 = vcmask 257024   ;;  %s199_s0 = inlined_call_operand.vmem [shape: bf16[8,32], index: 0, kind: input, shape index: {}]   ;;  %s200_s1 = inlined_call_operand.vmem [shape: f32[1,32], index: 1, kind: input, shape index: {}]   ;;  %s201_s2 = inlined_call_operand.vmem [shape: f32[1,32], index: 2, kind: input, shape index: {}]   ;;  %s202_s4 = inlined_call_operand.vmem [shape: f32[1,128], index: 4, kind: input, shape index: {}]   ;;  %s203_s3 = inlined_call_operand.vmem [shape: bf16[32,128], index: 3, kind: input, shape index: {}]   ;;  %s204_s5 = inlined_call_operand.vmem [shape: bf16[8,128], index: 5, kind: output, shape index: {}]  }
   0x1   :  { %v25_v0 = vld [vmem:[%s199_s0] sm:$0xf]  ;;  %138 = vrcp.f32 %v144_v3  ;;  %v133_v15 = vld [vmem:[%s203_s3 + $0x8] sm:$0xff] }
   0x2   :  { %v26_v1 = vunpack.c.l.bf16 %v25_v0  ;;  %101 = vmatpush.bf16.msra.mxu0 %v133_v15  ;;  %v132_v17 = vld [vmem:[%s203_s3] sm:$0xff] }
   0x3   :  { %v135_v26 = vld [vmem:[%s200_s1] ss:$0 sm:$0xff] }
   0x4   :  { %v28_v2 = vsel %vm27_vm0, %v26_v1, 0.0  ;;  %v136_v28 = vld [vmem:[%s201_s2] ss:$0 sm:$0xff] }
   0x5   :  { %29 = vadd.xlane.f32.xlu0 %v28_v2  ;;  %v137_v34 = vld [vmem:[%s202_s4] ss:$0 sm:$0xff] }
   0x6   :  { %102 = vmatpush.bf16.msra.mxu0 %v132_v17 }
   0x7   :  { %v139_v4 = vpop.eup %138 }
   0x8   :  { %v32_v5 = vmul.f32 32.0, %v139_v4  ;;  %vm36_vm1 = vweird.f32 %v139_v4 }
   0xa   :  { %v33_v6 = vsub.f32 1.0, %v32_v5 }
   0xc   :  { %v34_v7 = vmul.f32 %v139_v4, %v33_v6 }
   0xe   :  { %v35_v8 = vadd.f32 %v139_v4, %v34_v7 }
  0x10   :  { %v37_v9 = vsel %vm36_vm1, %v139_v4, %v35_v8 }
  0x78   :  { %v30_v10 = vpop.xlane.xlu0 %29 }
  0x79   :  { %v38_v11 = vmul.f32 %v37_v9, %v30_v10 }
  0x7b   :  { %v39_v12 = vsub.f32 %v26_v1, %v38_v11 }
  0x7d   :  { %v40_v13 = vmul.f32 %v39_v12, %v39_v12 }
  0x7f   :  { %v41_v14 = vsel %vm27_vm0, %v40_v13, 0.0 }
  0x80   :  { %42 = vadd.xlane.f32.xlu0 %v41_v14 }
  0xf3   :  { %v43_v16 = vpop.xlane.xlu0 %42 }
  0xf4   :  { %v44_v18 = vmul.f32 %v43_v16, %v37_v9 }
  0xf6   :  { %v45_v19 = vadd.f32 1e-05, %v44_v18 }
  0xf8   :  { %140 = vrsqrt.f32 %v45_v19  ;;  %vm52_vm3 = vweird.f32 %v45_v19 }
  0xfe   :  { %v141_v20 = vpop.eup %140 }
  0xff   :  { %v47_v21 = vmul.f32 %v141_v20, %v45_v19  ;;  %vm53_vm2 = vweird.f32 %v141_v20 }
 0x100   :  { %vm54_vm4 = vmor %vm52_vm3, %vm53_vm2 }
 0x101   :  { %v48_v22 = vmul.f32 %v141_v20, %v47_v21 }
 0x103   :  { %v49_v23 = vmul.f32 0.5, %v48_v22 }
 0x105   :  { %v50_v24 = vsub.f32 1.5, %v49_v23 }
 0x107   :  { %v51_v25 = vmul.f32 %v141_v20, %v50_v24 }
 0x109   :  { %v55_v27 = vsel %vm54_vm4, %v141_v20, %v51_v25 }
 0x10a   :  { %v56_v29 = vmul.f32 %v55_v27, %v39_v12 }
 0x10c   :  { %v61_v30 = vmul.f32 %v135_v26, %v56_v29 }
 0x10e   :  { %v66_v31 = vadd.f32 %v136_v28, %v61_v30 }
 0x110   :  { %v67_v32 = vpack.c.bf16 %v66_v31, %v66_v31 }
 0x112   :  { %69 = vst.msk [vmem:[#allocation2] sm:$0xf] %vm68_vm5, %v67_v32 }
 0x119   :  { %v70_v33 = vld [vmem:[#allocation2] sm:$0xf] }
 0x11a   :  { %131 = vmatmul.msk.bf16.vlgmr.msra.gmra.mxu0 %vm27_vm0, %v70_v33 }
 0x197   :  { %v104_v35 = vpop.f32.mrf.mxu0 }
 0x198   :  { %v105_v36 = vadd.f32 %v137_v34, %v104_v35 }
 0x19a   :  { %v108_v37 = vmul.f32 %v105_v36, %v105_v36 }
 0x19c   :  { %v109_v38 = vmul.f32 %v108_v37, %v105_v36 }
 0x19e   :  { %v110_v39 = vmul.f32 0.044715, %v109_v38 }
 0x19f   :  { %v106_v40 = vpop.f32.mrf.mxu0 }
 0x1a0   :  { %v111_v41 = vadd.f32 %v110_v39, %v105_v36 }
 0x1a2   :  { %v112_v42 = vmul.f32 0.7978846, %v111_v41 }
 0x1a4   :  { %142 = vtanh.f32 %v112_v42 }
 0x1aa   :  { %v143_v43 = vpop.eup %142 }
 0x1ab   :  { %v114_v44 = vadd.f32 1.0, %v143_v43 }
 0x1ad   :  { %v115_v45 = vmul.f32 0.5, %v114_v44 }
 0x1af   :  { %v116_v46 = vmul.f32 %v115_v45, %v105_v36 }
 0x1b1   :  { %v117_v47 = vpack.c.bf16 %v116_v46, %v116_v46 }
 0x1b3   :  { %118 = vst [vmem:[%s204_s5] sm:$0xf] %v117_v47 }

// kernel: _lambda_.70
= control target key start
LH: loop header
LB: loop body
LE: loop exit
PB: predicated region body
PF: predicated region fallthrough
CT: control target
= control target key end

     0   :  { %s777_s15 = smov 0   ;;  %s779_s16 = smov 0   ;;  %s860_s0 = inlined_call_operand.vmem [shape: bf16[2,4,8,8], index: 0, kind: input, shape index: {}]   ;;  %s861_s1 = inlined_call_operand.vmem [shape: bf16[2,4,4,8], index: 1, kind: input, shape index: {}]   ;;  %s862_s2 = inlined_call_operand.vmem [shape: bf16[2,4,4,8], index: 2, kind: input, shape index: {}]   ;;  %s863_s3 = inlined_call_operand.vmem [shape: f32[2,1,4], index: 3, kind: input, shape index: {}]   ;;  %s864_s4 = inlined_call_operand.vmem [shape: bf16[2,4,8,8], index: 4, kind: output, shape index: {}]  }
   0x1   :  { %s781_s17 = smov 0   ;;  %s783_s18 = smov 0  }
   0x2   :  { %s785_s19 = smov 0  }
   0x3 LB: > { %s36_s20 = sadd.s32 1, %s739_s17  ;;  %s40_s21 = sadd.s32 1, %s743_s18  ;;  %s747_s19 = sphi %s785_s19, %s14_s19   ;;  %s743_s18 = sphi %s783_s18, %s868_s18   ;;  %s739_s17 = sphi %s781_s17, %s867_s17   ;;  %s735_s16 = sphi %s779_s16, %s866_s16   ;;  %s731_s15 = sphi %s777_s15, %s865_s15  }
   0x4   : > { %p38_p0 = scmp.ge.s32.totalorder %s36_s20, 4  ;;  %p644_p1 = scmp.ge.s32.totalorder %s747_s19, 1 }
   0x5   : > { %p255_p2 = scmp.lt.s32.totalorder %s747_s19, 9 }
   0x6   : > { %s870_s20 = smov (%p38_p0, %s36_s20), 0  ;;  %s872_s21 = smov (!%p38_p0, %s40_s21), %s743_s18 }
   0x7   : > { %p256_p3 = pnand %p644_p1, %p255_p2  ;;  %p42_p4 = scmp.ge.s32.totalorder %s872_s21, 2 }
   0x8   : > { %p321_p5 = scmp.lt.s32.totalorder (!%p256_p3), %s735_s16, 1  ;;  %p323_p6 = scmp.lt.s32.totalorder (!%p256_p3), %s731_s15, 3 }
   0x9   : > { %s874_s21 = smov (%p42_p4, %s872_s21), 0  ;;  %259 = sbr.rel (%p256_p3) target bundleno = 630 (0x276), region = 36 }
   0xe   : > { %vm376_vm0 = vcmask 7168   ;;  %v749_v0 = vmov 0.0   ;;  %vm379_vm1 = vcmask 64512   ;;  %s876_s16 = smov (!%p321_p5, %s735_s16), 1  ;;  %s878_s15 = smov (!%p323_p6, %s731_s15), 3  ;;  %v750_v4 = vmov 0  }
   0xf   : > { %378 = vst.msk [vmem:[#allocation3] sm:$0xff] %vm376_vm0, %v749_v0  ;;  %s645_s22 = sshll.u32 %s876_s16, 2  ;;  %700 = vset.pattern.permute.xlu0 %v750_v4  ;;  %701 = vset.pattern.permute.xlu1 %v750_v4  ;;  %v751_v5 = vmov -inf   ;;  %s359_s8 = scalar_lea.vmem %s863_s3, %s876_s16  ;;  %vm411_vm4 = vcmask 31744   ;;  %vm446_vm5 = vcmask 1041408   ;;  %vm479_vm6 = vcmask 60416  }
  0x10   : > { %380 = vst.msk [vmem:[#allocation4] sm:$0xff] %vm379_vm1, %v749_v0  ;;  %s809_s23 = sadd.s32 %s645_s22, %s878_s15  ;;  %702 = vset.pattern.permute.xlu2 %v750_v4  ;;  %v384_v6 = vld [vmem:[%s359_s8] sm:$0x1] }
  0x11   : > { %s648_s24 = sshll.u32 %s809_s23, 1  ;;  %s646_s28 = sshll.u32 %s809_s23, 2  ;;  %377 = vst.msk [vmem:[#allocation2] sm:$0xff] %vm376_vm0, %v751_v5  ;;  %vm385_vm2 = vcmp.gt.f32.partialorder %v384_v6, 0.0 }
  0x12   : > { %s342_s27 = scalar_lea.vmem %s861_s1, %s648_s24  ;;  %s331_s5 = scalar_lea.vmem %s860_s0, %s646_s28  ;;  %v406_v7 = vsel %vm385_vm2, 1, %v750_v4 }
  0x13   : > { %v382_v1 = vld [vmem:[%s342_s27] sm:$0x3]  ;;  %v407_v8 = vperm.slane %v406_v7, 0  ;;  %s353_s11 = scalar_lea.vmem %s862_s2, %s648_s24  ;;  %s370_s14 = scalar_lea.vmem %s864_s4, %s646_s28 }
  0x14   : > { %v391_v2 = vsel %vm379_vm1, %v382_v1, 0  ;;  %v381_v3 = vld [vmem:[%s331_s5] sm:$0xf] }
  0x15   : > { %400 = vmatpush.bf16.xpose.msra.mxu0 %v391_v2  ;;  %vm408_vm3 = vcmp.eq.s32.totalorder %v407_v8, 1  ;;  %v383_v17 = vld [vmem:[%s353_s11] sm:$0x3] }
  0x16   : > { %v448_v18 = vsel %vm446_vm5, %v383_v17, 0  ;;  %v427_v27 = vld [vmem:[#allocation3] sm:$0xff] }
  0x17   : > { %457 = vmatpush.bf16.msra.mxu1 %v448_v18  ;;  %v435_v35 = vld [vmem:[#allocation4] sm:$0xff] }
  0x18   : > { %v410_v13 = vld [vmem:[#allocation2] sm:$0xff] }
  0x1c   : > { %653 = vmatmul.msk.bf16.vlgmr.msra.gmra.mxu0 %vm379_vm1, %v381_v3 }
  0x99   : > { %v402_v9 = vpop.f32.mrf.mxu0 }
  0x9a   : > { %v409_v10 = vsel %vm408_vm3, %v402_v9, -1e+09 }
  0x9b   : > { %v412_v11 = vsel %vm411_vm4, %v409_v10, -inf }
  0x9c   : > { %413 = vmax.xlane.f32.xlu0 %v412_v11 }
  0xa1   : > { %v404_v12 = vpop.f32.mrf.mxu0 }
 0x10f   : > { %v414_v14 = vpop.xlane.xlu0 %413 }
 0x110   : > { %v415_v15 = vmax.f32 %v410_v13, %v414_v14 }
 0x112   : > { %v416_v16 = vsub.f32 %v410_v13, %v415_v15  ;;  %465 = vst.msk [vmem:[#allocation2] sm:$0xff] %vm376_vm0, %v415_v15  ;;  %421 = vperm.xlu0 %700, %v415_v15  }
 0x114   : > { %v417_v25 = vmul.f32 1.442695, %v416_v16 }
 0x184   : > { %v422_v19 = vpop.permute.xlu0 %421 }
 0x185   : > { %v424_v20 = vsub.f32 %v409_v10, %v422_v19 }
 0x187   : > { %v425_v21 = vmul.f32 1.442695, %v424_v20 }
 0x189   : > { %703 = vpow2.f32 %v425_v21 }
 0x18a   : > { %705 = vpow2.f32 %v417_v25 }
 0x18f   : > { %v704_v22 = vpop.eup %703 }
 0x190   : > { %v429_v23 = vsel %vm411_vm4, %v704_v22, 0.0  ;;  %v442_v24 = vpack.c.bf16 %v704_v22, %v704_v22  ;;  %v706_v26 = vpop.eup %705 }
 0x191   : > { %430 = vadd.xlane.f32.xlu1 %v429_v23  ;;  %v428_v28 = vmul.f32 %v706_v26, %v427_v27 }
 0x192   : > { %654 = vmatmul.msk.bf16.vlgmr.msra.gmra.mxu1 %vm411_vm4, %v442_v24 }
 0x1aa   : > { %438 = vperm.xlu1 %701, %v706_v26  }
 0x204   : > { %v431_v29 = vpop.xlane.xlu1 %430 }
 0x205   : > { %v432_v30 = vadd.f32 %v431_v29, %v428_v28 }
 0x207   : > { %434 = vst.msk [vmem:[#allocation3] sm:$0xff] %vm376_vm0, %v432_v30 }
 0x20e   : > { %v470_v31 = vld [vmem:[#allocation3] sm:$0xff] }
 0x20f   : > { %v459_v32 = vpop.f32.mrf.mxu1  ;;  %707 = vrcp.f32 %v470_v31 }
 0x215   : > { %v708_v33 = vpop.eup %707 }
 0x216   : > { %474 = vperm.xlu2 %702, %v708_v33  }
 0x217   : > { %v461_v34 = vpop.f32.mrf.mxu1 }
 0x21c   : > { %v439_v36 = vpop.permute.xlu1 %438 }
 0x21d   : > { %v441_v37 = vmul.f32 %v439_v36, %v435_v35 }
 0x21f   : > { %v463_v38 = vadd.f32 %v459_v32, %v441_v37 }
 0x221   : > { %464 = vst.msk [vmem:[#allocation4] sm:$0xff] %vm379_vm1, %v463_v38 }
 0x228   : > { %v469_v39 = vld [vmem:[#allocation4] sm:$0xff] }
 0x270   : > { %v475_v40 = vpop.permute.xlu2 %474 }
 0x271   : > { %v477_v41 = vmul.f32 %v475_v40, %v469_v39 }
 0x273   : > { %v478_v42 = vpack.c.bf16 %v477_v41, %v477_v41 }
 0x275   : > { %480 = vst.msk [vmem:[%s370_s14] sm:$0xf] %vm479_vm6, %v478_v42 }
 0x276 PF: > { %s14_s19 = sadd.s32 1, %s747_s19   ;;  %s865_s15 = smov %s739_s17 }
 0x277   : > { %p11_p7 = scmp.ge.s32.totalorder %s14_s19, 10   ;;  %s866_s16 = smov %s743_s18 }
 0x278   : > { %s867_s17 = smov %s870_s20  ;;  %s868_s18 = smov %s874_s21 }
 0x279   :  { %13 = sbr.rel (!%p11_p7) target bundleno = 3 (0x3), region = 83 }

// kernel: _lambda_.59
= control target key start
LH: loop header
LB: loop body
LE: loop exit
PB: predicated region body
PF: predicated region fallthrough
CT: control target
= control target key end

     0   :  { %vm24_vm0 = vcmask 1043456   ;;  %vm20_vm1 = vcmask 64512   ;;  %vm54_vm2 = vcmask 130048   ;;  %s126_s1 = inlined_call_operand.vmem [shape: bf16[8,16], index: 1, kind: input, shape index: {}]   ;;  %s127_s0 = inlined_call_operand.vmem [shape: bf16[8,8], index: 0, kind: input, shape index: {}]   ;;  %s128_s3 = inlined_call_operand.vmem [shape: f32[1,128], index: 3, kind: input, shape index: {}]   ;;  %s129_s2 = inlined_call_operand.vmem [shape: bf16[16,128], index: 2, kind: input, shape index: {}]   ;;  %s130_s4 = inlined_call_operand.vmem [shape: bf16[8,128], index: 4, kind: output, shape index: {}]  }
   0x1   :  { %v19_v0 = vld [vmem:[%s126_s1] sm:$0xf] }
   0x2   :  { %v26_v1 = vsel %vm24_vm0, %v19_v0, 0  ;;  %v18_v2 = vld [vmem:[%s127_s0] sm:$0xf] }
   0x3   :  { %35 = vmatpush.bf16.msra.mxu0 %v26_v1  ;;  %v84_v3 = vld [vmem:[%s129_s2] sm:$0xff] }
   0x4   :  { %65 = vmatpush.bf16.msra.mxu1 %v84_v3  ;;  %v85_v7 = vld [vmem:[%s128_s3] ss:$0 sm:$0xff] }
   0x6   :  { %78 = vmatmul.msk.bf16.vlgmr.msra.gmra.mxu0 %vm20_vm1, %v18_v2 }
  0x83   :  { %v37_v4 = vpop.f32.mrf.mxu0 }
  0x84   :  { %v41_v5 = vpack.c.bf16 %v37_v4, %v37_v4 }
  0x86   :  { %83 = vmatmul.msk.bf16.vlgmr.msra.gmra.mxu1 %vm54_vm2, %v41_v5 }
  0x8b   :  { %v39_v6 = vpop.f32.mrf.mxu0 }
 0x103   :  { %v67_v8 = vpop.f32.mrf.mxu1 }
 0x104   :  { %v68_v9 = vadd.f32 %v85_v7, %v67_v8 }
 0x106   :  { %v71_v10 = vmax.f32 %v68_v9, 0.0 }
 0x108   :  { %v72_v11 = vpack.c.bf16 %v71_v10, %v71_v10 }
 0x10a   :  { %73 = vst [vmem:[%s130_s4] sm:$0xf] %v72_v11 }
 0x10b   :  { %v69_v12 = vpop.f32.mrf.mxu1 }

// kernel: _lambda_.60
= control target key start
LH: loop header
LB: loop body
LE: loop exit
PB: predicated region body
PF: predicated region fallthrough
CT: control target
= control target key end

     0   :  { %vm24_vm0 = vcmask 1043456   ;;  %vm20_vm1 = vcmask 64512   ;;  %vm124_vm2 = vcmask 125952   ;;  %s233_s1 = inlined_call_operand.vmem [shape: bf16[8,128], index: 1, kind: input, shape index: {}]   ;;  %s234_s0 = inlined_call_operand.vmem [shape: bf16[8,8], index: 0, kind: input, shape index: {}]   ;;  %s235_s2 = inlined_call_operand.vmem [shape: bf16[128,16], index: 2, kind: input, shape index: {}]   ;;  %s236_s3 = inlined_call_operand.vmem [shape: f32[1,16], index: 3, kind: input, shape index: {}]   ;;  %s237_s4 = inlined_call_operand.vmem [shape: bf16[8,16], index: 4, kind: output, shape index: {}]  }
   0x1   :  { %v19_v0 = vld [vmem:[%s233_s1] sm:$0xf]  ;;  %v170_v1 = vld [vmem:[%s235_s2 + $0x38] sm:$0xff]  ;;  %v169_v4 = vld [vmem:[%s235_s2 + $0x30] sm:$0xff] }
   0x2   :  { %v26_v2 = vsel %vm24_vm0, %v19_v0, 0  ;;  %v18_v3 = vld [vmem:[%s234_s0] sm:$0xf]  ;;  %110 = vmatpush.bf16.msra.mxu1 %v170_v1  ;;  %v168_v5 = vld [vmem:[%s235_s2 + $0x28] sm:$0xff]  ;;  %v166_v7 = vld [vmem:[%s235_s2 + $0x18] sm:$0xff] }
   0x3   :  { %35 = vmatpush.bf16.msra.mxu0 %v26_v2  ;;  %v167_v6 = vld [vmem:[%s235_s2 + $0x20] sm:$0xff]  ;;  %v165_v8 = vld [vmem:[%s235_s2 + $0x10] sm:$0xff]  ;;  %v164_v9 = vld [vmem:[%s235_s2 + $0x8] sm:$0xff] }
   0x4   :  { %v163_v10 = vld [vmem:[%s235_s2] sm:$0xff] }
   0x5   :  { %v171_v14 = vld [vmem:[%s236_s3] ss:$0 sm:$0xff] }
   0x6   :  { %130 = vmatmul.msk.bf16.vlgmr.msra.gmra.mxu0 %vm20_vm1, %v18_v3  ;;  %111 = vmatpush.bf16.msra.mxu1 %v169_v4 }
   0xa   :  { %112 = vmatpush.bf16.msra.mxu1 %v168_v5 }
   0xe   :  { %113 = vmatpush.bf16.msra.mxu1 %v167_v6 }
  0x12   :  { %114 = vmatpush.bf16.msra.mxu1 %v166_v7 }
  0x16   :  { %115 = vmatpush.bf16.msra.mxu1 %v165_v8 }
  0x1a   :  { %116 = vmatpush.bf16.msra.mxu1 %v164_v9 }
  0x1e   :  { %117 = vmatpush.bf16.msra.mxu1 %v163_v10 }
  0x83   :  { %v37_v11 = vpop.f32.mrf.mxu0 }
  0x84   :  { %v41_v12 = vpack.c.bf16 %v37_v11, %v37_v11 }
  0x86   :  { %118 = vmatmul.bf16.vlgmr.msra.gmra.mxu1 %v41_v12 }
  0x8b   :  { %v39_v13 = vpop.f32.mrf.mxu0 }
 0x103   :  { %v119_v15 = vpop.f32.mrf.mxu1 }
 0x104   :  { %v120_v16 = vadd.f32 %v171_v14, %v119_v15 }
 0x106   :  { %v123_v17 = vpack.c.bf16 %v120_v16, %v120_v16 }
 0x108   :  { %125 = vst.msk [vmem:[%s237_s4] sm:$0xf] %vm124_vm2, %v123_v17 }
 0x10b   :  { %v121_v18 = vpop.f32.mrf.mxu1 }

// kernel: _lambda_.74
= control target key start
LH: loop header
LB: loop body
LE: loop exit
PB: predicated region body
PF: predicated region fallthrough
CT: control target
= control target key end

     0   :  { %vm30_vm0 = vcmask 130048   ;;  %s103_s1 = inlined_call_operand.vmem [shape: bf16[16,128], index: 1, kind: input, shape index: {}]   ;;  %s104_s0 = inlined_call_operand.vmem [shape: bf16[8,16], index: 0, kind: input, shape index: {}]   ;;  %s105_s2 = inlined_call_operand.vmem [shape: f32[1,128], index: 2, kind: input, shape index: {}]   ;;  %s106_s3 = inlined_call_operand.vmem [shape: bf16[8,128], index: 3, kind: output, shape index: {}]  }
   0x1   :  { %v69_v0 = vld [vmem:[%s103_s1] sm:$0xff] }
   0x2   :  { %41 = vmatpush.bf16.msra.mxu0 %v69_v0  ;;  %v21_v1 = vld [vmem:[%s104_s0] sm:$0xf] }
   0x3   :  { %v70_v2 = vld [vmem:[%s105_s2] ss:$0 sm:$0xff] }
   0x5   :  { %68 = vmatmul.msk.bf16.vlgmr.msra.gmra.mxu0 %vm30_vm0, %v21_v1 }
  0x82   :  { %v43_v3 = vpop.f32.mrf.mxu0 }
  0x83   :  { %v57_v4 = vadd.f32 %v70_v2, %v43_v3 }
  0x85   :  { %v58_v5 = vpack.c.bf16 %v57_v4, %v57_v4 }
  0x87   :  { %59 = vst [vmem:[%s106_s3] sm:$0xf] %v58_v5 }
  0x8a   :  { %v45_v6 = vpop.f32.mrf.mxu0 }

</bundles_post_ra>
